<compile_context>
chip_gen: v7x
topology: tpu7x:2x2x1
jax: 0.10.0
libtpu: 0.0.40
codegen_flags: <defaults>
</compile_context>

<pallas_src>
import functools
import math

import jax
import jax.numpy as jnp
from jax import lax
from jax.experimental import pallas as pl
from jax.experimental.pallas import tpu as pltpu


def _dynamic_routing_kernel(
    u_ref,       # (Bt, N, D_in)   primary attrs
    scale_ref,   # (A, D_in)       LayerNorm(codes @ scale_w^T), precomputed
    mod_wT_ref,  # (D_in, D_out)   ModFC.native_weight^T
    mod_b_ref,   # (1, D_out)      ModFC.native_bias
    t_wT_ref,    # (D_in, D_out)   transform[0].weight^T
    t_b_ref,     # (1, D_out)      transform[0].bias
    v_ref,       # out (Bt, A, D_out)
    c_ref,       # out (Bt, A, N)  (lane = N; wrapper expands to (B, N, A, 1))
    *,
    routing_iter: int,
):
    u3 = u_ref[...]
    scale = scale_ref[...]
    mod_wT = mod_wT_ref[...]
    mod_b = mod_b_ref[...]
    t_wT = t_wT_ref[...]
    t_b = t_b_ref[...]

    Bt, N, D_in = u3.shape
    A = scale.shape[0]
    D_out = mod_wT.shape[1]
    f32 = jnp.float32

    # transform(u): single flattened MXU matmul (batch folded into M).
    ut2 = jnp.dot(u3.reshape(Bt * N, D_in), t_wT,
                  preferred_element_type=f32) + t_b            # (Bt*N, D_out)
    ut3 = ut2.reshape(Bt, N, D_out)
    # ||ut||^2 per n, with n on the lane axis; loop-invariant.
    w1 = jnp.sum(ut3 * ut3, axis=-1)[:, None, :]               # (Bt, 1, N)

    # Hoisted broadcasts (JAX does not CSE broadcast_in_dim inside the loop).
    scale_b3 = jnp.broadcast_to(scale[None], (Bt, A, D_in))
    mod_b_b3 = jnp.broadcast_to(mod_b[None], (Bt, A, D_out))

    # v_init = mean_n u_pred, via linearity of u_pred in u (u_pred is never
    # materialized as an (N, A, D_out) tensor).
    usum = jnp.sum(u3, axis=1, keepdims=True)                  # (Bt, 1, D_in)
    v0 = (jnp.dot((usum * scale_b3).reshape(Bt * A, D_in), mod_wT,
                  preferred_element_type=f32).reshape(Bt, A, D_out)
          * (1.0 / N) + mod_b_b3)                              # (Bt, A, D_out)

    b3 = jnp.zeros((Bt, A, N), f32)
    c3 = jnp.full((Bt, A, N), 1.0 / A, f32)
    s3 = v0

    def one_iter(carry):
        s3, b3, c3 = carry
        # cosine similarity between ut[n] and s[a]; NT batched contraction,
        # so no explicit transpose of ut is needed.
        w12 = jnp.einsum("bao,bno->ban", s3, ut3,
                         preferred_element_type=f32)           # (Bt, A, N)
        w2 = jnp.sum(s3 * s3, axis=-1, keepdims=True)          # (Bt, A, 1)
        b3 = b3 + w12 * lax.rsqrt(jnp.maximum(w1 * w2, 1e-16))
        # softmax over the out_attr axis (A = sublane axis in this layout).
        m = jnp.max(b3, axis=1, keepdims=True)
        e = jnp.exp(b3 - m)
        c3 = e * pl.reciprocal(jnp.sum(e, axis=1, keepdims=True), approx=False)
        # TODO(synk): nn.Dropout(p) on c is identity at inference; training
        # mode (random mask + 1/(1-p) scaling) is not implemented here.
        # s = sum_n(c*u_pred) / (1e-8 + sum_n c); u_pred is linear in u, so
        #   sum_n c*u_pred = ((c @ u) * scale) @ mod_w^T + (sum_n c) * bias
        cu = jnp.einsum("ban,bni->bai", c3, u3,
                        preferred_element_type=f32)            # (Bt, A, D_in)
        csum = jnp.sum(c3, axis=-1, keepdims=True)             # (Bt, A, 1)
        num = (jnp.dot((cu * scale_b3).reshape(Bt * A, D_in), mod_wT,
                       preferred_element_type=f32).reshape(Bt, A, D_out)
               + csum * mod_b_b3)
        s3 = num * pl.reciprocal(1e-8 + csum, approx=False)
        return s3, b3, c3

    carry = (s3, b3, c3)
    if routing_iter <= 4:
        for _ in range(routing_iter):   # short static trip count: unrolled
            carry = one_iter(carry)
    else:
        # Bound live ranges / vreg pressure for long routing schedules.
        carry = lax.fori_loop(0, routing_iter, lambda _, c: one_iter(c), carry)
    s3, b3, c3 = carry

    v = (v0 + s3) if routing_iter >= 1 else v0
    v_ref[...] = jnp.maximum(v, 0.0)                           # ReLU
    c_ref[...] = c3


def _tpu_generation():
    """Best-effort (VMEM bytes, TensorCores-per-chip) with safe fallbacks."""
    vmem_bytes = 64 << 20    # conservative default: v7x physical VMEM per TC
    num_tc = 1               # v5e / v6e: 1 TensorCore per chip
    try:
        info = pltpu.get_tpu_info()
        vmem_bytes = int(getattr(info, "vmem_capacity_bytes", vmem_bytes))
    except Exception:
        pass
    try:
        kind = jax.devices()[0].device_kind.lower()
        if "v7" in kind or "7x" in kind:
            num_tc = 2       # v7x: 2 TensorCores per chip share the grid
    except Exception:
        pass
    return vmem_bytes, num_tc


def _pick_batch_tile(B, N, D_in, D_out, A, vmem_bytes, num_tc, cap=64):
    # f32 VMEM footprint of one grid step, per batch element.  Pipelined
    # input/output blocks are double-buffered by Pallas; routing temporaries
    # are single-buffered.
    dbuf = 2
    per_elem = 4 * (
        dbuf * N * D_in                  # u block (pipelined)
        + dbuf * (A * D_out + A * N)     # v, c output blocks (pipelined)
        + N * D_out                      # ut
        + 4 * A * N                      # b3, c3, w12, e
        + 2 * A * D_in                   # cu, cu*scale
        + 3 * A * D_out                  # v0, s, num
    )
    budget = int(vmem_bytes * 0.4)       # headroom under the scoped limit
    cap = max(1, min(cap, budget // max(per_elem, 1)))
    bt = 1
    for cand in range(1, min(B, cap) + 1):
        if B % cand != 0:
            continue
        # Only 2-TC parts (v7x) benefit from >=2 grid steps (the "parallel"
        # axis shards across TensorCores); on 1-TC parts the grid is a serial
        # loop, so fewer/fatter steps amortize the ~0.35us per-step overhead.
        if num_tc >= 2 and B >= 2 and B // cand < 2:
            continue
        bt = cand
    return bt


def dynamic_routing_forward(feature, params, *, in_attr_dim, out_attr_num,
                            out_attr_dim, routing_iter, batch_tile=None):
    B, C, H, W = feature.shape
    D_in, A, D_out = in_attr_dim, out_attr_num, out_attr_dim
    g = C // D_in
    N = g * H * W

    # primary_attrs: reshape/transpose glue (one XLA copy).
    # TODO(synk): for large H*W this is a full extra HBM write+read of the
    # activations; feeding `feature` directly would require a rank-5 relayout
    # inside the kernel, which Mosaic does not lower cleanly today.
    u = feature.reshape(B, g, D_in, H, W).transpose(0, 1, 3, 4, 2)
    u = u.reshape(B, N, D_in).astype(jnp.float32)

    # ---- parameter-only work, hoisted out of the kernel (same for every b).
    codes = params["codes"][0].astype(jnp.float32)              # (A, D_out)
    scale_raw = codes @ params["scale_w"].astype(jnp.float32).T
    mu = jnp.mean(scale_raw, axis=-1, keepdims=True)
    var = jnp.mean((scale_raw - mu) ** 2, axis=-1, keepdims=True)
    scale = (scale_raw - mu) * lax.rsqrt(var + 1e-5)             # LayerNorm, no affine

    mod_wT = params["mod_w"].astype(jnp.float32).T               # (D_in, D_out)
    mod_b = params["mod_b"].astype(jnp.float32).reshape(1, D_out)
    t_wT = params["t_w"].astype(jnp.float32).T                   # (D_in, D_out)
    t_b = params["t_b"].astype(jnp.float32).reshape(1, D_out)

    vmem_bytes, num_tc = _tpu_generation()
    bt = batch_tile if batch_tile is not None else _pick_batch_tile(
        B, N, D_in, D_out, A, vmem_bytes, num_tc)
    assert B % bt == 0, (B, bt)
    grid = (B // bt,)
    vmem_limit = max(16 << 20, min(vmem_bytes * 3 // 4, 64 << 20))

    kernel = functools.partial(_dynamic_routing_kernel, routing_iter=routing_iter)
    v, c = pl.pallas_call(
        kernel,
        out_shape=(
            jax.ShapeDtypeStruct((B, A, D_out), jnp.float32),
            jax.ShapeDtypeStruct((B, A, N), jnp.float32),
        ),
        grid_spec=pltpu.PrefetchScalarGridSpec(
            num_scalar_prefetch=0,
            grid=grid,
            in_specs=[
                pl.BlockSpec((bt, N, D_in), lambda i: (i, 0, 0)),
                pl.BlockSpec((A, D_in), lambda i: (0, 0)),
                pl.BlockSpec((D_in, D_out), lambda i: (0, 0)),
                pl.BlockSpec((1, D_out), lambda i: (0, 0)),
                pl.BlockSpec((D_in, D_out), lambda i: (0, 0)),
                pl.BlockSpec((1, D_out), lambda i: (0, 0)),
            ],
            out_specs=(
                pl.BlockSpec((bt, A, D_out), lambda i: (i, 0, 0)),
                pl.BlockSpec((bt, A, N), lambda i: (i, 0, 0)),
            ),
        ),
        compiler_params=pltpu.CompilerParams(
            dimension_semantics=("parallel",),
            vmem_limit_bytes=vmem_limit,
        ),
    )(u, scale, mod_wT, mod_b, t_wT, t_b)

    # Back to the PyTorch layout: c is (B, N, A, 1).
    c = jnp.swapaxes(c, 1, 2)[..., None]
    return v, c


def init_params(key, in_attr_dim, out_attr_num, out_attr_dim):
    D_in, A, D_out = in_attr_dim, out_attr_num, out_attr_dim
    ks = jax.random.split(key, 5)

    def ku(k, shape, fan_in):  # kaiming_uniform(a=sqrt(5)) bound = 1/sqrt(fan_in)
        bound = 1.0 / math.sqrt(fan_in)
        return jax.random.uniform(k, shape, jnp.float32, -bound, bound)

    return {
        "mod_w": ku(ks[0], (D_out, D_in), D_in),       # ModFC.native_weight
        "mod_b": jnp.zeros((D_out,), jnp.float32),     # ModFC.native_bias
        "scale_w": ku(ks[1], (D_in, D_out), D_out),    # ModFC.scale.weight
        "codes": ku(ks[2], (1, A, D_out), A * D_out),  # DynamicRouting.codes
        "t_w": ku(ks[3], (D_out, D_in), D_in),         # transform[0].weight
        "t_b": ku(ks[4], (D_out,), D_in),              # transform[0].bias
    }


def reference_forward(feature, params, *, in_attr_dim, out_attr_num,
                      out_attr_dim, routing_iter):
    B, C, H, W = feature.shape
    D_in, A, D_out = in_attr_dim, out_attr_num, out_attr_dim
    g = C // D_in
    N = g * H * W
    u = feature.reshape(B, g, D_in, H, W).transpose(0, 1, 3, 4, 2).reshape(B, N, D_in)
    codes = params["codes"][0]
    scale_raw = codes @ params["scale_w"].T
    mu = scale_raw.mean(-1, keepdims=True)
    var = ((scale_raw - mu) ** 2).mean(-1, keepdims=True)
    scale = (scale_raw - mu) / jnp.sqrt(var + 1e-5)
    u_pred = jnp.einsum("bni,ai,oi->bnao", u, scale, params["mod_w"]) + params["mod_b"]
    ut = jnp.einsum("bni,oi->bno", u, params["t_w"]) + params["t_b"]
    v = u_pred.mean(1)
    s = v
    b = jnp.zeros((B, N, A), jnp.float32)
    c = jnp.full((B, N, A), 1.0 / A, jnp.float32)
    for _ in range(routing_iter):
        w12 = jnp.einsum("bno,bao->bna", ut, s)
        w1 = jnp.sum(ut * ut, -1)[:, :, None]
        w2 = jnp.sum(s * s, -1)[:, None, :]
        b = b + w12 / jnp.maximum(jnp.sqrt(w1 * w2), 1e-8)
        c = jax.nn.softmax(b, axis=-1)
        num = jnp.einsum("bna,bnao->bao", c, u_pred)
        den = 1e-8 + jnp.sum(c, axis=1)[:, :, None]
        s = num / den
    if routing_iter >= 1:
        v = v + s
    return jax.nn.relu(v), c[..., None]


if __name__ == "__main__":
    B, C, H, W = 2, 32, 4, 4
    in_attr_dim, out_attr_num, out_attr_dim = 16, 8, 32
    routing_iter = 3

    key = jax.random.PRNGKey(0)
    k_feat, k_par = jax.random.split(key)
    feature = jax.random.normal(k_feat, (B, C, H, W), jnp.float32)
    params = init_params(k_par, in_attr_dim, out_attr_num, out_attr_dim)

    v, c = dynamic_routing_forward(
        feature, params, in_attr_dim=in_attr_dim, out_attr_num=out_attr_num,
        out_attr_dim=out_attr_dim, routing_iter=routing_iter)
    jax.block_until_ready((v, c))

    v_ref, c_ref = reference_forward(
        feature, params, in_attr_dim=in_attr_dim, out_attr_num=out_attr_num,
        out_attr_dim=out_attr_dim, routing_iter=routing_iter)
    assert v.shape == (B, out_attr_num, out_attr_dim)
    assert c.shape == (B, (C // in_attr_dim) * H * W, out_attr_num, 1)
    assert jnp.allclose(v, v_ref, rtol=1e-3, atol=1e-3)
    assert jnp.allclose(c, c_ref, rtol=1e-3, atol=1e-3)
    print("KERNEL_OK")
</pallas_src>

<mosaic_0001>
module attributes {stable_mosaic.version = 11 : i64} {
  func.func @_dynamic_routing_kernel(%arg0: i32, %arg1: memref<2x32x16xf32, #tpu.memory_space<vmem>>, %arg2: memref<8x16xf32, #tpu.memory_space<vmem>>, %arg3: memref<16x32xf32, #tpu.memory_space<vmem>>, %arg4: memref<1x32xf32, #tpu.memory_space<vmem>>, %arg5: memref<16x32xf32, #tpu.memory_space<vmem>>, %arg6: memref<1x32xf32, #tpu.memory_space<vmem>>, %arg7: memref<2x8x32xf32, #tpu.memory_space<vmem>>, %arg8: memref<2x8x32xf32, #tpu.memory_space<vmem>>) attributes {dimension_semantics = [#tpu.dimension_semantics<parallel>], iteration_bounds = array<i64: 1>, scalar_prefetch = 0 : i64, scratch_operands = 0 : i64, tpu.core_type = #tpu.core_type<tc>, window_params = [{transform_indices = @transform_0, window_bounds = array<i64: 2, 32, 16>}, {pipeline_mode = #tpu.pipeline_mode<synchronous>, transform_indices = @transform_1, window_bounds = array<i64: 8, 16>}, {pipeline_mode = #tpu.pipeline_mode<synchronous>, transform_indices = @transform_2, window_bounds = array<i64: 16, 32>}, {pipeline_mode = #tpu.pipeline_mode<synchronous>, transform_indices = @transform_3, window_bounds = array<i64: 1, 32>}, {pipeline_mode = #tpu.pipeline_mode<synchronous>, transform_indices = @transform_4, window_bounds = array<i64: 16, 32>}, {pipeline_mode = #tpu.pipeline_mode<synchronous>, transform_indices = @transform_5, window_bounds = array<i64: 1, 32>}, {transform_indices = @transform_6, window_bounds = array<i64: 2, 8, 32>}, {transform_indices = @transform_7, window_bounds = array<i64: 2, 8, 32>}]} {
    %c0 = arith.constant 0 : index
    %c0_0 = arith.constant 0 : index
    %c0_1 = arith.constant 0 : index
    %0 = vector.load %arg1[%c0, %c0_0, %c0_1] : memref<2x32x16xf32, #tpu.memory_space<vmem>>, vector<2x32x16xf32>
    %c0_2 = arith.constant 0 : index
    %c0_3 = arith.constant 0 : index
    %1 = vector.load %arg2[%c0_2, %c0_3] : memref<8x16xf32, #tpu.memory_space<vmem>>, vector<8x16xf32>
    %c0_4 = arith.constant 0 : index
    %c0_5 = arith.constant 0 : index
    %2 = vector.load %arg3[%c0_4, %c0_5] : memref<16x32xf32, #tpu.memory_space<vmem>>, vector<16x32xf32>
    %c0_6 = arith.constant 0 : index
    %c0_7 = arith.constant 0 : index
    %3 = vector.load %arg4[%c0_6, %c0_7] : memref<1x32xf32, #tpu.memory_space<vmem>>, vector<1x32xf32>
    %c0_8 = arith.constant 0 : index
    %c0_9 = arith.constant 0 : index
    %4 = vector.load %arg5[%c0_8, %c0_9] : memref<16x32xf32, #tpu.memory_space<vmem>>, vector<16x32xf32>
    %c0_10 = arith.constant 0 : index
    %c0_11 = arith.constant 0 : index
    %5 = vector.load %arg6[%c0_10, %c0_11] : memref<1x32xf32, #tpu.memory_space<vmem>>, vector<1x32xf32>
    %6 = vector.shape_cast %0 : vector<2x32x16xf32> to vector<64x16xf32>
    %cst = arith.constant dense<0.000000e+00> : vector<64x32xf32>
    %7 = tpu.matmul %6, %4, %cst {dimension_numbers = #tpu.dot_dimension_numbers<[1], [0], [0], [1], [0, 0, 1, 1], [], []>} : vector<64x16xf32>, vector<16x32xf32>, vector<64x32xf32> -> vector<64x32xf32>
    %8 = vector.broadcast %5 : vector<1x32xf32> to vector<64x32xf32>
    %9 = arith.addf %7, %8 : vector<64x32xf32>
    %10 = vector.shape_cast %9 : vector<64x32xf32> to vector<2x32x32xf32>
    %11 = arith.mulf %10, %10 : vector<2x32x32xf32>
    %cst_12 = arith.constant dense<0.000000e+00> : vector<2x32xf32>
    %12 = vector.multi_reduction <add>, %11, %cst_12 [2] : vector<2x32x32xf32> to vector<2x32xf32>
    %13 = vector.shape_cast %12 : vector<2x32xf32> to vector<2x1x32xf32>
    %14 = vector.shape_cast %1 : vector<8x16xf32> to vector<1x8x16xf32>
    %15 = vector.shape_cast %14 : vector<1x8x16xf32> to vector<1x8x16xf32>
    %16 = vector.broadcast %15 : vector<1x8x16xf32> to vector<2x8x16xf32>
    %17 = vector.shape_cast %3 : vector<1x32xf32> to vector<1x1x32xf32>
    %18 = vector.shape_cast %17 : vector<1x1x32xf32> to vector<1x1x32xf32>
    %19 = vector.broadcast %18 : vector<1x1x32xf32> to vector<2x8x32xf32>
    %cst_13 = arith.constant dense<0.000000e+00> : vector<2x16xf32>
    %20 = vector.multi_reduction <add>, %0, %cst_13 [1] : vector<2x32x16xf32> to vector<2x16xf32>
    %21 = vector.shape_cast %20 : vector<2x16xf32> to vector<2x1x16xf32>
    %22 = vector.broadcast %21 : vector<2x1x16xf32> to vector<2x8x16xf32>
    %23 = arith.mulf %22, %16 : vector<2x8x16xf32>
    %24 = vector.shape_cast %23 : vector<2x8x16xf32> to vector<16x16xf32>
    %cst_14 = arith.constant dense<0.000000e+00> : vector<16x32xf32>
    %25 = tpu.matmul %24, %2, %cst_14 {dimension_numbers = #tpu.dot_dimension_numbers<[1], [0], [0], [1], [0, 0, 1, 1], [], []>} : vector<16x16xf32>, vector<16x32xf32>, vector<16x32xf32> -> vector<16x32xf32>
    %26 = vector.shape_cast %25 : vector<16x32xf32> to vector<2x8x32xf32>
    %cst_15 = arith.constant 3.125000e-02 : f32
    %27 = vector.broadcast %cst_15 : f32 to vector<2x8x32xf32>
    %28 = arith.mulf %26, %27 : vector<2x8x32xf32>
    %29 = arith.addf %28, %19 : vector<2x8x32xf32>
    %cst_16 = arith.constant 0.000000e+00 : f32
    %30 = vector.broadcast %cst_16 : f32 to vector<2x8x32xf32>
    "tpu.trace_start"() <{level = 10 : i32, message = "bao,bno->ban"}> : () -> ()
    %cst_17 = arith.constant dense<0.000000e+00> : vector<2x8x32xf32>
    %31 = tpu.matmul %29, %10, %cst_17 {dimension_numbers = #tpu.dot_dimension_numbers<[2], [2], [1], [1], [0, 0, 0, 1, 1, 1], [0], [0]>} : vector<2x8x32xf32>, vector<2x32x32xf32>, vector<2x8x32xf32> -> vector<2x8x32xf32>
    "tpu.trace_stop"() : () -> ()
    %32 = arith.mulf %29, %29 : vector<2x8x32xf32>
    %cst_18 = arith.constant dense<0.000000e+00> : vector<2x8xf32>
    %33 = vector.multi_reduction <add>, %32, %cst_18 [2] : vector<2x8x32xf32> to vector<2x8xf32>
    %34 = vector.shape_cast %33 : vector<2x8xf32> to vector<2x8x1xf32>
    %35 = vector.broadcast %13 : vector<2x1x32xf32> to vector<2x8x32xf32>
    %36 = vector.broadcast %34 : vector<2x8x1xf32> to vector<2x8x32xf32>
    %37 = arith.mulf %35, %36 : vector<2x8x32xf32>
    %cst_19 = arith.constant 1.000000e-16 : f32
    %38 = vector.broadcast %cst_19 : f32 to vector<2x8x32xf32>
    %39 = arith.maximumf %37, %38 : vector<2x8x32xf32>
    %40 = math.rsqrt %39 : vector<2x8x32xf32>
    %41 = arith.mulf %31, %40 : vector<2x8x32xf32>
    %42 = arith.addf %30, %41 : vector<2x8x32xf32>
    %cst_20 = arith.constant dense<0xFF800000> : vector<2x32xf32>
    %43 = vector.multi_reduction <maximumf>, %42, %cst_20 [1] : vector<2x8x32xf32> to vector<2x32xf32>
    %44 = vector.shape_cast %43 : vector<2x32xf32> to vector<2x1x32xf32>
    %45 = vector.broadcast %44 : vector<2x1x32xf32> to vector<2x8x32xf32>
    %46 = arith.subf %42, %45 : vector<2x8x32xf32>
    %47 = math.exp %46 : vector<2x8x32xf32>
    %cst_21 = arith.constant dense<0.000000e+00> : vector<2x32xf32>
    %48 = vector.multi_reduction <add>, %47, %cst_21 [1] : vector<2x8x32xf32> to vector<2x32xf32>
    %49 = vector.shape_cast %48 : vector<2x32xf32> to vector<2x1x32xf32>
    %50 = tpu.reciprocal %49 : vector<2x1x32xf32> -> vector<2x1x32xf32>
    %51 = vector.broadcast %50 : vector<2x1x32xf32> to vector<2x8x32xf32>
    %52 = arith.mulf %47, %51 : vector<2x8x32xf32>
    "tpu.trace_start"() <{level = 10 : i32, message = "ban,bni->bai"}> : () -> ()
    %cst_22 = arith.constant dense<0.000000e+00> : vector<2x8x16xf32>
    %53 = tpu.matmul %52, %0, %cst_22 {dimension_numbers = #tpu.dot_dimension_numbers<[2], [1], [1], [2], [0, 0, 0, 1, 1, 2], [0], [0]>} : vector<2x8x32xf32>, vector<2x32x16xf32>, vector<2x8x16xf32> -> vector<2x8x16xf32>
    "tpu.trace_stop"() : () -> ()
    %cst_23 = arith.constant dense<0.000000e+00> : vector<2x8xf32>
    %54 = vector.multi_reduction <add>, %52, %cst_23 [2] : vector<2x8x32xf32> to vector<2x8xf32>
    %55 = vector.shape_cast %54 : vector<2x8xf32> to vector<2x8x1xf32>
    %56 = arith.mulf %53, %16 : vector<2x8x16xf32>
    %57 = vector.shape_cast %56 : vector<2x8x16xf32> to vector<16x16xf32>
    %cst_24 = arith.constant dense<0.000000e+00> : vector<16x32xf32>
    %58 = tpu.matmul %57, %2, %cst_24 {dimension_numbers = #tpu.dot_dimension_numbers<[1], [0], [0], [1], [0, 0, 1, 1], [], []>} : vector<16x16xf32>, vector<16x32xf32>, vector<16x32xf32> -> vector<16x32xf32>
    %59 = vector.shape_cast %58 : vector<16x32xf32> to vector<2x8x32xf32>
    %60 = vector.broadcast %55 : vector<2x8x1xf32> to vector<2x8x32xf32>
    %61 = arith.mulf %60, %19 : vector<2x8x32xf32>
    %62 = arith.addf %59, %61 : vector<2x8x32xf32>
    %cst_25 = arith.constant 9.99999993E-9 : f32
    %63 = vector.broadcast %cst_25 : f32 to vector<2x8x1xf32>
    %64 = arith.addf %63, %55 : vector<2x8x1xf32>
    %65 = tpu.reciprocal %64 : vector<2x8x1xf32> -> vector<2x8x1xf32>
    %66 = vector.broadcast %65 : vector<2x8x1xf32> to vector<2x8x32xf32>
    %67 = arith.mulf %62, %66 : vector<2x8x32xf32>
    "tpu.trace_start"() <{level = 10 : i32, message = "bao,bno->ban"}> : () -> ()
    %cst_26 = arith.constant dense<0.000000e+00> : vector<2x8x32xf32>
    %68 = tpu.matmul %67, %10, %cst_26 {dimension_numbers = #tpu.dot_dimension_numbers<[2], [2], [1], [1], [0, 0, 0, 1, 1, 1], [0], [0]>} : vector<2x8x32xf32>, vector<2x32x32xf32>, vector<2x8x32xf32> -> vector<2x8x32xf32>
    "tpu.trace_stop"() : () -> ()
    %69 = arith.mulf %67, %67 : vector<2x8x32xf32>
    %cst_27 = arith.constant dense<0.000000e+00> : vector<2x8xf32>
    %70 = vector.multi_reduction <add>, %69, %cst_27 [2] : vector<2x8x32xf32> to vector<2x8xf32>
    %71 = vector.shape_cast %70 : vector<2x8xf32> to vector<2x8x1xf32>
    %72 = vector.broadcast %13 : vector<2x1x32xf32> to vector<2x8x32xf32>
    %73 = vector.broadcast %71 : vector<2x8x1xf32> to vector<2x8x32xf32>
    %74 = arith.mulf %72, %73 : vector<2x8x32xf32>
    %cst_28 = arith.constant 1.000000e-16 : f32
    %75 = vector.broadcast %cst_28 : f32 to vector<2x8x32xf32>
    %76 = arith.maximumf %74, %75 : vector<2x8x32xf32>
    %77 = math.rsqrt %76 : vector<2x8x32xf32>
    %78 = arith.mulf %68, %77 : vector<2x8x32xf32>
    %79 = arith.addf %42, %78 : vector<2x8x32xf32>
    %cst_29 = arith.constant dense<0xFF800000> : vector<2x32xf32>
    %80 = vector.multi_reduction <maximumf>, %79, %cst_29 [1] : vector<2x8x32xf32> to vector<2x32xf32>
    %81 = vector.shape_cast %80 : vector<2x32xf32> to vector<2x1x32xf32>
    %82 = vector.broadcast %81 : vector<2x1x32xf32> to vector<2x8x32xf32>
    %83 = arith.subf %79, %82 : vector<2x8x32xf32>
    %84 = math.exp %83 : vector<2x8x32xf32>
    %cst_30 = arith.constant dense<0.000000e+00> : vector<2x32xf32>
    %85 = vector.multi_reduction <add>, %84, %cst_30 [1] : vector<2x8x32xf32> to vector<2x32xf32>
    %86 = vector.shape_cast %85 : vector<2x32xf32> to vector<2x1x32xf32>
    %87 = tpu.reciprocal %86 : vector<2x1x32xf32> -> vector<2x1x32xf32>
    %88 = vector.broadcast %87 : vector<2x1x32xf32> to vector<2x8x32xf32>
    %89 = arith.mulf %84, %88 : vector<2x8x32xf32>
    "tpu.trace_start"() <{level = 10 : i32, message = "ban,bni->bai"}> : () -> ()
    %cst_31 = arith.constant dense<0.000000e+00> : vector<2x8x16xf32>
    %90 = tpu.matmul %89, %0, %cst_31 {dimension_numbers = #tpu.dot_dimension_numbers<[2], [1], [1], [2], [0, 0, 0, 1, 1, 2], [0], [0]>} : vector<2x8x32xf32>, vector<2x32x16xf32>, vector<2x8x16xf32> -> vector<2x8x16xf32>
    "tpu.trace_stop"() : () -> ()
    %cst_32 = arith.constant dense<0.000000e+00> : vector<2x8xf32>
    %91 = vector.multi_reduction <add>, %89, %cst_32 [2] : vector<2x8x32xf32> to vector<2x8xf32>
    %92 = vector.shape_cast %91 : vector<2x8xf32> to vector<2x8x1xf32>
    %93 = arith.mulf %90, %16 : vector<2x8x16xf32>
    %94 = vector.shape_cast %93 : vector<2x8x16xf32> to vector<16x16xf32>
    %cst_33 = arith.constant dense<0.000000e+00> : vector<16x32xf32>
    %95 = tpu.matmul %94, %2, %cst_33 {dimension_numbers = #tpu.dot_dimension_numbers<[1], [0], [0], [1], [0, 0, 1, 1], [], []>} : vector<16x16xf32>, vector<16x32xf32>, vector<16x32xf32> -> vector<16x32xf32>
    %96 = vector.shape_cast %95 : vector<16x32xf32> to vector<2x8x32xf32>
    %97 = vector.broadcast %92 : vector<2x8x1xf32> to vector<2x8x32xf32>
    %98 = arith.mulf %97, %19 : vector<2x8x32xf32>
    %99 = arith.addf %96, %98 : vector<2x8x32xf32>
    %cst_34 = arith.constant 9.99999993E-9 : f32
    %100 = vector.broadcast %cst_34 : f32 to vector<2x8x1xf32>
    %101 = arith.addf %100, %92 : vector<2x8x1xf32>
    %102 = tpu.reciprocal %101 : vector<2x8x1xf32> -> vector<2x8x1xf32>
    %103 = vector.broadcast %102 : vector<2x8x1xf32> to vector<2x8x32xf32>
    %104 = arith.mulf %99, %103 : vector<2x8x32xf32>
    "tpu.trace_start"() <{level = 10 : i32, message = "bao,bno->ban"}> : () -> ()
    %cst_35 = arith.constant dense<0.000000e+00> : vector<2x8x32xf32>
    %105 = tpu.matmul %104, %10, %cst_35 {dimension_numbers = #tpu.dot_dimension_numbers<[2], [2], [1], [1], [0, 0, 0, 1, 1, 1], [0], [0]>} : vector<2x8x32xf32>, vector<2x32x32xf32>, vector<2x8x32xf32> -> vector<2x8x32xf32>
    "tpu.trace_stop"() : () -> ()
    %106 = arith.mulf %104, %104 : vector<2x8x32xf32>
    %cst_36 = arith.constant dense<0.000000e+00> : vector<2x8xf32>
    %107 = vector.multi_reduction <add>, %106, %cst_36 [2] : vector<2x8x32xf32> to vector<2x8xf32>
    %108 = vector.shape_cast %107 : vector<2x8xf32> to vector<2x8x1xf32>
    %109 = vector.broadcast %13 : vector<2x1x32xf32> to vector<2x8x32xf32>
    %110 = vector.broadcast %108 : vector<2x8x1xf32> to vector<2x8x32xf32>
    %111 = arith.mulf %109, %110 : vector<2x8x32xf32>
    %cst_37 = arith.constant 1.000000e-16 : f32
    %112 = vector.broadcast %cst_37 : f32 to vector<2x8x32xf32>
    %113 = arith.maximumf %111, %112 : vector<2x8x32xf32>
    %114 = math.rsqrt %113 : vector<2x8x32xf32>
    %115 = arith.mulf %105, %114 : vector<2x8x32xf32>
    %116 = arith.addf %79, %115 : vector<2x8x32xf32>
    %cst_38 = arith.constant dense<0xFF800000> : vector<2x32xf32>
    %117 = vector.multi_reduction <maximumf>, %116, %cst_38 [1] : vector<2x8x32xf32> to vector<2x32xf32>
    %118 = vector.shape_cast %117 : vector<2x32xf32> to vector<2x1x32xf32>
    %119 = vector.broadcast %118 : vector<2x1x32xf32> to vector<2x8x32xf32>
    %120 = arith.subf %116, %119 : vector<2x8x32xf32>
    %121 = math.exp %120 : vector<2x8x32xf32>
    %cst_39 = arith.constant dense<0.000000e+00> : vector<2x32xf32>
    %122 = vector.multi_reduction <add>, %121, %cst_39 [1] : vector<2x8x32xf32> to vector<2x32xf32>
    %123 = vector.shape_cast %122 : vector<2x32xf32> to vector<2x1x32xf32>
    %124 = tpu.reciprocal %123 : vector<2x1x32xf32> -> vector<2x1x32xf32>
    %125 = vector.broadcast %124 : vector<2x1x32xf32> to vector<2x8x32xf32>
    %126 = arith.mulf %121, %125 : vector<2x8x32xf32>
    "tpu.trace_start"() <{level = 10 : i32, message = "ban,bni->bai"}> : () -> ()
    %cst_40 = arith.constant dense<0.000000e+00> : vector<2x8x16xf32>
    %127 = tpu.matmul %126, %0, %cst_40 {dimension_numbers = #tpu.dot_dimension_numbers<[2], [1], [1], [2], [0, 0, 0, 1, 1, 2], [0], [0]>} : vector<2x8x32xf32>, vector<2x32x16xf32>, vector<2x8x16xf32> -> vector<2x8x16xf32>
    "tpu.trace_stop"() : () -> ()
    %cst_41 = arith.constant dense<0.000000e+00> : vector<2x8xf32>
    %128 = vector.multi_reduction <add>, %126, %cst_41 [2] : vector<2x8x32xf32> to vector<2x8xf32>
    %129 = vector.shape_cast %128 : vector<2x8xf32> to vector<2x8x1xf32>
    %130 = arith.mulf %127, %16 : vector<2x8x16xf32>
    %131 = vector.shape_cast %130 : vector<2x8x16xf32> to vector<16x16xf32>
    %cst_42 = arith.constant dense<0.000000e+00> : vector<16x32xf32>
    %132 = tpu.matmul %131, %2, %cst_42 {dimension_numbers = #tpu.dot_dimension_numbers<[1], [0], [0], [1], [0, 0, 1, 1], [], []>} : vector<16x16xf32>, vector<16x32xf32>, vector<16x32xf32> -> vector<16x32xf32>
    %133 = vector.shape_cast %132 : vector<16x32xf32> to vector<2x8x32xf32>
    %134 = vector.broadcast %129 : vector<2x8x1xf32> to vector<2x8x32xf32>
    %135 = arith.mulf %134, %19 : vector<2x8x32xf32>
    %136 = arith.addf %133, %135 : vector<2x8x32xf32>
    %cst_43 = arith.constant 9.99999993E-9 : f32
    %137 = vector.broadcast %cst_43 : f32 to vector<2x8x1xf32>
    %138 = arith.addf %137, %129 : vector<2x8x1xf32>
    %139 = tpu.reciprocal %138 : vector<2x8x1xf32> -> vector<2x8x1xf32>
    %140 = vector.broadcast %139 : vector<2x8x1xf32> to vector<2x8x32xf32>
    %141 = arith.mulf %136, %140 : vector<2x8x32xf32>
    %142 = arith.addf %29, %141 : vector<2x8x32xf32>
    %cst_44 = arith.constant 0.000000e+00 : f32
    %143 = vector.broadcast %cst_44 : f32 to vector<2x8x32xf32>
    %144 = arith.maximumf %142, %143 : vector<2x8x32xf32>
    %c0_45 = arith.constant 0 : index
    %c0_46 = arith.constant 0 : index
    %c0_47 = arith.constant 0 : index
    %145 = vector.load %arg7[%c0_45, %c0_46, %c0_47] : memref<2x8x32xf32, #tpu.memory_space<vmem>>, vector<2x8x32xf32>
    tpu.vector_store %arg7[%c0_45, %c0_46, %c0_47], %144 {strides = array<i32>} : memref<2x8x32xf32, #tpu.memory_space<vmem>>, vector<2x8x32xf32>,
    %c0_48 = arith.constant 0 : index
    %c0_49 = arith.constant 0 : index
    %c0_50 = arith.constant 0 : index
    %146 = vector.load %arg8[%c0_48, %c0_49, %c0_50] : memref<2x8x32xf32, #tpu.memory_space<vmem>>, vector<2x8x32xf32>
    tpu.vector_store %arg8[%c0_48, %c0_49, %c0_50], %126 {strides = array<i32>} : memref<2x8x32xf32, #tpu.memory_space<vmem>>, vector<2x8x32xf32>,
    return
  }
  func.func @transform_0(%arg0: i32) -> (i32, i32, i32) {
    %c0_i32 = arith.constant 0 : i32
    %c0_i32_0 = arith.constant 0 : i32
    %c0_i32_1 = arith.constant 0 : i32
    return %arg0, %c0_i32, %c0_i32_0 : i32, i32, i32
  }
  func.func @transform_1(%arg0: i32) -> (i32, i32) {
    %c0_i32 = arith.constant 0 : i32
    %c0_i32_0 = arith.constant 0 : i32
    %c0_i32_1 = arith.constant 0 : i32
    return %c0_i32, %c0_i32_0 : i32, i32
  }
  func.func @transform_2(%arg0: i32) -> (i32, i32) {
    %c0_i32 = arith.constant 0 : i32
    %c0_i32_0 = arith.constant 0 : i32
    %c0_i32_1 = arith.constant 0 : i32
    return %c0_i32, %c0_i32_0 : i32, i32
  }
  func.func @transform_3(%arg0: i32) -> (i32, i32) {
    %c0_i32 = arith.constant 0 : i32
    %c0_i32_0 = arith.constant 0 : i32
    %c0_i32_1 = arith.constant 0 : i32
    return %c0_i32, %c0_i32_0 : i32, i32
  }
  func.func @transform_4(%arg0: i32) -> (i32, i32) {
    %c0_i32 = arith.constant 0 : i32
    %c0_i32_0 = arith.constant 0 : i32
    %c0_i32_1 = arith.constant 0 : i32
    return %c0_i32, %c0_i32_0 : i32, i32
  }
  func.func @transform_5(%arg0: i32) -> (i32, i32) {
    %c0_i32 = arith.constant 0 : i32
    %c0_i32_0 = arith.constant 0 : i32
    %c0_i32_1 = arith.constant 0 : i32
    return %c0_i32, %c0_i32_0 : i32, i32
  }
  func.func @transform_6(%arg0: i32) -> (i32, i32, i32) {
    %c0_i32 = arith.constant 0 : i32
    %c0_i32_0 = arith.constant 0 : i32
    %c0_i32_1 = arith.constant 0 : i32
    return %arg0, %c0_i32, %c0_i32_0 : i32, i32, i32
  }
  func.func @transform_7(%arg0: i32) -> (i32, i32, i32) {
    %c0_i32 = arith.constant 0 : i32
    %c0_i32_0 = arith.constant 0 : i32
    %c0_i32_1 = arith.constant 0 : i32
    return %arg0, %c0_i32, %c0_i32_0 : i32, i32, i32
  }
}

</mosaic_0001>

<bundles_post_ra>
// kernel: tpu_custom_call.1
= control target key start
LH: loop header
LB: loop body
LE: loop exit
PB: predicated region body
PF: predicated region fallthrough
CT: control target
= control target key end

     0   :  { %13 = vsyncpa [#allocation3], 0  ;;  %vm48_vm0 = vcmask 130048   ;;  %s6726_s0 = inlined_call_operand.vmem [shape: f32[2,32,16], index: 0, kind: input, shape index: {}]   ;;  %s6727_s1 = inlined_call_operand.vmem [shape: f32[8,16], index: 1, kind: input, shape index: {}]   ;;  %s6728_s2 = inlined_call_operand.vmem [shape: f32[16,32], index: 2, kind: input, shape index: {}]   ;;  %s6729_s3 = inlined_call_operand.vmem [shape: f32[1,32], index: 3, kind: input, shape index: {}]   ;;  %s6730_s4 = inlined_call_operand.vmem [shape: f32[16,32], index: 4, kind: input, shape index: {}]   ;;  %s6731_s5 = inlined_call_operand.vmem [shape: f32[1,32], index: 5, kind: input, shape index: {}]   ;;  %s6732_s6 = inlined_call_operand.hbm [shape: f32[2,8,32], index: 6, kind: output, shape index: {0}]   ;;  %s6733_s7 = inlined_call_operand.hbm [shape: f32[2,8,32], index: 7, kind: output, shape index: {1}]  }
   0x1   :  { %v39_v0 = vld [vmem:[%s6730_s4] sm:$0xff]  ;;  %v40_v1 = vld [vmem:[%s6730_s4 + $0x8] sm:$0xff]  ;;  %v29_v6 = vld [vmem:[%s6726_s0 + $0x10] sm:$0xff] }
   0x2   :  { %v27_v2 = vld [vmem:[%s6726_s0] sm:$0xff]  ;;  %v4598_v3 = vpack.c.bf16 %v40_v1, %v39_v0  ;;  %v28_v5 = vld [vmem:[%s6726_s0 + $0x8] sm:$0xff]  ;;  %v30_v7 = vld [vmem:[%s6726_s0 + $0x18] sm:$0xff]  ;;  %v220_v10 = vsel %vm48_vm0, %v29_v6, 0.0 }
   0x3   :  { %4426 = vmatprep.mubr.msk.f32.mxu0 %vm48_vm0, %v27_v2  ;;  %v217_v4 = vsel %vm48_vm0, %v27_v2, 0.0  ;;  %v218_v8 = vsel %vm48_vm0, %v28_v5, 0.0  ;;  %v5255_v9 = vpack.c.bf16 %v28_v5, %v27_v2  ;;  %v31_v11 = vld [vmem:[%s6726_s0 + $0x20] sm:$0xff]  ;;  %v32_v12 = vld [vmem:[%s6726_s0 + $0x28] sm:$0xff]  ;;  %v33_v13 = vld [vmem:[%s6726_s0 + $0x30] sm:$0xff]  ;;  %v5267_v15 = vpack.c.bf16 %v30_v7, %v29_v6 }
   0x4   :  { %4599 = vmatprep.subr.bf16.mxu0 %v4598_v3  ;;  %v219_v14 = vadd.f32 %v218_v8, %v217_v4  ;;  %v230_v16 = vsel %vm48_vm0, %v31_v11, 0.0  ;;  %v231_v17 = vsel %vm48_vm0, %v32_v12, 0.0  ;;  %v34_v18 = vld [vmem:[%s6726_s0 + $0x38] sm:$0xff]  ;;  %v36_v19 = vld [vmem:[%s6728_s2] sm:$0xff]  ;;  %v37_v20 = vld [vmem:[%s6728_s2 + $0x8] sm:$0xff]  ;;  %v222_v21 = vsel %vm48_vm0, %v30_v7, 0.0 }
   0x5   :  { %6814 = vst [vmem:[#allocation8_spill] sm:$0xff] %v5255_v9  ;;  %6815 = vst [vmem:[#allocation9_spill] sm:$0xff] %v5267_v15  ;;  %4601 = vmatpush3.bf16.msra.mxu0 %v4598_v3  ;;  %v232_v22 = vadd.f32 %v231_v17, %v230_v16  ;;  %v5281_v23 = vpack.c.bf16 %v32_v12, %v31_v11  ;;  %v233_v24 = vsel %vm48_vm0, %v33_v13, 0.0 }
   0x7   :  { %6816 = vst [vmem:[#allocation10_spill] sm:$0xff] %v5281_v23 }
   0x8   :  { %14 = vsyncpa [#allocation5], 0  ;;  %v221_v25 = vadd.f32 %v220_v10, %v219_v14  ;;  %v235_v26 = vsel %vm48_vm0, %v34_v18, 0.0  ;;  %v5285_v27 = vpack.c.bf16 %v34_v18, %v33_v13  ;;  %v5287_v28 = vpack.c.bf16 %v37_v20, %v36_v19  ;;  %4427 = vmatmul.mubr.msk.f32.vlgmr.msra.gmra.mrb[0].mxu0 %vm48_vm0, %v28_v5  ;;  %v35_v41 = vld [vmem:[%s6727_s1] sm:$0xff]  ;;  %s5190_s13 = smov [#allocation4]  }
   0x9   :  { %v234_v29 = vadd.f32 %v233_v24, %v232_v22  ;;  %4429 = vmatprep.mubr.msk.f32.mxu0 %vm48_vm0, %v29_v6  ;;  %v6736_v47 = vmov 0.0|0.0   ;;  %vm5187_vm1 = vmmov 0   ;;  %v6734_v48 = vmov 0.0   ;;  %v4282_v49 = vld [vmem:[%s6731_s5] ss:$0 sm:$0xff]  ;;  %s4267_s14 = sshll.u32 %s5190_s13, 4  ;;  %s4268_s14 = int_to_ptr.vmem [resolvable:$true] %s4267_s14 }
   0xa   :  { %6817 = vst [vmem:[#allocation11_spill] sm:$0xff] %v5285_v27  ;;  %6818 = vst [vmem:[#allocation12_spill] sm:$0xff] %v5287_v28  ;;  %v223_v30 = vadd.f32 %v222_v21, %v221_v25  ;;  %4603 = vmatprep.subr.bf16.mxu1 %v5287_v28  ;;  %4606 = vmatprep.subr.bf16.mxu0 %v6736_v47  ;;  %vm186_vm2 = vcmask 261120   ;;  %v6819_v55 = vmov 0  ;;  %v4291_v21 = vld [vmem:[%s6729_s3] ss:$0 sm:$0xff]  ;;  %p5143_p1 = scmp.lt.s32.totalorder %s4268_s14, %s4268_s14 }
   0xb   :  { %v236_v31 = vadd.f32 %v235_v26, %v234_v29  ;;  %4605 = vmatpush3.bf16.msra.mxu1 %v5287_v28  ;;  %vm5314_vm3 = vmpackc.low %vm186_vm2, %vm186_vm2  ;;  %vm1049_vm4 = vcmask 130112   ;;  %vm1056_vm5 = vcmask 195712   ;;  %vm1063_vm6 = vcmask 261312   ;;  %s5138_s15 = scalar_lea.vmem %s4268_s14, 256 }
   0xc   :  { %v224_v32 = vrot.slane %v223_v30, 4  ;;  %4430 = vmatmul.mubr.msk.f32.gmra.mrb[2].mxu0 %vm48_vm0, %v30_v7  ;;  %4614 = vmatprep.subr.bf16.mxu1 %v6736_v47  ;;  %v6820_v55 = vsel %vm5314_vm3, 4294967295, %v6819_v55  ;;  %vm1350_vm7 = vcmask 1041409   ;;  %vm1352_vm8 = vcmask 1042434   ;;  %p5139_p0 = scmp.ne.s32.totalorder %s4268_s14, %s5138_s15  ;;  %p5144_p2 = scmp.lt.s32.totalorder %s5138_s15, %s5138_s15 }
   0xd   :  { %v237_v33 = vrot.slane %v236_v31, 4  ;;  %4432 = vmatprep.mubr.msk.f32.mxu0 %vm48_vm0, %v31_v11  ;;  %6821 = vst [vmem:[#allocation13_spill] sm:$0xff] %v6820_v55  ;;  %vm1354_vm9 = vcmask 1043459   ;;  %vm1356_vm10 = vcmask 1044484   ;;  %vm1358_vm11 = vcmask 1045509  }
   0xe   :  { %v225_v34 = vadd.f32 %v224_v32, %v223_v30  ;;  %vm1362_vm12 = vcmask 1047559   ;;  %vm1360_vm13 = vcmask 1046534   ;;  %p5145_p3 = por %p5144_p2, %p5143_p1 }
   0xf   :  { %v238_v35 = vadd.f32 %v237_v33, %v236_v31 }
  0x10   :  { %v226_v36 = vrot.slane %v225_v34, 2  ;;  %4433 = vmatmul.mubr.msk.f32.gmra.mrb[4].mxu0 %vm48_vm0, %v32_v12  ;;  %p5146_p4 = pnand %p5145_p3, %p5139_p0 }
  0x11   :  { %v239_v37 = vrot.slane %v238_v35, 2  ;;  %4435 = vmatprep.mubr.msk.f32.mxu0 %vm48_vm0, %v33_v13 }
  0x12   :  { %v227_v38 = vadd.f32 %v226_v36, %v225_v34 }
  0x13   :  { %v240_v39 = vadd.f32 %v239_v37, %v238_v35 }
  0x14   :  { %v228_v40 = vrot.slane %v227_v38, 1  ;;  %4436 = vmatmul.mubr.msk.f32.gmra.mrb[6].mxu0 %vm48_vm0, %v34_v18 }
  0x15   :  { %v241_v42 = vrot.slane %v240_v39, 1  ;;  %4453 = vmatprep.mubr.msk.f32.mxu0 %vm5187_vm1, %v6734_v48 }
  0x16   :  { %v229_v43 = vadd.f32 %v228_v40, %v227_v38 }
  0x17   :  { %v242_v44 = vadd.f32 %v241_v42, %v240_v39  ;;  %v510_v39 = vlaneseq }
  0x18   :  { %v243_v45 = vmul.f32 %v229_v43, %v35_v41 }
  0x19   :  { %v244_v46 = vmul.f32 %v242_v44, %v35_v41  ;;  %v1039_v40 = vand.u32 127, %v510_v39  ;;  %v5379_v41 = vshrl.u32 %v510_v39, 7 }
  0x1a   :  { %4442 = vmatprep.mubr.msk.f32.mxu1 %vm48_vm0, %v243_v45 }
  0x1b   :  { %4443 = vmatmul.mubr.msk.f32.vlgmr.msra.gmra.mrb[0].mxu1 %vm48_vm0, %v244_v46  ;;  %v5382_v42 = vsub.s32 %v1039_v40, %v5379_v41  ;;  %v1044_v43 = vadd.s32 4294967288, %v1039_v40  ;;  %v1051_v44 = vadd.s32 4294967280, %v1039_v40  ;;  %v1058_v45 = vadd.s32 4294967272, %v1039_v40 }
  0x1c   :  { %4464 = vmatprep.mubr.msk.f32.mxu1 %vm5187_vm1, %v6734_v48  ;;  %v5443_v39 = vsub.s32 4, %v5379_v41 }
  0x1d   :  { %v5385_v46 = vsub.s32 %v1044_v43, %v5379_v41 }
  0x1e   :  { %6840 = vst [vmem:[#allocation32_spill] sm:$0xff] %v5443_v39 }
  0xdb   :  { %v4428_v50 = vpop.f32.mrb[0].mxu0 }
  0xdc   :  { %v145_v51 = vadd.f32 %v4428_v50, %v4282_v49  ;;  %v139_v52 = vpop.f32.mrb[1].mxu0  ;;  %v5391_v50 = vsub.s32 %v1058_v45, %v5379_v41 }
  0xdd   :  { %v140_v53 = vadd.f32 %v4282_v49, %v139_v52 }
  0xde   :  { %v179_v54 = vmul.f32 %v145_v51, %v145_v51 }
  0xdf   :  { %v5318_v56 = vpack.c.bf16 %v145_v51, %v140_v53  ;;  %v4431_v57 = vpop.f32.mrb[2].mxu0  ;;  %v178_v61 = vmul.f32 %v140_v53, %v140_v53  ;;  %v5189_v51 = vmov 0  }
  0xe0   :  { %v155_v58 = vadd.f32 %v4431_v57, %v4282_v49  ;;  %v149_v59 = vpop.f32.mrb[3].mxu0  ;;  %v190_v60 = vsel %vm186_vm2, %v179_v54, 0.0  ;;  %4711 = vset.pattern.permute.xlu0 %v5189_v51  ;;  %4710 = vset.pattern.permute.xlu1 %v5189_v51 }
  0xe1   :  { %6822 = vst [vmem:[#allocation14_spill] sm:$0xff] %v5318_v56  ;;  %v150_v62 = vadd.f32 %v4282_v49, %v149_v59  ;;  %191 = vadd.xlane.f32.xlu1 %v190_v60  ;;  %4609 = vmatpush3.bf16.xpose.msk.msra.mxu0 %vm5314_vm3, %v5318_v56  ;;  %v187_v4 = vsel %vm186_vm2, %v178_v61, 0.0  ;;  %v5406_v60 = vsub.s32 0, %v5379_v41  ;;  %v5409_v61 = vsub.s32 1, %v5379_v41 }
  0xe2   :  { %4610 = vmatprep.subr.bf16.mxu0 %v6736_v47  ;;  %v181_v7 = vmul.f32 %v155_v58, %v155_v58 }
  0xe3   :  { %v5325_v63 = vpack.c.bf16 %v155_v58, %v150_v62  ;;  %v4434_v0 = vpop.f32.mrb[4].mxu0  ;;  %v180_v1 = vmul.f32 %v150_v62, %v150_v62  ;;  %6834 = vst [vmem:[#allocation26_spill] sm:$0xff] %v5406_v60  ;;  %6835 = vst [vmem:[#allocation27_spill] sm:$0xff] %v5409_v61 }
  0xe4   :  { %v165_v2 = vadd.f32 %v4434_v0, %v4282_v49  ;;  %v159_v3 = vpop.f32.mrb[5].mxu0  ;;  %v196_v17 = vsel %vm186_vm2, %v181_v7, 0.0 }
  0xe5   :  { %6823 = vst [vmem:[#allocation15_spill] sm:$0xff] %v5325_v63  ;;  %v160_v5 = vadd.f32 %v4282_v49, %v159_v3  ;;  %188 = vadd.xlane.f32.xlu1 %v187_v4  ;;  %v193_v6 = vsel %vm186_vm2, %v180_v1, 0.0 }
  0xe6   :  { %194 = vadd.xlane.f32.xlu0 %v193_v6  ;;  %v183_v8 = vmul.f32 %v165_v2, %v165_v2 }
  0xe7   :  { %v5329_v10 = vpack.c.bf16 %v165_v2, %v160_v5  ;;  %v4437_v11 = vpop.f32.mrb[6].mxu0  ;;  %v182_v18 = vmul.f32 %v160_v5, %v160_v5  ;;  %v5422_v5 = vsub.s32 2, %v5379_v41 }
  0xe8   :  { %v175_v12 = vadd.f32 %v4437_v11, %v4282_v49  ;;  %v169_v13 = vpop.f32.mrb[7].mxu0  ;;  %v202_v14 = vsel %vm186_vm2, %v183_v8, 0.0 }
  0xe9   :  { %6824 = vst [vmem:[#allocation16_spill] sm:$0xff] %v5329_v10  ;;  %v170_v16 = vadd.f32 %v4282_v49, %v169_v13  ;;  %4613 = vmatpush3.bf16.xpose.msk.msra.mxu0 %vm5314_vm3, %v5325_v63  ;;  %4617 = vmatpush3.bf16.xpose.msk.msra.mxu1 %vm5314_vm3, %v5329_v10  ;;  %v199_v26 = vsel %vm186_vm2, %v182_v18, 0.0  ;;  %v5388_v49 = vsub.s32 %v1051_v44, %v5379_v41  ;;  %6837 = vst [vmem:[#allocation29_spill] sm:$0xff] %v5422_v5 }
  0xea   :  { %197 = vadd.xlane.f32.xlu1 %v196_v17  ;;  %203 = vadd.xlane.f32.xlu0 %v202_v14  ;;  %v185_v30 = vmul.f32 %v175_v12, %v175_v12 }
  0xeb   :  { %v5339_v19 = vpack.c.bf16 %v175_v12, %v170_v16  ;;  %v184_v20 = vmul.f32 %v170_v16, %v170_v16  ;;  %4618 = vmatprep.subr.bf16.mxu1 %v6736_v47  ;;  %4622 = vmatprep.subr.bf16.mxu0 %v6736_v47 }
  0xec   :  { %v208_v34 = vsel %vm186_vm2, %v185_v30, 0.0 }
  0xed   :  { %6825 = vst [vmem:[#allocation17_spill] sm:$0xff] %v5339_v19  ;;  %v205_v29 = vsel %vm186_vm2, %v184_v20, 0.0 }
  0xee   :  { %v4444_v22 = vpop.f32.mrb[0].mxu1  ;;  %200 = vadd.xlane.f32.xlu1 %v199_v26  ;;  %206 = vadd.xlane.f32.xlu0 %v205_v29 }
  0xef   :  { %v327_v24 = vmul.f32 0.03125, %v4444_v22  ;;  %v317_v25 = vpop.f32.mrb[1].mxu1 }
  0xf0   :  { %v326_v31 = vmul.f32 0.03125, %v317_v25 }
  0xf1   :  { %v5348_v32 = vadd.f32 %v4291_v21, %v327_v24  ;;  %4621 = vmatpush3.bf16.xpose.msk.msra.mxu1 %vm5314_vm3, %v5339_v19 }
  0xf2   :  { %v5350_v33 = vadd.f32 %v4291_v21, %v326_v31  ;;  %209 = vadd.xlane.f32.xlu1 %v208_v34  ;;  %4628 = vmatprep.subr.bf16.mxu1 %v6736_v47  ;;  %v5432_v21 = vsub.s32 3, %v5379_v41 }
  0xf3   :  { %6826 = vst [vmem:[#allocation18_spill] sm:$0xff] %v5348_v32  ;;  %v501_v35 = vmul.f32 %v5348_v32, %v5348_v32 }
  0xf4   :  { %6827 = vst [vmem:[#allocation19_spill] sm:$0xff] %v5350_v33  ;;  %4454 = vmatmul.mubr.msk.f32.vlgmr.msra.gmra.mrb[8].mxu0 %vm186_vm2, %v5350_v33  ;;  %v500_v37 = vmul.f32 %v5350_v33, %v5350_v33  ;;  %6838 = vst [vmem:[#allocation30_spill] sm:$0xff] %v5432_v21 }
  0xf5   :  { %v505_v36 = vsel %vm186_vm2, %v501_v35, 0.0  ;;  %4624 = vmatpush3.bf16.msra.mxu0 %v5255_v9  ;;  %4475 = vmatprep.mubr.msk.f32.mxu0 %vm5187_vm1, %v6734_v48 }
  0xf6   :  { %506 = vadd.xlane.f32.xlu0 %v505_v36  ;;  %4625 = vmatprep.subr.bf16.mxu0 %v6736_v47  ;;  %v502_v38 = vsel %vm186_vm2, %v500_v37, 0.0 }
  0xf8   :  { %4465 = vmatmul.mubr.msk.f32.vlgmr.msra.gmra.mrb[2].mxu1 %vm186_vm2, %v5348_v32 }
  0xf9   :  { %4627 = vmatpush3.bf16.msra.mxu0 %v5267_v15  ;;  %4630 = vmatpush3.bf16.msra.mxu1 %v5281_v23 }
  0xfa   :  { %503 = vadd.xlane.f32.xlu0 %v502_v38  ;;  %4486 = vmatprep.mubr.msk.f32.mxu1 %vm5187_vm1, %v6734_v48 }
  0xfb   :  { %4631 = vmatprep.subr.bf16.mxu1 %v6736_v47  ;;  %4635 = vmatprep.subr.bf16.mxu0 %v5287_v28 }
  0xfd   :  { %4633 = vmatpush3.bf16.msra.mxu1 %v5285_v27 }
  0xfe   :  { %4638 = vmatprep.subr.bf16.mxu1 %v6736_v47 }
 0x16e   :  { %v5393_v52 = vpop.xlane.xlu1 %191 }
 0x16f   :  { %6828 = vst [vmem:[#allocation20_spill] sm:$0xff] %v5393_v52 }
 0x172   :  { %v5397_v54 = vpop.xlane.xlu1 %188 }
 0x173   :  { %v5395_v53 = vpop.xlane.xlu0 %194  ;;  %6830 = vst [vmem:[#allocation22_spill] sm:$0xff] %v5397_v54 }
 0x174   :  { %6829 = vst [vmem:[#allocation21_spill] sm:$0xff] %v5395_v53 }
 0x177   :  { %v5399_v57 = vpop.xlane.xlu0 %203  ;;  %v5403_v59 = vpop.xlane.xlu1 %197 }
 0x178   :  { %6831 = vst [vmem:[#allocation23_spill] sm:$0xff] %v5399_v57  ;;  %6833 = vst [vmem:[#allocation25_spill] sm:$0xff] %v5403_v59 }
 0x17b   :  { %v5401_v58 = vpop.xlane.xlu0 %206  ;;  %v5417_v2 = vpop.xlane.xlu1 %200 }
 0x17c   :  { %6832 = vst [vmem:[#allocation24_spill] sm:$0xff] %v5401_v58  ;;  %6836 = vst [vmem:[#allocation28_spill] sm:$0xff] %v5417_v2 }
 0x17f   :  { %v5435_v25 = vpop.xlane.xlu1 %209 }
 0x180   :  { %6839 = vst [vmem:[#allocation31_spill] sm:$0xff] %v5435_v25 }
 0x183   :  { %v5411_v62 = vpop.xlane.xlu0 %506 }
 0x184   :  { %v545_v0 = vrot.slane %v5411_v62, %v5406_v60  ;;  %v549_v1 = vrot.slane %v5411_v62, %v5409_v61  ;;  %v553_v12 = vrot.slane %v5411_v62, %v5422_v5  ;;  %v557_v30 = vrot.slane %v5411_v62, %v5432_v21 }
 0x186   :  { %v623_v3 = vmul.f32 %v545_v0, %v5399_v57  ;;  %v622_v4 = vmul.f32 %v545_v0, %v5417_v2  ;;  %v627_v6 = vmul.f32 %v549_v1, %v5399_v57  ;;  %v626_v7 = vmul.f32 %v549_v1, %v5417_v2 }
 0x187   :  { %v624_v14 = vmul.f32 %v545_v0, %v5401_v58  ;;  %v628_v17 = vmul.f32 %v549_v1, %v5401_v58  ;;  %v630_v20 = vmul.f32 %v553_v12, %v5417_v2  ;;  %v631_v24 = vmul.f32 %v553_v12, %v5399_v57 }
 0x188   :  { %v687_v8 = vmax.f32 %v623_v3, 1e-16  ;;  %v686_v11 = vmax.f32 %v622_v4, 1e-16  ;;  %v691_v13 = vmax.f32 %v627_v6, 1e-16  ;;  %v625_v29 = vmul.f32 %v545_v0, %v5435_v25 }
 0x189   :  { %v690_v16 = vmax.f32 %v626_v7, 1e-16  ;;  %v688_v18 = vmax.f32 %v624_v14, 1e-16  ;;  %v692_v22 = vmax.f32 %v628_v17, 1e-16  ;;  %v629_v34 = vmul.f32 %v549_v1, %v5435_v25 }
 0x18a   :  { %4712 = vrsqrt.f32 %v687_v8  ;;  %v694_v26 = vmax.f32 %v630_v20, 1e-16  ;;  %v695_v31 = vmax.f32 %v631_v24, 1e-16  ;;  %v689_v37 = vmax.f32 %v625_v29, 1e-16 }
 0x18b   :  { %4714 = vrsqrt.f32 %v686_v11  ;;  %v632_v38 = vmul.f32 %v553_v12, %v5401_v58  ;;  %v693_v40 = vmax.f32 %v629_v34, 1e-16  ;;  %v634_v43 = vmul.f32 %v557_v30, %v5417_v2 }
 0x18c   :  { %4716 = vrsqrt.f32 %v691_v13  ;;  %v635_v0 = vmul.f32 %v557_v30, %v5399_v57  ;;  %v561_v1 = vrot.slane %v5411_v62, %v5443_v39  ;;  %v633_v4 = vmul.f32 %v553_v12, %v5435_v25 }
 0x18d   :  { %4718 = vrsqrt.f32 %v690_v16  ;;  %v696_v51 = vmax.f32 %v632_v38, 1e-16  ;;  %v698_v3 = vmax.f32 %v634_v43, 1e-16  ;;  %v636_v11 = vmul.f32 %v557_v30, %v5401_v58 }
 0x18e   :  { %4720 = vrsqrt.f32 %v688_v18  ;;  %v699_v8 = vmax.f32 %v635_v0, 1e-16  ;;  %v5452_v13 = vsub.s32 5, %v5379_v41  ;;  %v697_v14 = vmax.f32 %v633_v4, 1e-16 }
 0x18f   :  { %4722 = vrsqrt.f32 %v692_v22  ;;  %v638_v16 = vmul.f32 %v561_v1, %v5417_v2  ;;  %v700_v12 = vmax.f32 %v636_v11, 1e-16  ;;  %v639_v20 = vmul.f32 %v561_v1, %v5399_v57 }
 0x190   :  { %4724 = vrsqrt.f32 %v694_v26  ;;  %6841 = vst [vmem:[#allocation33_spill] sm:$0xff] %v5452_v13  ;;  %v565_v22 = vrot.slane %v5411_v62, %v5452_v13  ;;  %v637_v26 = vmul.f32 %v557_v30, %v5435_v25  ;;  %v641_v0 = vmul.f32 %v561_v1, %v5435_v25 }
 0x191   :  { %4726 = vrsqrt.f32 %v695_v31  ;;  %v702_v24 = vmax.f32 %v638_v16, 1e-16  ;;  %v703_v34 = vmax.f32 %v639_v20, 1e-16 }
 0x192   :  { %4728 = vrsqrt.f32 %v689_v37  ;;  %v701_v37 = vmax.f32 %v637_v26, 1e-16  ;;  %v642_v38 = vmul.f32 %v565_v22, %v5417_v2  ;;  %v705_v11 = vmax.f32 %v641_v0, 1e-16  ;;  %v5479_v26 = vpop.xlane.xlu0 %503 }
 0x193   :  { %4730 = vrsqrt.f32 %v693_v40 }
 0x194   :  { %v4713_v35 = vpop.eup %4712  ;;  %4732 = vrsqrt.f32 %v696_v51  ;;  %v706_v51 = vmax.f32 %v642_v38, 1e-16 }
 0x195   :  { %v4715_v36 = vpop.eup %4714  ;;  %946 = vperm.xlu0 %4711, %v4713_v35   ;;  %4734 = vrsqrt.f32 %v698_v3  ;;  %v640_v35 = vmul.f32 %v561_v1, %v5401_v58 }
 0x196   :  { %943 = vperm.xlu1 %4710, %v4715_v36   ;;  %v4717_v44 = vpop.eup %4716  ;;  %4736 = vrsqrt.f32 %v699_v8  ;;  %v5461_v36 = vsub.s32 6, %v5379_v41  ;;  %v5470_v8 = vsub.s32 7, %v5379_v41  ;;  %v645_v41 = vmul.f32 %v565_v22, %v5435_v25 }
 0x197   :  { %v4719_v45 = vpop.eup %4718  ;;  %4738 = vrsqrt.f32 %v697_v14  ;;  %v704_v30 = vmax.f32 %v640_v35, 1e-16  ;;  %v5484_v35 = vrot.slane %v5479_v26, %v5406_v60 }
 0x198   :  { %v4721_v6 = vpop.eup %4720  ;;  %4740 = vrsqrt.f32 %v700_v12  ;;  %6842 = vst [vmem:[#allocation34_spill] sm:$0xff] %v5461_v36  ;;  %6843 = vst [vmem:[#allocation35_spill] sm:$0xff] %v5470_v8  ;;  %v5476_v12 = vrot.slane %v5411_v62, %v5470_v8 }
 0x199   :  { %958 = vperm.xlu0 %4711, %v4717_v44   ;;  %v4723_v7 = vpop.eup %4722  ;;  %4742 = vrsqrt.f32 %v702_v24  ;;  %v643_v44 = vmul.f32 %v565_v22, %v5399_v57 }
 0x19a   :  { %955 = vperm.xlu1 %4710, %v4719_v45   ;;  %v4725_v17 = vpop.eup %4724  ;;  %4744 = vrsqrt.f32 %v703_v34  ;;  %v569_v45 = vrot.slane %v5411_v62, %v5461_v36  ;;  %v709_v62 = vmax.f32 %v645_v41, 1e-16 }
 0x19b   :  { %v4727_v18 = vpop.eup %4726  ;;  %4746 = vrsqrt.f32 %v701_v37  ;;  %v650_v37 = vmul.f32 %v5476_v12, %v5417_v2 }
 0x19c   :  { %v4729_v29 = vpop.eup %4728  ;;  %4748 = vrsqrt.f32 %v704_v30  ;;  %v646_v14 = vmul.f32 %v569_v45, %v5417_v2  ;;  %v648_v34 = vmul.f32 %v569_v45, %v5401_v58  ;;  %v517_v30 = vrot.slane %v5479_v26, %v5409_v61 }
 0x19d   :  { %949 = vperm.xlu0 %4711, %v4721_v6   ;;  %v4731_v31 = vpop.eup %4730  ;;  %v707_v6 = vmax.f32 %v643_v44, 1e-16  ;;  %4750 = vrsqrt.f32 %v706_v51  ;;  %v714_v44 = vmax.f32 %v650_v37, 1e-16  ;;  %v591_v51 = vmul.f32 %v5484_v35, %v5393_v52 }
 0x19e   :  { %961 = vperm.xlu1 %4710, %v4723_v7   ;;  %v4733_v40 = vpop.eup %4732  ;;  %v644_v7 = vmul.f32 %v565_v22, %v5401_v58  ;;  %v710_v20 = vmax.f32 %v646_v14, 1e-16 }
 0x19f   :  { %v4735_v43 = vpop.eup %4734  ;;  %4752 = vrsqrt.f32 %v707_v6  ;;  %v649_v6 = vmul.f32 %v569_v45, %v5435_v25 }
 0x1a0   :  { %v4737_v3 = vpop.eup %4736  ;;  %v708_v1 = vmax.f32 %v644_v7, 1e-16  ;;  %4754 = vrsqrt.f32 %v705_v11  ;;  %v655_v7 = vmax.f32 %v591_v51, 1e-16  ;;  %v594_v11 = vmul.f32 %v517_v30, %v5397_v54 }
 0x1a1   :  { %967 = vperm.xlu0 %4711, %v4725_v17   ;;  %v4739_v4 = vpop.eup %4738 }
 0x1a2   :  { %970 = vperm.xlu1 %4710, %v4727_v18   ;;  %v4741_v16 = vpop.eup %4740  ;;  %v647_v18 = vmul.f32 %v569_v45, %v5399_v57  ;;  %4756 = vrsqrt.f32 %v708_v1  ;;  %v590_v1 = vmul.f32 %v5484_v35, %v5397_v54 }
 0x1a3   :  { %v4743_v17 = vpop.eup %4742  ;;  %4758 = vrsqrt.f32 %v710_v20  ;;  %v595_v20 = vmul.f32 %v517_v30, %v5393_v52 }
 0x1a4   :  { %v4745_v24 = vpop.eup %4744 }
 0x1a5   :  { %952 = vperm.xlu0 %4711, %v4729_v29   ;;  %v4747_v29 = vpop.eup %4746  ;;  %v659_v37 = vmax.f32 %v595_v20, 1e-16 }
 0x1a6   :  { %964 = vperm.xlu1 %4710, %v4731_v31   ;;  %v711_v31 = vmax.f32 %v647_v18, 1e-16  ;;  %v4749_v22 = vpop.eup %4748  ;;  %v658_v18 = vmax.f32 %v594_v11, 1e-16 }
 0x1a7   :  { %v4751_v38 = vpop.eup %4750 }
 0x1a8   :  { %4760 = vrsqrt.f32 %v711_v31 }
 0x1a9   :  { %973 = vperm.xlu0 %4711, %v4733_v40   ;;  %v712_v40 = vmax.f32 %v648_v34, 1e-16  ;;  %4762 = vrsqrt.f32 %v709_v62  ;;  %v4753_v0 = vpop.eup %4752  ;;  %v654_v34 = vmax.f32 %v590_v1, 1e-16  ;;  %v597_v62 = vmul.f32 %v517_v30, %v5403_v59 }
 0x1aa   :  { %979 = vperm.xlu1 %4710, %v4735_v43   ;;  %v651_v43 = vmul.f32 %v5476_v12, %v5399_v57 }
 0x1ab   :  { %4764 = vrsqrt.f32 %v712_v40 }
 0x1ac   :  { %4766 = vrsqrt.f32 %v714_v44  ;;  %v661_v44 = vmax.f32 %v597_v62, 1e-16 }
 0x1ad   :  { %982 = vperm.xlu0 %4711, %v4737_v3   ;;  %v4755_v3 = vpop.eup %4754 }
 0x1ae   :  { %976 = vperm.xlu1 %4710, %v4739_v4   ;;  %v715_v4 = vmax.f32 %v651_v43, 1e-16  ;;  %v4757_v14 = vpop.eup %4756  ;;  %v521_v43 = vrot.slane %v5479_v26, %v5422_v5 }
 0x1b0   :  { %4768 = vrsqrt.f32 %v715_v4  ;;  %v596_v4 = vmul.f32 %v517_v30, %v5395_v53 }
 0x1b1   :  { %985 = vperm.xlu0 %4711, %v4741_v16   ;;  %v4759_v16 = vpop.eup %4758  ;;  %4770 = vrsqrt.f32 %v655_v7 }
 0x1b2   :  { %991 = vperm.xlu1 %4710, %v4743_v17   ;;  %v713_v17 = vmax.f32 %v649_v6, 1e-16  ;;  %v4761_v41 = vpop.eup %4760  ;;  %v660_v1 = vmax.f32 %v596_v4, 1e-16 }
 0x1b4   :  { %4772 = vrsqrt.f32 %v713_v17  ;;  %v601_v17 = vmul.f32 %v521_v43, %v5403_v59 }
 0x1b5   :  { %994 = vperm.xlu0 %4711, %v4745_v24   ;;  %v4763_v24 = vpop.eup %4762  ;;  %4774 = vrsqrt.f32 %v658_v18  ;;  %v598_v18 = vmul.f32 %v521_v43, %v5397_v54 }
 0x1b6   :  { %988 = vperm.xlu1 %4710, %v4747_v29   ;;  %v5503_v29 = vrot.slane %v5479_v26, %v5432_v21  ;;  %4776 = vrsqrt.f32 %v654_v34  ;;  %v665_v30 = vmax.f32 %v601_v17, 1e-16  ;;  %v599_v34 = vmul.f32 %v521_v43, %v5393_v52 }
 0x1b7   :  { %4778 = vrsqrt.f32 %v659_v37 }
 0x1b8   :  { %v602_v51 = vmul.f32 %v5503_v29, %v5397_v54  ;;  %4780 = vrsqrt.f32 %v661_v44  ;;  %v663_v44 = vmax.f32 %v599_v34, 1e-16 }
 0x1b9   :  { %997 = vperm.xlu0 %4711, %v4749_v22   ;;  %v592_v22 = vmul.f32 %v5484_v35, %v5395_v53 }
 0x1ba   :  { %1003 = vperm.xlu1 %4710, %v4751_v38   ;;  %v4765_v38 = vpop.eup %4764 }
 0x1bb   :  { %v4767_v40 = vpop.eup %4766 }
 0x1bc   :  { %v4769_v6 = vpop.eup %4768 }
 0x1bd   :  { %1006 = vperm.xlu0 %4711, %v4753_v0   ;;  %v4771_v11 = vpop.eup %4770 }
 0x1be   :  { %1000 = vperm.xlu1 %4710, %v4755_v3   ;;  %v656_v3 = vmax.f32 %v592_v22, 1e-16  ;;  %v4773_v20 = vpop.eup %4772  ;;  %v5526_v22 = vrot.slane %v5479_v26, %v5452_v13 }
 0x1c0   :  { %4782 = vrsqrt.f32 %v656_v3 }
 0x1c1   :  { %1009 = vperm.xlu0 %4711, %v4757_v14   ;;  %v5517_v14 = vrot.slane %v5479_v26, %v5443_v39 }
 0x1c2   :  { %1015 = vperm.xlu1 %4710, %v4759_v16   ;;  %v666_v16 = vmax.f32 %v602_v51, 1e-16  ;;  %v593_v51 = vmul.f32 %v5484_v35, %v5403_v59 }
 0x1c4   :  { %4784 = vrsqrt.f32 %v666_v16  ;;  %v600_v16 = vmul.f32 %v521_v43, %v5395_v53 }
 0x1c5   :  { %1018 = vperm.xlu0 %4711, %v4761_v41   ;;  %v4775_v41 = vpop.eup %4774  ;;  %4786 = vrsqrt.f32 %v660_v1 }
 0x1c6   :  { %1012 = vperm.xlu1 %4710, %v4763_v24   ;;  %v606_v24 = vmul.f32 %v5517_v14, %v5397_v54  ;;  %v4777_v62 = vpop.eup %4776  ;;  %4788 = vrsqrt.f32 %v665_v30  ;;  %v603_v30 = vmul.f32 %v5503_v29, %v5393_v52 }
 0x1c7   :  { %v5499_v45 = vpop.f32.mrb[8].mxu0  ;;  %v4779_v37 = vpop.eup %4778 }
 0x1c8   :  { %6844 = vst [vmem:[#allocation36_spill] sm:$0xff] %v5499_v45  ;;  %v4455_v31 = vpop.f32.mrb[9].mxu0  ;;  %v4781_v3 = vpop.eup %4780 }
 0x1c9   :  { %1021 = vperm.xlu0 %4711, %v4765_v38   ;;  %v662_v31 = vmax.f32 %v598_v18, 1e-16  ;;  %v670_v38 = vmax.f32 %v606_v24, 1e-16  ;;  %v5537_v18 = vrot.slane %v5479_v26, %v5461_v36 }
 0x1ca   :  { %1027 = vperm.xlu1 %4710, %v4767_v40   ;;  %v608_v40 = vmul.f32 %v5517_v14, %v5395_v53  ;;  %v4783_v4 = vpop.eup %4782 }
 0x1cb   :  { %v5512_v0 = vpop.f32.mrb[2].mxu1  ;;  %4790 = vrsqrt.f32 %v662_v31  ;;  %v615_v34 = vmul.f32 %v5537_v18, %v5393_v52 }
 0x1cc   :  { %6845 = vst [vmem:[#allocation37_spill] sm:$0xff] %v5512_v0  ;;  %v4466_v7 = vpop.f32.mrb[3].mxu1  ;;  %4792 = vrsqrt.f32 %v670_v38 }
 0x1cd   :  { %1030 = vperm.xlu0 %4711, %v4769_v6   ;;  %v672_v6 = vmax.f32 %v608_v40, 1e-16  ;;  %v611_v7 = vmul.f32 %v5526_v22, %v5393_v52  ;;  %4794 = vrsqrt.f32 %v663_v44  ;;  %v5549_v44 = vrot.slane %v5479_v26, %v5470_v8 }
 0x1ce   :  { %850 = vperm.xlu1 %4710, %v4771_v11   ;;  %v657_v11 = vmax.f32 %v593_v51, 1e-16  ;;  %v4785_v17 = vpop.eup %4784  ;;  %v679_v51 = vmax.f32 %v615_v34, 1e-16 }
 0x1cf   :  { %v4787_v1 = vpop.eup %4786  ;;  %4796 = vrsqrt.f32 %v672_v6  ;;  %v675_v35 = vmax.f32 %v611_v7, 1e-16  ;;  %v607_v6 = vmul.f32 %v5517_v14, %v5393_v52  ;;  %v619_v26 = vmul.f32 %v5549_v44, %v5393_v52 }
 0x1d0   :  { %4798 = vrsqrt.f32 %v657_v11  ;;  %v4789_v24 = vpop.eup %4788 }
 0x1d1   :  { %1024 = vperm.xlu0 %4711, %v4773_v20   ;;  %v612_v20 = vmul.f32 %v5526_v22, %v5395_v53  ;;  %4800 = vrsqrt.f32 %v675_v35 }
 0x1d2   :  { %859 = vperm.xlu1 %4710, %v4775_v41   ;;  %v664_v41 = vmax.f32 %v600_v16, 1e-16 }
 0x1d3   :  { %v676_v31 = vmax.f32 %v612_v20, 1e-16 }
 0x1d4   :  { %4802 = vrsqrt.f32 %v664_v41  ;;  %v683_v41 = vmax.f32 %v619_v26, 1e-16 }
 0x1d5   :  { %847 = vperm.xlu0 %4711, %v4777_v62   ;;  %v4791_v43 = vpop.eup %4790  ;;  %v667_v62 = vmax.f32 %v603_v30, 1e-16  ;;  %4804 = vrsqrt.f32 %v676_v31  ;;  %v620_v30 = vmul.f32 %v5549_v44, %v5395_v53 }
 0x1d6   :  { %862 = vperm.xlu1 %4710, %v4779_v37   ;;  %v604_v37 = vmul.f32 %v5503_v29, %v5395_v53  ;;  %v4793_v38 = vpop.eup %4792 }
 0x1d7   :  { %v4795_v40 = vpop.eup %4794  ;;  %4806 = vrsqrt.f32 %v667_v62  ;;  %v653_v62 = vmul.f32 %v5476_v12, %v5435_v25 }
 0x1d8   :  { %4808 = vrsqrt.f32 %v679_v51 }
 0x1d9   :  { %868 = vperm.xlu0 %4711, %v4781_v3   ;;  %v616_v3 = vmul.f32 %v5537_v18, %v5395_v53  ;;  %v4797_v7 = vpop.eup %4796 }
 0x1da   :  { %853 = vperm.xlu1 %4710, %v4783_v4   ;;  %v668_v4 = vmax.f32 %v604_v37, 1e-16  ;;  %v4799_v11 = vpop.eup %4798 }
 0x1db   :  { %v680_v16 = vmax.f32 %v616_v3, 1e-16  ;;  %v4801_v35 = vpop.eup %4800  ;;  %v717_v3 = vmax.f32 %v653_v62, 1e-16 }
 0x1dc   :  { %4810 = vrsqrt.f32 %v668_v4 }
 0x1dd   :  { %883 = vperm.xlu0 %4711, %v4785_v17   ;;  %v671_v17 = vmax.f32 %v607_v6, 1e-16  ;;  %4812 = vrsqrt.f32 %v680_v16  ;;  %v614_v6 = vmul.f32 %v5537_v18, %v5397_v54 }
 0x1de   :  { %865 = vperm.xlu1 %4710, %v4787_v1   ;;  %v605_v1 = vmul.f32 %v5503_v29, %v5403_v59  ;;  %v4803_v20 = vpop.eup %4802  ;;  %v684_v29 = vmax.f32 %v620_v30, 1e-16 }
 0x1df   :  { %4814 = vrsqrt.f32 %v671_v17  ;;  %v4805_v31 = vpop.eup %4804  ;;  %v678_v16 = vmax.f32 %v614_v6, 1e-16 }
 0x1e0   :  { %4816 = vrsqrt.f32 %v683_v41 }
 0x1e1   :  { %880 = vperm.xlu0 %4711, %v4789_v24   ;;  %v669_v24 = vmax.f32 %v605_v1, 1e-16  ;;  %v4807_v34 = vpop.eup %4806 }
 0x1e2   :  { %871 = vperm.xlu1 %4710, %v4791_v43   ;;  %v610_v43 = vmul.f32 %v5526_v22, %v5397_v54 }
 0x1e3   :  { %4818 = vrsqrt.f32 %v669_v24  ;;  %v617_v24 = vmul.f32 %v5537_v18, %v5403_v59 }
 0x1e4   :  { %v674_v37 = vmax.f32 %v610_v43, 1e-16  ;;  %4820 = vrsqrt.f32 %v684_v29 }
 0x1e5   :  { %895 = vperm.xlu0 %4711, %v4793_v38   ;;  %v609_v38 = vmul.f32 %v5517_v14, %v5403_v59  ;;  %v613_v14 = vmul.f32 %v5526_v22, %v5403_v59 }
 0x1e6   :  { %874 = vperm.xlu1 %4710, %v4795_v40   ;;  %v4809_v40 = vpop.eup %4808  ;;  %4822 = vrsqrt.f32 %v674_v37  ;;  %v652_v37 = vmul.f32 %v5476_v12, %v5401_v58 }
 0x1e7   :  { %v4811_v51 = vpop.eup %4810  ;;  %v673_v4 = vmax.f32 %v609_v38, 1e-16  ;;  %4824 = vrsqrt.f32 %v717_v3  ;;  %v677_v1 = vmax.f32 %v613_v14, 1e-16 }
 0x1e8   :  { %v716_v18 = vmax.f32 %v652_v37, 1e-16 }
 0x1e9   :  { %901 = vperm.xlu0 %4711, %v4797_v7   ;;  %v4813_v7 = vpop.eup %4812  ;;  %4826 = vrsqrt.f32 %v673_v4 }
 0x1ea   :  { %856 = vperm.xlu1 %4710, %v4799_v11   ;;  %v4815_v11 = vpop.eup %4814  ;;  %4828 = vrsqrt.f32 %v678_v16 }
 0x1eb   :  { %v4817_v26 = vpop.eup %4816  ;;  %4830 = vrsqrt.f32 %v677_v1 }
 0x1ed   :  { %910 = vperm.xlu0 %4711, %v4801_v35   ;;  %v4819_v17 = vpop.eup %4818  ;;  %v618_v35 = vmul.f32 %v5549_v44, %v5397_v54 }
 0x1ee   :  { %877 = vperm.xlu1 %4710, %v4803_v20   ;;  %v4821_v20 = vpop.eup %4820 }
 0x1ef   :  { %v682_v30 = vmax.f32 %v618_v35, 1e-16 }
 0x1f0   :  { %v4823_v41 = vpop.eup %4822 }
 0x1f1   :  { %913 = vperm.xlu0 %4711, %v4805_v31   ;;  %v4825_v43 = vpop.eup %4824  ;;  %4832 = vrsqrt.f32 %v682_v30  ;;  %v681_v31 = vmax.f32 %v617_v24, 1e-16 }
 0x1f2   :  { %886 = vperm.xlu1 %4710, %v4807_v34   ;;  %v621_v34 = vmul.f32 %v5549_v44, %v5403_v59 }
 0x1f3   :  { %v4827_v22 = vpop.eup %4826  ;;  %4834 = vrsqrt.f32 %v681_v31 }
 0x1f4   :  { %v4829_v29 = vpop.eup %4828  ;;  %v685_v62 = vmax.f32 %v621_v34, 1e-16 }
 0x1f5   :  { %922 = vperm.xlu0 %4711, %v4809_v40   ;;  %v4831_v38 = vpop.eup %4830 }
 0x1f6   :  { %889 = vperm.xlu1 %4710, %v4811_v51   ;;  %4836 = vrsqrt.f32 %v685_v62 }
 0x1f7   :  { %4838 = vrsqrt.f32 %v716_v18 }
 0x1f9   :  { %925 = vperm.xlu0 %4711, %v4813_v7  }
 0x1fa   :  { %898 = vperm.xlu1 %4710, %v4815_v11  }
 0x1fb   :  { %v4833_v40 = vpop.eup %4832 }
 0x1fd   :  { %934 = vperm.xlu0 %4711, %v4817_v26   ;;  %v4835_v3 = vpop.eup %4834 }
 0x1fe   :  { %892 = vperm.xlu1 %4710, %v4819_v17  }
 0x200   :  { %v4837_v6 = vpop.eup %4836 }
 0x201   :  { %937 = vperm.xlu0 %4711, %v4821_v20   ;;  %v4839_v11 = vpop.eup %4838 }
 0x202   :  { %907 = vperm.xlu1 %4710, %v4823_v41  }
 0x205   :  { %1036 = vperm.xlu0 %4711, %v4825_v43  }
 0x206   :  { %904 = vperm.xlu1 %4710, %v4827_v22  }
 0x20a   :  { %919 = vperm.xlu1 %4710, %v4829_v29  }
 0x20e   :  { %916 = vperm.xlu1 %4710, %v4831_v38  }
 0x212   :  { %931 = vperm.xlu1 %4710, %v4833_v40  }
 0x214   :  { %v5579_v51 = vpop.permute.xlu0 %946 }
 0x215   :  { %v5581_v4 = vpop.permute.xlu1 %943  ;;  %v1205_v23 = vrot.slane %v5579_v51, %v5385_v46 }
 0x216   :  { %928 = vperm.xlu1 %4710, %v4835_v3   ;;  %v1201_v19 = vrot.slane %v5581_v4, %v5382_v42 }
 0x218   :  { %v5583_v44 = vpop.permute.xlu0 %958 }
 0x219   :  { %v5585_v7 = vpop.permute.xlu1 %955  ;;  %v1224_v10 = vrot.slane %v5583_v44, %v5385_v46 }
 0x21a   :  { %940 = vperm.xlu1 %4710, %v4837_v6   ;;  %v1220_v63 = vrot.slane %v5585_v7, %v5382_v42 }
 0x21c   :  { %v5587_v12 = vpop.permute.xlu0 %949 }
 0x21d   :  { %v5589_v16 = vpop.permute.xlu1 %961  ;;  %v1210_v55 = vrot.slane %v5587_v12, %v5388_v49 }
 0x21e   :  { %1033 = vperm.xlu1 %4710, %v4839_v11   ;;  %v1229_v56 = vrot.slane %v5589_v16, %v5388_v49 }
 0x220   :  { %v5591_v14 = vpop.permute.xlu0 %967 }
 0x221   :  { %v5593_v26 = vpop.permute.xlu1 %970  ;;  %v1239_v28 = vrot.slane %v5591_v14, %v5382_v42  ;;  %v1206_v14 = vsel %vm1049_vm4, %v1205_v23, %v1201_v19 }
 0x222   :  { %v1243_v51 = vrot.slane %v5593_v26, %v5385_v46  ;;  %v1225_v26 = vsel %vm1049_vm4, %v1224_v10, %v1220_v63 }
 0x223   :  { %v1230_v0 = vsel %vm1056_vm5, %v1229_v56, %v1225_v26 }
 0x224   :  { %v5595_v17 = vpop.permute.xlu0 %952 }
 0x225   :  { %v5597_v1 = vpop.permute.xlu1 %964  ;;  %v1215_v4 = vrot.slane %v5595_v17, %v5391_v50  ;;  %v1211_v17 = vsel %vm1056_vm5, %v1210_v55, %v1206_v14 }
 0x226   :  { %v1234_v44 = vrot.slane %v5597_v1, %v5391_v50  ;;  %v1244_v1 = vsel %vm1049_vm4, %v1243_v51, %v1239_v28 }
 0x228   :  { %v5599_v35 = vpop.permute.xlu0 %973 }
 0x229   :  { %v5601_v20 = vpop.permute.xlu1 %979  ;;  %v1248_v7 = vrot.slane %v5599_v35, %v5388_v49 }
 0x22a   :  { %v1258_v55 = vrot.slane %v5601_v20, %v5382_v42 }
 0x22b   :  { %v1249_v23 = vsel %vm1056_vm5, %v1248_v7, %v1244_v1 }
 0x22c   :  { %v5603_v41 = vpop.permute.xlu0 %982 }
 0x22d   :  { %v5605_v30 = vpop.permute.xlu1 %976  ;;  %v1262_v35 = vrot.slane %v5603_v41, %v5385_v46 }
 0x22e   :  { %v1253_v16 = vrot.slane %v5605_v30, %v5391_v50  ;;  %v1235_v30 = vsel %vm1063_vm6, %v1234_v44, %v1230_v0 }
 0x230   :  { %v5607_v24 = vpop.permute.xlu0 %985  ;;  %v1254_v28 = vsel %vm1063_vm6, %v1253_v16, %v1249_v23 }
 0x231   :  { %v5609_v43 = vpop.permute.xlu1 %991  ;;  %v1267_v63 = vrot.slane %v5607_v24, %v5388_v49  ;;  %v1263_v24 = vsel %vm1049_vm4, %v1262_v35, %v1258_v55 }
 0x232   :  { %v1277_v51 = vrot.slane %v5609_v43, %v5382_v42 }
 0x234   :  { %v5611_v22 = vpop.permute.xlu0 %994 }
 0x235   :  { %v5613_v31 = vpop.permute.xlu1 %988  ;;  %v1281_v56 = vrot.slane %v5611_v22, %v5385_v46  ;;  %v1268_v22 = vsel %vm1056_vm5, %v1267_v63, %v1263_v24 }
 0x236   :  { %v1272_v19 = vrot.slane %v5613_v31, %v5391_v50 }
 0x237   :  { %v1282_v44 = vsel %vm1049_vm4, %v1281_v56, %v1277_v51 }
 0x238   :  { %v5615_v34 = vpop.permute.xlu0 %997  ;;  %v5748_v7 = vsel %vm1063_vm6, %v1272_v19, %v1268_v22 }
 0x239   :  { %v5617_v29 = vpop.permute.xlu1 %1003  ;;  %v1286_v0 = vrot.slane %v5615_v34, %v5388_v49 }
 0x23b   :  { %v5757_v14 = vsel %vm1056_vm5, %v1286_v0, %v1282_v44 }
 0x23c   :  { %v5619_v62 = vpop.permute.xlu0 %1006 }
 0x23d   :  { %v5621_v37 = vpop.permute.xlu1 %1000  ;;  %v1300_v31 = vrot.slane %v5619_v62, %v5385_v46 }
 0x240   :  { %v5623_v38 = vpop.permute.xlu0 %1009 }
 0x241   :  { %v5625_v18 = vpop.permute.xlu1 %1015 }
 0x244   :  { %v5627_v40 = vpop.permute.xlu0 %1018 }
 0x245   :  { %v5629_v3 = vpop.permute.xlu1 %1012 }
 0x248   :  { %v5631_v6 = vpop.permute.xlu0 %1021 }
 0x249   :  { %v5633_v11 = vpop.permute.xlu1 %1027 }
 0x24a   :  { %6846 = vst [vmem:[#allocation38_spill] sm:$0xff] %v5633_v11  ;;  %v1216_v11 = vsel %vm1063_vm6, %v1215_v4, %v1211_v17 }
 0x24b   :  { %v1364_v41 = vsel %vm1350_vm7, %v1235_v30, %v1216_v11 }
 0x24c   :  { %v5635_v48 = vpop.permute.xlu0 %1030  ;;  %v5739_v4 = vsel %vm1352_vm8, %v1254_v28, %v1364_v41 }
 0x24d   :  { %v5637_v47 = vpop.permute.xlu1 %850 }
 0x250   :  { %v5639_v33 = vpop.permute.xlu0 %1024 }
 0x251   :  { %v5641_v32 = vpop.permute.xlu1 %859 }
 0x254   :  { %v5643_v59 = vpop.permute.xlu0 %847 }
 0x255   :  { %v5645_v53 = vpop.permute.xlu1 %862  ;;  %v1043_v43 = vrot.slane %v5643_v59, %v5382_v42  ;;  %v1048_v59 = vrot.slane %v5637_v47, %v5385_v46  ;;  %v1319_v47 = vrot.slane %v5627_v40, %v5385_v46  ;;  %v1366_v40 = vsel %vm1354_vm9, %v5748_v7, %v5739_v4 }
 0x256   :  { %v1072_v20 = vrot.slane %v5645_v53, %v5385_v46  ;;  %v1068_v53 = vrot.slane %v5641_v32, %v5382_v42  ;;  %v1291_v32 = vrot.slane %v5621_v37, %v5391_v50 }
 0x257   :  { %v1050_v23 = vsel %vm1049_vm4, %v1048_v59, %v1043_v43 }
 0x258   :  { %v5649_v52 = vpop.permute.xlu0 %868  ;;  %v1073_v17 = vsel %vm1049_vm4, %v1072_v20, %v1068_v53 }
 0x259   :  { %v5647_v54 = vpop.permute.xlu1 %853 }
 0x25a   :  { %v1055_v62 = vrot.slane %v5647_v54, %v5388_v49  ;;  %v1305_v54 = vrot.slane %v5623_v38, %v5388_v49 }
 0x25c   :  { %v5653_v36 = vpop.permute.xlu0 %883  ;;  %v1057_v55 = vsel %vm1056_vm5, %v1055_v62, %v1050_v23 }
 0x25d   :  { %v5651_v8 = vpop.permute.xlu1 %865  ;;  %v1106_v28 = vrot.slane %v5653_v36, %v5382_v42 }
 0x25e   :  { %v1077_v34 = vrot.slane %v5651_v8, %v5388_v49  ;;  %v1296_v8 = vrot.slane %v5617_v29, %v5382_v42 }
 0x260   :  { %v5659_v21 = vpop.permute.xlu0 %880  ;;  %v5773_v35 = vsel %vm1049_vm4, %v1300_v31, %v1296_v8  ;;  %v1078_v29 = vsel %vm1056_vm5, %v1077_v34, %v1073_v17 }
 0x261   :  { %v5655_v13 = vpop.permute.xlu1 %871  ;;  %v1101_v36 = vrot.slane %v5659_v21, %v5391_v50 }
 0x264   :  { %v5663_v58 = vpop.permute.xlu0 %895 }
 0x265   :  { %v5657_v39 = vpop.permute.xlu1 %874  ;;  %v1125_v24 = vrot.slane %v5663_v58, %v5382_v42 }
 0x266   :  { %v1091_v26 = vrot.slane %v5657_v39, %v5385_v46  ;;  %v1087_v39 = vrot.slane %v5655_v13, %v5382_v42 }
 0x268   :  { %v5669_v57 = vpop.permute.xlu0 %901  ;;  %v1092_v56 = vsel %vm1049_vm4, %v1091_v26, %v1087_v39 }
 0x269   :  { %v5661_v25 = vpop.permute.xlu1 %856 }
 0x26a   :  { %v1062_v63 = vrot.slane %v5661_v25, %v5391_v50 }
 0x26c   :  { %v5673_v60 = vpop.permute.xlu0 %910  ;;  %v1064_v22 = vsel %vm1063_vm6, %v1062_v63, %v1057_v55  ;;  %v1324_v63 = vrot.slane %v5631_v6, %v5388_v49  ;;  %v1292_v6 = vsel %vm1063_vm6, %v1291_v32, %v5757_v14 }
 0x26d   :  { %v5665_v5 = vpop.permute.xlu1 %877 }
 0x26e   :  { %v1096_v1 = vrot.slane %v5665_v5, %v5388_v49  ;;  %v1082_v5 = vrot.slane %v5649_v52, %v5391_v50 }
 0x270   :  { %v5679_v9 = vpop.permute.xlu0 %913  ;;  %v1083_v19 = vsel %vm1063_vm6, %v1082_v5, %v1078_v29  ;;  %v1097_v0 = vsel %vm1056_vm5, %v1096_v1, %v1092_v56 }
 0x271   :  { %v5667_v2 = vpop.permute.xlu1 %886  ;;  %v1102_v58 = vsel %vm1063_vm6, %v1101_v36, %v1097_v0  ;;  %v1153_v44 = vrot.slane %v5679_v9, %v5388_v49  ;;  %v1310_v9 = vrot.slane %v5629_v3, %v5391_v50  ;;  %v1351_v1 = vsel %vm1350_vm7, %v1083_v19, %v1064_v22 }
 0x272   :  { %v1110_v52 = vrot.slane %v5667_v2, %v5385_v46  ;;  %v1134_v2 = vrot.slane %v5669_v57, %v5388_v49  ;;  %v1353_v39 = vsel %vm1352_vm8, %v1102_v58, %v1351_v1  ;;  %v1329_v19 = vrot.slane %v5639_v33, %v5391_v50 }
 0x273   :  { %v1306_v33 = vsel %vm1056_vm5, %v1305_v54, %v5773_v35  ;;  %v1367_v22 = vsel %vm1356_vm10, %v1292_v6, %v1366_v40  ;;  %v6857_v40 = vld [vmem:[#allocation15_spill] sm:$0xff] }
 0x274   :  { %v5714_v45 = vpop.permute.xlu0 %922  ;;  %v1111_v34 = vsel %vm1049_vm4, %v1110_v52, %v1106_v28  ;;  %v1311_v32 = vsel %vm1063_vm6, %v1310_v9, %v1306_v33 }
 0x275   :  { %v5671_v61 = vpop.permute.xlu1 %889  ;;  %v1368_v58 = vsel %vm1358_vm11, %v1311_v32, %v1367_v22  ;;  %v6853_v32 = vmov 0.0|0.0  }
 0x278   :  { %v5754_v16 = vpop.permute.xlu0 %925 }
 0x279   :  { %v5675_v15 = vpop.permute.xlu1 %898 }
 0x27a   :  { %v1129_v13 = vrot.slane %v5675_v15, %v5385_v46  ;;  %v1115_v15 = vrot.slane %v5671_v61, %v5388_v49  ;;  %v1167_v61 = vrot.slane %v5714_v45, %v5385_v46  ;;  %v1172_v45 = vrot.slane %v5754_v16, %v5388_v49 }
 0x27c   :  { %v935_v41 = vpop.permute.xlu0 %934  ;;  %v1130_v31 = vsel %vm1049_vm4, %v1129_v13, %v1125_v24  ;;  %v1116_v53 = vsel %vm1056_vm5, %v1115_v15, %v1111_v34  ;;  %v1315_v13 = vrot.slane %v5625_v18, %v5382_v42  ;;  %v6847_v15 = vld [vmem:[#allocation38_spill] sm:$0xff] }
 0x27d   :  { %v5677_v27 = vpop.permute.xlu1 %892  ;;  %v1135_v59 = vsel %vm1056_vm5, %v1134_v2, %v1130_v31 }
 0x27e   :  { %v1120_v21 = vrot.slane %v5677_v27, %v5391_v50  ;;  %v1320_v37 = vsel %vm1049_vm4, %v1319_v47, %v1315_v13  ;;  %v6848_v47 = vld [vmem:[#allocation36_spill] sm:$0xff] }
 0x27f   :  { %v1325_v24 = vsel %vm1056_vm5, %v1324_v63, %v1320_v37 }
 0x280   :  { %v1121_v62 = vsel %vm1063_vm6, %v1120_v21, %v1116_v53  ;;  %v938_v26 = vpop.permute.xlu0 %937  ;;  %v1330_v54 = vsel %vm1063_vm6, %v1329_v19, %v1325_v24 }
 0x281   :  { %v5703_v12 = vpop.permute.xlu1 %907  ;;  %v1355_v55 = vsel %vm1354_vm9, %v1121_v62, %v1353_v39  ;;  %v1191_v3 = vrot.slane %v938_v26, %v5388_v49  ;;  %v1369_v7 = vsel %vm1360_vm13, %v1330_v54, %v1368_v58 }
 0x282   :  { %v1144_v25 = vrot.slane %v5703_v12, %v5382_v42  ;;  %v1148_v12 = vrot.slane %v5673_v60, %v5385_v46 }
 0x284   :  { %v1037_v36 = vpop.permute.xlu0 %1036 }
 0x285   :  { %v5721_v10 = vpop.permute.xlu1 %904  ;;  %v1348_v21 = vrot.slane %v1037_v36, %v5391_v50 }
 0x286   :  { %v1139_v57 = vrot.slane %v5721_v10, %v5391_v50  ;;  %v1186_v10 = vrot.slane %v935_v41, %v5385_v46  ;;  %v1338_v41 = vrot.slane %v5635_v48, %v5385_v46 }
 0x288   :  { %v1140_v29 = vsel %vm1063_vm6, %v1139_v57, %v1135_v59 }
 0x289   :  { %v920_v11 = vpop.permute.xlu1 %919  ;;  %v1357_v0 = vsel %vm1356_vm10, %v1140_v29, %v1355_v55 }
 0x28a   :  { %v1163_v51 = vrot.slane %v920_v11, %v5382_v42  ;;  %v1149_v11 = vsel %vm1049_vm4, %v1148_v12, %v1144_v25 }
 0x28b   :  { %v1154_v16 = vsel %vm1056_vm5, %v1153_v44, %v1149_v11 }
 0x28c   :  { %v1168_v43 = vsel %vm1049_vm4, %v1167_v61, %v1163_v51  ;;  %v1334_v51 = vrot.slane %v6847_v15, %v5382_v42 }
 0x28d   :  { %v917_v30 = vpop.permute.xlu1 %916  ;;  %v1173_v5 = vsel %vm1056_vm5, %v1172_v45, %v1168_v43 }
 0x28e   :  { %v1158_v60 = vrot.slane %v917_v30, %v5391_v50  ;;  %v1339_v12 = vsel %vm1049_vm4, %v1338_v41, %v1334_v51  ;;  %v6854_v51 = vld [vmem:[#allocation14_spill] sm:$0xff] }
 0x290   :  { %v1159_v30 = vsel %vm1063_vm6, %v1158_v60, %v1154_v16  ;;  %v6850_v60 = vld [vmem:[#allocation37_spill] sm:$0xff] }
 0x291   :  { %v932_v20 = vpop.permute.xlu1 %931  ;;  %v1359_v25 = vsel %vm1358_vm11, %v1159_v30, %v1357_v0 }
 0x292   :  { %v1182_v27 = vrot.slane %v932_v20, %v5382_v42 }
 0x294   :  { %v1187_v23 = vsel %vm1049_vm4, %v1186_v10, %v1182_v27 }
 0x295   :  { %v929_v8 = vpop.permute.xlu1 %928  ;;  %v1192_v18 = vsel %vm1056_vm5, %v1191_v3, %v1187_v23 }
 0x296   :  { %v1177_v17 = vrot.slane %v929_v8, %v5391_v50 }
 0x298   :  { %v1178_v28 = vsel %vm1063_vm6, %v1177_v17, %v1173_v5 }
 0x299   :  { %v941_v56 = vpop.permute.xlu1 %940  ;;  %v1361_v14 = vsel %vm1360_vm13, %v1178_v28, %v1359_v25 }
 0x29a   :  { %v1196_v52 = vrot.slane %v941_v56, %v5391_v50 }
 0x29c   :  { %v1197_v48 = vsel %vm1063_vm6, %v1196_v52, %v1192_v18 }
 0x29d   :  { %v1363_v38 = vsel %vm1362_vm12, %v1197_v48, %v1361_v14  ;;  %v1034_v35 = vpop.permute.xlu1 %1033  ;;  %v6852_v14 = vld [vmem:[#allocation12_spill] sm:$0xff] }
 0x29e   :  { %v5883_v20 = vmul.f32 %v1363_v38, %v6848_v47  ;;  %v1343_v2 = vrot.slane %v1034_v35, %v5388_v49  ;;  %v6856_v35 = vmov 0.0   ;;  %v5132_v47 = vld [vmem:[%s6727_s1] sm:$0xff] }
 0x2a0   :  { %6849 = vst [vmem:[#allocation38_spill] sm:$0xff] %v5883_v20  ;;  %v1377_v61 = vsel %vm186_vm2, %v5883_v20, -inf  ;;  %v1344_v4 = vsel %vm1056_vm5, %v1343_v2, %v1339_v12 }
 0x2a1   :  { %v1378_v31 = vrot.slane %v1377_v61, 4  ;;  %v1349_v57 = vsel %vm1063_vm6, %v1348_v21, %v1344_v4  ;;  %v6859_v4 = vld [vmem:[#allocation17_spill] sm:$0xff] }
 0x2a2   :  { %v1370_v34 = vsel %vm1362_vm12, %v1349_v57, %v1369_v7 }
 0x2a3   :  { %v1379_v11 = vmax.f32 %v1377_v61, %v1378_v31  ;;  %v5897_v27 = vmul.f32 %v1370_v34, %v6850_v60  ;;  %v6858_v61 = vld [vmem:[#allocation16_spill] sm:$0xff] }
 0x2a5   :  { %6851 = vst [vmem:[#allocation36_spill] sm:$0xff] %v5897_v27  ;;  %v1380_v44 = vrot.slane %v1379_v11, 2  ;;  %v1384_v53 = vsel %vm186_vm2, %v5897_v27, -inf }
 0x2a6   :  { %v1385_v45 = vrot.slane %v1384_v53, 4 }
 0x2a7   :  { %v1381_v43 = vmax.f32 %v1379_v11, %v1380_v44  ;;  %v5133_v11 = vld [vmem:[%s6729_s3] ss:$0 sm:$0xff] }
 0x2a8   :  { %v1386_v8 = vmax.f32 %v1384_v53, %v1385_v45 }
 0x2a9   :  { %v1382_v10 = vrot.slane %v1381_v43, 1 }
 0x2aa   :  { %v1387_v62 = vrot.slane %v1386_v8, 2 }
 0x2ab   :  { %v1383_v26 = vmax.f32 %v1381_v43, %v1382_v10 }
 0x2ac   :  { %v1388_v59 = vmax.f32 %v1386_v8, %v1387_v62 }
 0x2ad   :  { %v1391_v17 = vsub.f32 %v5883_v20, %v1383_v26 }
 0x2ae   :  { %v1389_v9 = vrot.slane %v1388_v59, 1 }
 0x2af   :  { %v1393_v1 = vmul.f32 1.442695, %v1391_v17 }
 0x2b0   :  { %v1390_v29 = vmax.f32 %v1388_v59, %v1389_v9 }
 0x2b1   :  { %4840 = vpow2.f32 %v1393_v1  ;;  %v6860_v1 = vld [vmem:[#allocation10_spill] sm:$0xff] }
 0x2b2   :  { %v1392_v16 = vsub.f32 %v5897_v27, %v1390_v29 }
 0x2b4   :  { %v1395_v39 = vmul.f32 1.442695, %v1392_v16  ;;  %v6861_v16 = vld [vmem:[#allocation8_spill] sm:$0xff] }
 0x2b6   :  { %4842 = vpow2.f32 %v1395_v39 }
 0x2bb   :  { %v4841_v30 = vpop.eup %4840 }
 0x2bc   :  { %v1397_v23 = vsel %vm186_vm2, %v4841_v30, 0.0 }
 0x2bd   :  { %v1398_v5 = vrot.slane %v1397_v23, 4 }
 0x2bf   :  { %v1399_v63 = vadd.f32 %v1398_v5, %v1397_v23  ;;  %v6863_v23 = vld [vmem:[#allocation9_spill] sm:$0xff] }
 0x2c0   :  { %v4843_v55 = vpop.eup %4842 }
 0x2c1   :  { %v1404_v3 = vsel %vm186_vm2, %v4843_v55, 0.0  ;;  %v1400_v28 = vrot.slane %v1399_v63, 2 }
 0x2c2   :  { %v1405_v56 = vrot.slane %v1404_v3, 4 }
 0x2c3   :  { %v1401_v13 = vadd.f32 %v1400_v28, %v1399_v63  ;;  %v6864_v63 = vld [vmem:[#allocation26_spill] sm:$0xff] }
 0x2c4   :  { %v1406_v19 = vadd.f32 %v1405_v56, %v1404_v3  ;;  %v6865_v3 = vld [vmem:[#allocation27_spill] sm:$0xff] }
 0x2c5   :  { %v1402_v0 = vrot.slane %v1401_v13, 1  ;;  %v6866_v56 = vld [vmem:[#allocation23_spill] sm:$0xff] }
 0x2c6   :  { %v1407_v52 = vrot.slane %v1406_v19, 2 }
 0x2c7   :  { %v1403_v6 = vadd.f32 %v1402_v0, %v1401_v13 }
 0x2c8   :  { %v1408_v41 = vadd.f32 %v1407_v52, %v1406_v19  ;;  %v6867_v19 = vld [vmem:[#allocation28_spill] sm:$0xff] }
 0x2c9   :  { %4844 = vrcp.f32 %v1403_v6 }
 0x2ca   :  { %v1409_v25 = vrot.slane %v1408_v41, 1 }
 0x2cc   :  { %v1410_v18 = vadd.f32 %v1409_v25, %v1408_v41 }
 0x2ce   :  { %4846 = vrcp.f32 %v1410_v18  ;;  %v6868_v18 = vld [vmem:[#allocation29_spill] sm:$0xff] }
 0x2d3   :  { %v4845_v33 = vpop.eup %4844 }
 0x2d4   :  { %v1413_v37 = vmul.f32 %v4845_v33, %v4841_v30  ;;  %v6862_v30 = vld [vmem:[#allocation11_spill] sm:$0xff] }
 0x2d6   :  { %4476 = vmatmul.mubr.msk.f32.vlgmr.msra.gmra.mrb[10].mxu0 %vm186_vm2, %v1413_v37  ;;  %v1561_v36 = vsel %vm186_vm2, %v1413_v37, 0.0 }
 0x2d7   :  { %1562 = vadd.xlane.f32.xlu1 %v1561_v36  ;;  %4637 = vmatpush3.bf16.msra.mxu0 %v6852_v14  ;;  %v6869_v36 = vld [vmem:[#allocation24_spill] sm:$0xff] }
 0x2d8   :  { %v4847_v48 = vpop.eup %4846  ;;  %4646 = vmatprep.subr.bf16.mxu0 %v6853_v32 }
 0x2d9   :  { %v1414_v24 = vmul.f32 %v4847_v48, %v4843_v55 }
 0x2db   :  { %4487 = vmatmul.mubr.msk.f32.vlgmr.msra.gmra.mrb[4].mxu1 %vm186_vm2, %v1414_v24  ;;  %v1564_v15 = vsel %vm186_vm2, %v1414_v24, 0.0 }
 0x2dc   :  { %4641 = vmatpush3.bf16.xpose.msk.msra.mxu1 %vm5314_vm3, %v6854_v51  ;;  %1565 = vadd.xlane.f32.xlu0 %v1564_v15 }
 0x2dd   :  { %4642 = vmatprep.subr.bf16.mxu1 %v6853_v32  ;;  %4504 = vmatprep.mubr.msk.f32.mxu1 %vm5187_vm1, %v6856_v35 }
 0x2e4   :  { %4645 = vmatpush3.bf16.xpose.msk.msra.mxu1 %vm5314_vm3, %v6857_v40 }
 0x2e5   :  { %4654 = vmatprep.subr.bf16.mxu1 %v6853_v32 }
 0x364   :  { %v1563_v31 = vpop.xlane.xlu1 %1562 }
 0x365   :  { %v1654_v34 = vadd.f32 1e-08, %v1563_v31  ;;  %v1650_v53 = vmul.f32 %v5133_v11, %v1563_v31 }
 0x369   :  { %v1566_v7 = vpop.xlane.xlu0 %1565 }
 0x36a   :  { %v1655_v57 = vadd.f32 1e-08, %v1566_v7  ;;  %v1651_v60 = vmul.f32 %v5133_v11, %v1566_v7  ;;  %v6871_v7 = vld [vmem:[#allocation30_spill] sm:$0xff] }
 0x36c   :  { %4848 = vrcp.f32 %v1655_v57 }
 0x36d   :  { %4850 = vrcp.f32 %v1654_v34 }
 0x376   :  { %v4849_v8 = vpop.eup %4848 }
 0x377   :  { %v4851_v62 = vpop.eup %4850 }
 0x3a9   :  { %v1484_v54 = vpop.f32.mrb[10].mxu0 }
 0x3aa   :  { %v1567_v2 = vmul.f32 %v5132_v47, %v1484_v54  ;;  %v4477_v22 = vpop.f32.mrb[11].mxu0 }
 0x3ac   :  { %4493 = vmatprep.mubr.msk.f32.mxu0 %vm48_vm0, %v1567_v2 }
 0x3ae   :  { %v1557_v12 = vpop.f32.mrb[4].mxu1 }
 0x3af   :  { %v1568_v21 = vmul.f32 %v5132_v47, %v1557_v12  ;;  %v4488_v58 = vpop.f32.mrb[5].mxu1 }
 0x3b1   :  { %4494 = vmatmul.mubr.msk.f32.vlgmr.msra.gmra.mrb[12].mxu0 %vm48_vm0, %v1568_v21  ;;  %v6870_v21 = vld [vmem:[#allocation31_spill] sm:$0xff] }
 0x3b2   :  { %4649 = vmatpush3.bf16.xpose.msk.msra.mxu0 %vm5314_vm3, %v6858_v61  ;;  %4515 = vmatprep.mubr.msk.f32.mxu0 %vm5187_vm1, %v6856_v35 }
 0x3b3   :  { %4650 = vmatprep.subr.bf16.mxu0 %v6853_v32 }
 0x3ba   :  { %4653 = vmatpush3.bf16.xpose.msk.msra.mxu0 %vm5314_vm3, %v6859_v4 }
 0x3bb   :  { %4660 = vmatprep.subr.bf16.mxu0 %v6853_v32 }
 0x484   :  { %v4495_v44 = vpop.f32.mrb[12].mxu0 }
 0x485   :  { %v1653_v45 = vadd.f32 %v4495_v44, %v1651_v60  ;;  %v1641_v43 = vpop.f32.mrb[13].mxu0 }
 0x486   :  { %v1652_v10 = vadd.f32 %v1650_v53, %v1641_v43 }
 0x487   :  { %v1659_v26 = vmul.f32 %v4849_v8, %v1653_v45 }
 0x488   :  { %v1658_v59 = vmul.f32 %v4851_v62, %v1652_v10 }
 0x489   :  { %4516 = vmatmul.mubr.msk.f32.vlgmr.msra.gmra.mrb[14].mxu0 %vm186_vm2, %v1659_v26  ;;  %v1807_v17 = vmul.f32 %v1659_v26, %v1659_v26 }
 0x48a   :  { %4505 = vmatmul.mubr.msk.f32.vlgmr.msra.gmra.mrb[6].mxu1 %vm186_vm2, %v1658_v59  ;;  %v1806_v9 = vmul.f32 %v1658_v59, %v1658_v59  ;;  %4662 = vmatpush3.bf16.msra.mxu0 %v6860_v1 }
 0x48b   :  { %v1811_v29 = vsel %vm186_vm2, %v1807_v17, 0.0  ;;  %4656 = vmatpush3.bf16.msra.mxu1 %v6861_v16  ;;  %4663 = vmatprep.subr.bf16.mxu0 %v6853_v32 }
 0x48c   :  { %1812 = vadd.xlane.f32.xlu1 %v1811_v29  ;;  %v1808_v39 = vsel %vm186_vm2, %v1806_v9, 0.0  ;;  %4657 = vmatprep.subr.bf16.mxu1 %v6853_v32 }
 0x48d   :  { %1809 = vadd.xlane.f32.xlu0 %v1808_v39  ;;  %4526 = vmatprep.mubr.msk.f32.mxu1 %vm5187_vm1, %v6856_v35  ;;  %v6873_v39 = vld [vmem:[#allocation32_spill] sm:$0xff] }
 0x48e   :  { %4665 = vmatpush3.bf16.msra.mxu0 %v6862_v30  ;;  %4537 = vmatprep.mubr.msk.f32.mxu0 %vm5187_vm1, %v6856_v35 }
 0x48f   :  { %4659 = vmatpush3.bf16.msra.mxu1 %v6863_v23  ;;  %4670 = vmatprep.subr.bf16.mxu0 %v6853_v32 }
 0x490   :  { %4667 = vmatprep.subr.bf16.mxu1 %v6852_v14 }
 0x519   :  { %v5955_v5 = vpop.xlane.xlu1 %1812 }
 0x51a   :  { %v1851_v55 = vrot.slane %v5955_v5, %v6864_v63  ;;  %v1855_v28 = vrot.slane %v5955_v5, %v6865_v3  ;;  %v1859_v33 = vrot.slane %v5955_v5, %v6868_v18  ;;  %v1863_v31 = vrot.slane %v5955_v5, %v6871_v7 }
 0x51c   :  { %v1929_v13 = vmul.f32 %v1851_v55, %v6866_v56  ;;  %v1928_v0 = vmul.f32 %v1851_v55, %v6867_v19  ;;  %v1933_v6 = vmul.f32 %v1855_v28, %v6866_v56  ;;  %v1932_v25 = vmul.f32 %v1855_v28, %v6867_v19 }
 0x51d   :  { %v1930_v48 = vmul.f32 %v1851_v55, %v6869_v36  ;;  %v1934_v15 = vmul.f32 %v1855_v28, %v6869_v36  ;;  %v1936_v47 = vmul.f32 %v1859_v33, %v6867_v19  ;;  %v1937_v22 = vmul.f32 %v1859_v33, %v6866_v56 }
 0x51e   :  { %v1993_v52 = vmax.f32 %v1929_v13, 1e-16  ;;  %v1992_v41 = vmax.f32 %v1928_v0, 1e-16  ;;  %v1997_v37 = vmax.f32 %v1933_v6, 1e-16  ;;  %v1931_v58 = vmul.f32 %v1851_v55, %v6870_v21 }
 0x51f   :  { %v1996_v24 = vmax.f32 %v1932_v25, 1e-16  ;;  %v1994_v54 = vmax.f32 %v1930_v48, 1e-16  ;;  %v1998_v2 = vmax.f32 %v1934_v15, 1e-16  ;;  %v1935_v34 = vmul.f32 %v1855_v28, %v6870_v21 }
 0x520   :  { %4852 = vrsqrt.f32 %v1993_v52  ;;  %v2000_v12 = vmax.f32 %v1936_v47, 1e-16  ;;  %v2001_v57 = vmax.f32 %v1937_v22, 1e-16  ;;  %v1995_v53 = vmax.f32 %v1931_v58, 1e-16 }
 0x521   :  { %4854 = vrsqrt.f32 %v1992_v41  ;;  %v1938_v45 = vmul.f32 %v1859_v33, %v6869_v36  ;;  %v1999_v10 = vmax.f32 %v1935_v34, 1e-16  ;;  %v1940_v62 = vmul.f32 %v1863_v31, %v6867_v19 }
 0x522   :  { %4856 = vrsqrt.f32 %v1997_v37  ;;  %v1941_v29 = vmul.f32 %v1863_v31, %v6866_v56  ;;  %v1867_v55 = vrot.slane %v5955_v5, %v6873_v39  ;;  %v1939_v13 = vmul.f32 %v1859_v33, %v6870_v21 }
 0x523   :  { %4858 = vrsqrt.f32 %v1996_v24  ;;  %v2002_v9 = vmax.f32 %v1938_v45, 1e-16  ;;  %v2004_v28 = vmax.f32 %v1940_v62, 1e-16  ;;  %v1942_v41 = vmul.f32 %v1863_v31, %v6869_v36 }
 0x524   :  { %4860 = vrsqrt.f32 %v1994_v54  ;;  %v2005_v6 = vmax.f32 %v1941_v29, 1e-16  ;;  %v1944_v25 = vmul.f32 %v1867_v55, %v6867_v19  ;;  %v2003_v37 = vmax.f32 %v1939_v13, 1e-16  ;;  %v6874_v54 = vld [vmem:[#allocation33_spill] sm:$0xff] }
 0x525   :  { %4862 = vrsqrt.f32 %v1998_v2  ;;  %v2006_v15 = vmax.f32 %v1942_v41, 1e-16  ;;  %v1945_v33 = vmul.f32 %v1867_v55, %v6866_v56  ;;  %v1871_v47 = vrot.slane %v5955_v5, %v6874_v54 }
 0x526   :  { %4864 = vrsqrt.f32 %v2000_v12  ;;  %v1943_v2 = vmul.f32 %v1863_v31, %v6870_v21  ;;  %v2008_v22 = vmax.f32 %v1944_v25, 1e-16  ;;  %v1946_v34 = vmul.f32 %v1867_v55, %v6869_v36  ;;  %v6876_v25 = vld [vmem:[#allocation35_spill] sm:$0xff] }
 0x527   :  { %4866 = vrsqrt.f32 %v2001_v57  ;;  %v2009_v57 = vmax.f32 %v1945_v33, 1e-16  ;;  %v6005_v33 = vpop.xlane.xlu0 %1809 }
 0x528   :  { %4868 = vrsqrt.f32 %v1995_v53  ;;  %v2010_v31 = vmax.f32 %v1946_v34, 1e-16 }
 0x529   :  { %4870 = vrsqrt.f32 %v1999_v10  ;;  %v6875_v10 = vld [vmem:[#allocation34_spill] sm:$0xff] }
 0x52a   :  { %v4853_v11 = vpop.eup %4852  ;;  %4872 = vrsqrt.f32 %v2002_v9  ;;  %v1875_v62 = vrot.slane %v5955_v5, %v6875_v10 }
 0x52b   :  { %v4855_v60 = vpop.eup %4854  ;;  %2252 = vperm.xlu0 %4711, %v4853_v11   ;;  %4874 = vrsqrt.f32 %v2004_v28  ;;  %v1948_v11 = vmul.f32 %v1871_v47, %v6867_v19  ;;  %v1950_v28 = vmul.f32 %v1871_v47, %v6869_v36 }
 0x52c   :  { %2249 = vperm.xlu1 %4710, %v4855_v60   ;;  %v4857_v59 = vpop.eup %4856  ;;  %4876 = vrsqrt.f32 %v2005_v6  ;;  %v2007_v60 = vmax.f32 %v1943_v2, 1e-16  ;;  %v1952_v13 = vmul.f32 %v1875_v62, %v6867_v19  ;;  %v1953_v41 = vmul.f32 %v1875_v62, %v6866_v56 }
 0x52d   :  { %v4859_v17 = vpop.eup %4858  ;;  %4878 = vrsqrt.f32 %v2003_v37  ;;  %v6002_v37 = vrot.slane %v5955_v5, %v6876_v25  ;;  %v1819_v5 = vrot.slane %v6005_v33, %v6864_v63 }
 0x52e   :  { %v4861_v0 = vpop.eup %4860  ;;  %4880 = vrsqrt.f32 %v2006_v15 }
 0x52f   :  { %2264 = vperm.xlu0 %4711, %v4857_v59   ;;  %v4863_v52 = vpop.eup %4862  ;;  %4882 = vrsqrt.f32 %v2008_v22  ;;  %v2012_v59 = vmax.f32 %v1948_v11, 1e-16  ;;  %v1954_v22 = vmul.f32 %v1875_v62, %v6869_v36  ;;  %v1957_v11 = vmul.f32 %v6002_v37, %v6866_v56 }
 0x530   :  { %2261 = vperm.xlu1 %4710, %v4859_v17   ;;  %v4865_v48 = vpop.eup %4864  ;;  %4884 = vrsqrt.f32 %v2009_v57 }
 0x531   :  { %v4867_v24 = vpop.eup %4866  ;;  %4886 = vrsqrt.f32 %v2007_v60  ;;  %v2018_v60 = vmax.f32 %v1954_v22, 1e-16 }
 0x532   :  { %v4869_v12 = vpop.eup %4868  ;;  %4888 = vrsqrt.f32 %v2010_v31  ;;  %v6877_v31 = vld [vmem:[#allocation20_spill] sm:$0xff] }
 0x533   :  { %2255 = vperm.xlu0 %4711, %v4861_v0   ;;  %v4871_v58 = vpop.eup %4870  ;;  %4890 = vrsqrt.f32 %v2012_v59 }
 0x534   :  { %2267 = vperm.xlu1 %4710, %v4863_v52   ;;  %v4873_v53 = vpop.eup %4872 }
 0x535   :  { %v4875_v45 = vpop.eup %4874 }
 0x536   :  { %v4877_v17 = vpop.eup %4876 }
 0x537   :  { %2273 = vperm.xlu0 %4711, %v4865_v48   ;;  %v4879_v9 = vpop.eup %4878  ;;  %v1951_v48 = vmul.f32 %v1871_v47, %v6870_v21 }
 0x538   :  { %2276 = vperm.xlu1 %4710, %v4867_v24   ;;  %v4881_v52 = vpop.eup %4880  ;;  %v2016_v24 = vmax.f32 %v1952_v13, 1e-16 }
 0x539   :  { %v4883_v6 = vpop.eup %4882  ;;  %v2015_v57 = vmax.f32 %v1951_v48, 1e-16  ;;  %v6879_v48 = vld [vmem:[#allocation21_spill] sm:$0xff] }
 0x53a   :  { %v4885_v15 = vpop.eup %4884 }
 0x53b   :  { %2258 = vperm.xlu0 %4711, %v4869_v12   ;;  %v4887_v2 = vpop.eup %4886  ;;  %v2017_v12 = vmax.f32 %v1953_v41, 1e-16  ;;  %v1827_v41 = vrot.slane %v6005_v33, %v6868_v18 }
 0x53c   :  { %2270 = vperm.xlu1 %4710, %v4871_v58   ;;  %v1956_v58 = vmul.f32 %v6002_v37, %v6867_v19 }
 0x53f   :  { %2279 = vperm.xlu0 %4711, %v4873_v53   ;;  %v2020_v53 = vmax.f32 %v1956_v58, 1e-16 }
 0x540   :  { %2285 = vperm.xlu1 %4710, %v4875_v45   ;;  %v1823_v45 = vrot.slane %v6005_v33, %v6865_v3 }
 0x542   :  { %v1901_v22 = vmul.f32 %v1823_v45, %v6877_v31 }
 0x543   :  { %2288 = vperm.xlu0 %4711, %v4877_v17   ;;  %v1955_v17 = vmul.f32 %v1875_v62, %v6870_v21  ;;  %v1898_v62 = vmul.f32 %v1819_v5, %v6879_v48 }
 0x544   :  { %2282 = vperm.xlu1 %4710, %v4879_v9   ;;  %v2021_v9 = vmax.f32 %v1957_v11, 1e-16  ;;  %v1902_v11 = vmul.f32 %v1823_v45, %v6879_v48 }
 0x547   :  { %2291 = vperm.xlu0 %4711, %v4881_v52  }
 0x548   :  { %2297 = vperm.xlu1 %4710, %v4883_v6   ;;  %v2019_v6 = vmax.f32 %v1955_v17, 1e-16 }
 0x54b   :  { %2300 = vperm.xlu0 %4711, %v4885_v15  }
 0x54c   :  { %2294 = vperm.xlu1 %4710, %v4887_v2  }
 0x55c   :  { %v5975_v44 = vpop.f32.mrb[14].mxu0 }
 0x55d   :  { %6872 = vst [vmem:[#allocation37_spill] sm:$0xff] %v5975_v44  ;;  %v5978_v43 = vpop.f32.mrb[6].mxu1  ;;  %v4517_v8 = vpop.f32.mrb[15].mxu0 }
 0x55e   :  { %v4506_v26 = vpop.f32.mrb[7].mxu1  ;;  %v1949_v8 = vmul.f32 %v1871_v47, %v6866_v56  ;;  %v4889_v47 = vpop.eup %4888 }
 0x55f   :  { %v1947_v26 = vmul.f32 %v1867_v55, %v6870_v21  ;;  %v2014_v55 = vmax.f32 %v1950_v28, 1e-16  ;;  %v4891_v34 = vpop.eup %4890  ;;  %2303 = vperm.xlu0 %4711, %v4889_v47  }
 0x560   :  { %v2013_v29 = vmax.f32 %v1949_v8, 1e-16  ;;  %2309 = vperm.xlu1 %4710, %v4891_v34   ;;  %v1897_v8 = vmul.f32 %v1819_v5, %v6877_v31 }
 0x561   :  { %v2011_v0 = vmax.f32 %v1947_v26, 1e-16 }
 0x562   :  { %4892 = vrsqrt.f32 %v2013_v29  ;;  %v6878_v29 = vld [vmem:[#allocation22_spill] sm:$0xff]  ;;  %v1961_v13 = vmax.f32 %v1897_v8, 1e-16 }
 0x563   :  { %4894 = vrsqrt.f32 %v2011_v0  ;;  %v1900_v28 = vmul.f32 %v1823_v45, %v6878_v29  ;;  %v1904_v58 = vmul.f32 %v1827_v41, %v6878_v29 }
 0x564   :  { %4896 = vrsqrt.f32 %v2014_v55  ;;  %v1896_v55 = vmul.f32 %v1819_v5, %v6878_v29 }
 0x565   :  { %4898 = vrsqrt.f32 %v2016_v24  ;;  %v1964_v24 = vmax.f32 %v1900_v28, 1e-16  ;;  %v1966_v28 = vmax.f32 %v1902_v11, 1e-16 }
 0x566   :  { %4900 = vrsqrt.f32 %v2017_v12  ;;  %v1960_v12 = vmax.f32 %v1896_v55, 1e-16 }
 0x567   :  { %4902 = vrsqrt.f32 %v2015_v57  ;;  %v1962_v57 = vmax.f32 %v1898_v62, 1e-16 }
 0x568   :  { %4904 = vrsqrt.f32 %v2018_v60  ;;  %v1965_v60 = vmax.f32 %v1901_v22, 1e-16 }
 0x569   :  { %4906 = vrsqrt.f32 %v2020_v53  ;;  %v6880_v53 = vld [vmem:[#allocation25_spill] sm:$0xff] }
 0x56a   :  { %4908 = vrsqrt.f32 %v2021_v9  ;;  %v1899_v8 = vmul.f32 %v1819_v5, %v6880_v53  ;;  %v1905_v9 = vmul.f32 %v1827_v41, %v6877_v31  ;;  %v1903_v5 = vmul.f32 %v1823_v45, %v6880_v53 }
 0x56b   :  { %4910 = vrsqrt.f32 %v1961_v13  ;;  %v1831_v13 = vrot.slane %v6005_v33, %v6871_v7 }
 0x56c   :  { %v4893_v26 = vpop.eup %4892  ;;  %4912 = vrsqrt.f32 %v2019_v6  ;;  %v1969_v62 = vmax.f32 %v1905_v9, 1e-16 }
 0x56d   :  { %v4895_v59 = vpop.eup %4894  ;;  %2312 = vperm.xlu0 %4711, %v4893_v26   ;;  %4914 = vrsqrt.f32 %v1964_v24  ;;  %v1968_v26 = vmax.f32 %v1904_v58, 1e-16  ;;  %v1909_v24 = vmul.f32 %v1831_v13, %v6877_v31  ;;  %v1967_v58 = vmax.f32 %v1903_v5, 1e-16 }
 0x56e   :  { %2306 = vperm.xlu1 %4710, %v4895_v59   ;;  %v4897_v0 = vpop.eup %4896  ;;  %4916 = vrsqrt.f32 %v1960_v12  ;;  %v1908_v12 = vmul.f32 %v1831_v13, %v6878_v29  ;;  %v1910_v45 = vmul.f32 %v1831_v13, %v6879_v48 }
 0x56f   :  { %v4899_v52 = vpop.eup %4898  ;;  %4918 = vrsqrt.f32 %v1962_v57  ;;  %v1835_v57 = vrot.slane %v6005_v33, %v6873_v39 }
 0x570   :  { %v4901_v15 = vpop.eup %4900  ;;  %4920 = vrsqrt.f32 %v1965_v60  ;;  %v1907_v60 = vmul.f32 %v1827_v41, %v6880_v53 }
 0x571   :  { %2315 = vperm.xlu0 %4711, %v4897_v0   ;;  %v4903_v2 = vpop.eup %4902  ;;  %v1906_v0 = vmul.f32 %v1827_v41, %v6879_v48  ;;  %4922 = vrsqrt.f32 %v1968_v26  ;;  %v1913_v26 = vmul.f32 %v1835_v57, %v6877_v31  ;;  %v1911_v41 = vmul.f32 %v1831_v13, %v6880_v53 }
 0x572   :  { %2321 = vperm.xlu1 %4710, %v4899_v52   ;;  %v4905_v47 = vpop.eup %4904  ;;  %v1963_v52 = vmax.f32 %v1899_v8, 1e-16  ;;  %4924 = vrsqrt.f32 %v1966_v28  ;;  %v1972_v8 = vmax.f32 %v1908_v12, 1e-16  ;;  %v1912_v28 = vmul.f32 %v1835_v57, %v6878_v29 }
 0x573   :  { %v4907_v34 = vpop.eup %4906 }
 0x574   :  { %v4909_v59 = vpop.eup %4908  ;;  %4926 = vrsqrt.f32 %v1963_v52  ;;  %v1839_v52 = vrot.slane %v6005_v33, %v6874_v54 }
 0x575   :  { %2324 = vperm.xlu0 %4711, %v4901_v15   ;;  %v4911_v17 = vpop.eup %4910  ;;  %v1970_v15 = vmax.f32 %v1906_v0, 1e-16  ;;  %4928 = vrsqrt.f32 %v1969_v62  ;;  %v1971_v0 = vmax.f32 %v1907_v60, 1e-16  ;;  %v1914_v62 = vmul.f32 %v1835_v57, %v6879_v48 }
 0x576   :  { %2318 = vperm.xlu1 %4710, %v4903_v2   ;;  %v4913_v6 = vpop.eup %4912 }
 0x577   :  { %v4915_v55 = vpop.eup %4914  ;;  %4930 = vrsqrt.f32 %v1970_v15  ;;  %v1916_v15 = vmul.f32 %v1839_v52, %v6878_v29  ;;  %v1978_v13 = vmax.f32 %v1914_v62, 1e-16 }
 0x578   :  { %v4917_v2 = vpop.eup %4916  ;;  %4932 = vrsqrt.f32 %v1967_v58  ;;  %v1917_v58 = vmul.f32 %v1839_v52, %v6877_v31 }
 0x579   :  { %2327 = vperm.xlu0 %4711, %v4905_v47   ;;  %v4919_v22 = vpop.eup %4918  ;;  %v1973_v47 = vmax.f32 %v1909_v24, 1e-16  ;;  %v1976_v24 = vmax.f32 %v1912_v28, 1e-16 }
 0x57a   :  { %2333 = vperm.xlu1 %4710, %v4907_v34   ;;  %v4921_v34 = vpop.eup %4920 }
 0x57b   :  { %v4923_v11 = vpop.eup %4922  ;;  %4934 = vrsqrt.f32 %v1973_v47  ;;  %v1915_v47 = vmul.f32 %v1835_v57, %v6880_v53 }
 0x57c   :  { %4936 = vrsqrt.f32 %v1972_v8  ;;  %v1918_v8 = vmul.f32 %v1839_v52, %v6879_v48 }
 0x57d   :  { %2336 = vperm.xlu0 %4711, %v4909_v59   ;;  %v1974_v59 = vmax.f32 %v1910_v45, 1e-16  ;;  %v1843_v45 = vrot.slane %v6005_v33, %v6875_v10 }
 0x57e   :  { %2156 = vperm.xlu1 %4710, %v4911_v17   ;;  %v4925_v17 = vpop.eup %4924  ;;  %v1982_v57 = vmax.f32 %v1918_v8, 1e-16 }
 0x57f   :  { %v4927_v9 = vpop.eup %4926  ;;  %4938 = vrsqrt.f32 %v1974_v59  ;;  %v1920_v59 = vmul.f32 %v1843_v45, %v6878_v29 }
 0x580   :  { %4940 = vrsqrt.f32 %v1971_v0  ;;  %v1921_v0 = vmul.f32 %v1843_v45, %v6877_v31 }
 0x581   :  { %2330 = vperm.xlu0 %4711, %v4913_v6   ;;  %v1977_v6 = vmax.f32 %v1913_v26, 1e-16  ;;  %v1981_v26 = vmax.f32 %v1917_v58, 1e-16 }
 0x582   :  { %2165 = vperm.xlu1 %4710, %v4915_v55   ;;  %v4929_v55 = vpop.eup %4928 }
 0x583   :  { %v4931_v5 = vpop.eup %4930  ;;  %4942 = vrsqrt.f32 %v1977_v6  ;;  %v1919_v6 = vmul.f32 %v1839_v52, %v6880_v53 }
 0x584   :  { %4944 = vrsqrt.f32 %v1976_v24  ;;  %v1922_v24 = vmul.f32 %v1843_v45, %v6879_v48 }
 0x585   :  { %2153 = vperm.xlu0 %4711, %v4917_v2   ;;  %v1975_v2 = vmax.f32 %v1911_v41, 1e-16  ;;  %v1847_v41 = vrot.slane %v6005_v33, %v6876_v25 }
 0x586   :  { %2159 = vperm.xlu1 %4710, %v4919_v22   ;;  %v4933_v22 = vpop.eup %4932  ;;  %v1986_v52 = vmax.f32 %v1922_v24, 1e-16 }
 0x587   :  { %v4935_v12 = vpop.eup %4934  ;;  %4946 = vrsqrt.f32 %v1975_v2  ;;  %v1924_v2 = vmul.f32 %v1847_v41, %v6878_v29  ;;  %v1925_v33 = vmul.f32 %v1847_v41, %v6877_v31 }
 0x588   :  { %4948 = vrsqrt.f32 %v1978_v13  ;;  %v1923_v13 = vmul.f32 %v1843_v45, %v6880_v53  ;;  %v1959_v45 = vmul.f32 %v6002_v37, %v6870_v21 }
 0x589   :  { %2168 = vperm.xlu0 %4711, %v4921_v34   ;;  %v1980_v34 = vmax.f32 %v1916_v15, 1e-16  ;;  %v1985_v15 = vmax.f32 %v1921_v0, 1e-16  ;;  %v1989_v8 = vmax.f32 %v1925_v33, 1e-16  ;;  %v1958_v0 = vmul.f32 %v6002_v37, %v6869_v36 }
 0x58a   :  { %2177 = vperm.xlu1 %4710, %v4923_v11   ;;  %v4937_v11 = vpop.eup %4936 }
 0x58b   :  { %v4939_v60 = vpop.eup %4938  ;;  %4950 = vrsqrt.f32 %v1980_v34 }
 0x58c   :  { %4952 = vrsqrt.f32 %v1981_v26  ;;  %v1927_v26 = vmul.f32 %v1847_v41, %v6880_v53 }
 0x58d   :  { %2171 = vperm.xlu0 %4711, %v4925_v17   ;;  %v1979_v17 = vmax.f32 %v1915_v47, 1e-16  ;;  %v1988_v47 = vmax.f32 %v1924_v2, 1e-16 }
 0x58e   :  { %2162 = vperm.xlu1 %4710, %v4927_v9   ;;  %v4941_v9 = vpop.eup %4940 }
 0x58f   :  { %v4943_v28 = vpop.eup %4942  ;;  %4954 = vrsqrt.f32 %v1979_v17 }
 0x590   :  { %4956 = vrsqrt.f32 %v1982_v57  ;;  %v1991_v57 = vmax.f32 %v1927_v26, 1e-16 }
 0x591   :  { %2180 = vperm.xlu0 %4711, %v4929_v55   ;;  %v1984_v55 = vmax.f32 %v1920_v59, 1e-16  ;;  %v1987_v59 = vmax.f32 %v1923_v13, 1e-16 }
 0x592   :  { %2183 = vperm.xlu1 %4710, %v4931_v5   ;;  %v4945_v5 = vpop.eup %4944 }
 0x593   :  { %v4947_v62 = vpop.eup %4946  ;;  %4958 = vrsqrt.f32 %v1984_v55 }
 0x594   :  { %4960 = vrsqrt.f32 %v1985_v15 }
 0x595   :  { %2174 = vperm.xlu0 %4711, %v4933_v22   ;;  %v1983_v22 = vmax.f32 %v1919_v6, 1e-16 }
 0x596   :  { %2192 = vperm.xlu1 %4710, %v4935_v12   ;;  %v4949_v12 = vpop.eup %4948 }
 0x597   :  { %v4951_v58 = vpop.eup %4950  ;;  %4962 = vrsqrt.f32 %v1983_v22 }
 0x598   :  { %v4953_v34 = vpop.eup %4952  ;;  %4964 = vrsqrt.f32 %v1986_v52 }
 0x599   :  { %2189 = vperm.xlu0 %4711, %v4937_v11   ;;  %v4955_v11 = vpop.eup %4954  ;;  %4966 = vrsqrt.f32 %v1988_v47 }
 0x59a   :  { %2195 = vperm.xlu1 %4710, %v4939_v60   ;;  %v1926_v60 = vmul.f32 %v1847_v41, %v6879_v48  ;;  %v4957_v17 = vpop.eup %4956  ;;  %4968 = vrsqrt.f32 %v1989_v8  ;;  %v2023_v41 = vmax.f32 %v1959_v45, 1e-16 }
 0x59b   :  { %4970 = vrsqrt.f32 %v1987_v59 }
 0x59d   :  { %2186 = vperm.xlu0 %4711, %v4941_v9   ;;  %v4959_v9 = vpop.eup %4958 }
 0x59e   :  { %2204 = vperm.xlu1 %4710, %v4943_v28   ;;  %v1990_v28 = vmax.f32 %v1926_v60, 1e-16  ;;  %v4961_v6 = vpop.eup %4960 }
 0x5a0   :  { %4972 = vrsqrt.f32 %v1990_v28 }
 0x5a1   :  { %2201 = vperm.xlu0 %4711, %v4945_v5   ;;  %v4963_v55 = vpop.eup %4962  ;;  %v2022_v5 = vmax.f32 %v1958_v0, 1e-16  ;;  %4974 = vrsqrt.f32 %v1991_v57 }
 0x5a2   :  { %2198 = vperm.xlu1 %4710, %v4947_v62   ;;  %v4965_v62 = vpop.eup %4964  ;;  %4976 = vrsqrt.f32 %v2023_v41 }
 0x5a3   :  { %v4967_v24 = vpop.eup %4966  ;;  %4978 = vrsqrt.f32 %v2022_v5 }
 0x5a4   :  { %v4969_v15 = vpop.eup %4968 }
 0x5a5   :  { %2207 = vperm.xlu0 %4711, %v4949_v12   ;;  %v4971_v2 = vpop.eup %4970 }
 0x5a6   :  { %2213 = vperm.xlu1 %4710, %v4951_v58  }
 0x5a9   :  { %2216 = vperm.xlu0 %4711, %v4953_v34  }
 0x5aa   :  { %2210 = vperm.xlu1 %4710, %v4955_v11   ;;  %v4973_v37 = vpop.eup %4972  ;;  %v6065_v33 = vpop.permute.xlu0 %2252 }
 0x5ab   :  { %v4975_v22 = vpop.eup %4974  ;;  %v2250_v52 = vpop.permute.xlu1 %2249  ;;  %v2503_v4 = vrot.slane %v6065_v33, %v5385_v46 }
 0x5ac   :  { %v4977_v12 = vpop.eup %4976  ;;  %v2499_v61 = vrot.slane %v2250_v52, %v5382_v42 }
 0x5ad   :  { %2219 = vperm.xlu0 %4711, %v4957_v17   ;;  %v4979_v58 = vpop.eup %4978 }
 0x5ae   :  { %2225 = vperm.xlu1 %4710, %v4959_v9   ;;  %v2265_v13 = vpop.permute.xlu0 %2264 }
 0x5af   :  { %v2262_v47 = vpop.permute.xlu1 %2261  ;;  %v2522_v40 = vrot.slane %v2265_v13, %v5385_v46 }
 0x5b0   :  { %v2518_v35 = vrot.slane %v2262_v47, %v5382_v42  ;;  %v2504_v47 = vsel %vm1049_vm4, %v2503_v4, %v2499_v61 }
 0x5b1   :  { %2228 = vperm.xlu0 %4711, %v4961_v6  }
 0x5b2   :  { %2222 = vperm.xlu1 %4710, %v4963_v55   ;;  %v2256_v34 = vpop.permute.xlu0 %2255 }
 0x5b3   :  { %v2268_v11 = vpop.permute.xlu1 %2267  ;;  %v2508_v38 = vrot.slane %v2256_v34, %v5388_v49  ;;  %v2523_v34 = vsel %vm1049_vm4, %v2522_v40, %v2518_v35 }
 0x5b4   :  { %v2527_v51 = vrot.slane %v2268_v11, %v5388_v49 }
 0x5b5   :  { %2231 = vperm.xlu0 %4711, %v4965_v62  }
 0x5b6   :  { %2237 = vperm.xlu1 %4710, %v4967_v24   ;;  %v2274_v60 = vpop.permute.xlu0 %2273 }
 0x5b7   :  { %v2277_v8 = vpop.permute.xlu1 %2276  ;;  %v2537_v32 = vrot.slane %v2274_v60, %v5382_v42  ;;  %v2509_v60 = vsel %vm1056_vm5, %v2508_v38, %v2504_v47 }
 0x5b8   :  { %v2541_v14 = vrot.slane %v2277_v8, %v5385_v46  ;;  %v2528_v8 = vsel %vm1056_vm5, %v2527_v51, %v2523_v34 }
 0x5b9   :  { %2240 = vperm.xlu0 %4711, %v4969_v15  }
 0x5ba   :  { %2234 = vperm.xlu1 %4710, %v4971_v2   ;;  %v6067_v26 = vpop.permute.xlu0 %2258 }
 0x5bb   :  { %v6069_v59 = vpop.permute.xlu1 %2270  ;;  %v2513_v44 = vrot.slane %v6067_v26, %v5391_v50  ;;  %v2542_v26 = vsel %vm1049_vm4, %v2541_v14, %v2537_v32 }
 0x5bc   :  { %v2532_v33 = vrot.slane %v6069_v59, %v5391_v50 }
 0x5bd   :  { %2243 = vperm.xlu0 %4711, %v4973_v37  }
 0x5be   :  { %2246 = vperm.xlu1 %4710, %v4975_v22   ;;  %v6071_v17 = vpop.permute.xlu0 %2279  ;;  %v2533_v61 = vsel %vm1063_vm6, %v2532_v33, %v2528_v8 }
 0x5bf   :  { %v6073_v9 = vpop.permute.xlu1 %2285  ;;  %v2546_v13 = vrot.slane %v6071_v17, %v5388_v49  ;;  %v2514_v17 = vsel %vm1063_vm6, %v2513_v44, %v2509_v60 }
 0x5c0   :  { %v2556_v14 = vrot.slane %v6073_v9, %v5382_v42 }
 0x5c1   :  { %2342 = vperm.xlu0 %4711, %v4977_v12   ;;  %v2547_v51 = vsel %vm1056_vm5, %v2546_v13, %v2542_v26 }
 0x5c2   :  { %2339 = vperm.xlu1 %4710, %v4979_v58   ;;  %v6075_v45 = vpop.permute.xlu0 %2288 }
 0x5c3   :  { %v6077_v28 = vpop.permute.xlu1 %2282  ;;  %v2560_v59 = vrot.slane %v6075_v45, %v5385_v46 }
 0x5c4   :  { %v2551_v11 = vrot.slane %v6077_v28, %v5391_v50 }
 0x5c6   :  { %v6079_v0 = vpop.permute.xlu0 %2291  ;;  %v2552_v44 = vsel %vm1063_vm6, %v2551_v11, %v2547_v51 }
 0x5c7   :  { %v6081_v57 = vpop.permute.xlu1 %2297  ;;  %v2565_v35 = vrot.slane %v6079_v0, %v5388_v49  ;;  %v2561_v0 = vsel %vm1049_vm4, %v2560_v59, %v2556_v14 }
 0x5c8   :  { %v2575_v45 = vrot.slane %v6081_v57, %v5382_v42 }
 0x5c9   :  { %v2566_v33 = vsel %vm1056_vm5, %v2565_v35, %v2561_v0 }
 0x5ca   :  { %v6083_v6 = vpop.permute.xlu0 %2300 }
 0x5cb   :  { %v6085_v55 = vpop.permute.xlu1 %2294  ;;  %v2579_v40 = vrot.slane %v6083_v6, %v5385_v46 }
 0x5cc   :  { %v2570_v32 = vrot.slane %v6085_v55, %v5391_v50 }
 0x5cd   :  { %v2580_v13 = vsel %vm1049_vm4, %v2579_v40, %v2575_v45 }
 0x5de   :  { %v6087_v41 = vpop.permute.xlu0 %2303 }
 0x5df   :  { %v6089_v5 = vpop.permute.xlu1 %2309  ;;  %v2584_v4 = vrot.slane %v6087_v41, %v5388_v49  ;;  %v2655_v41 = vsel %vm1350_vm7, %v2533_v61, %v2514_v17 }
 0x5e0   :  { %v2594_v57 = vrot.slane %v6089_v5, %v5382_v42  ;;  %v6212_v47 = vsel %vm1352_vm8, %v2552_v44, %v2655_v41 }
 0x5ec   :  { %v6091_v62 = vpop.permute.xlu0 %2312 }
 0x5ed   :  { %v6093_v24 = vpop.permute.xlu1 %2306  ;;  %v2598_v28 = vrot.slane %v6091_v62, %v5385_v46 }
 0x5ee   :  { %v2589_v6 = vrot.slane %v6093_v24, %v5391_v50  ;;  %v6215_v24 = vsel %vm1063_vm6, %v2570_v32, %v2566_v33 }
 0x5ef   :  { %v6221_v11 = vsel %vm1049_vm4, %v2598_v28, %v2594_v57 }
 0x5f0   :  { %v6095_v15 = vpop.permute.xlu0 %2315 }
 0x5f1   :  { %v6097_v2 = vpop.permute.xlu1 %2321 }
 0x5f4   :  { %v6099_v37 = vpop.permute.xlu0 %2324 }
 0x5f5   :  { %v6101_v22 = vpop.permute.xlu1 %2318 }
 0x5f8   :  { %v6103_v12 = vpop.permute.xlu0 %2327 }
 0x5f9   :  { %v6105_v58 = vpop.permute.xlu1 %2333 }
 0x5fc   :  { %v6107_v53 = vpop.permute.xlu0 %2336 }
 0x5fd   :  { %v6109_v48 = vpop.permute.xlu1 %2156 }
 0x5fe   :  { %v2351_v34 = vrot.slane %v6109_v48, %v5385_v46 }
 0x600   :  { %v6111_v29 = vpop.permute.xlu0 %2330 }
 0x601   :  { %v6113_v31 = vpop.permute.xlu1 %2165 }
 0x604   :  { %v6115_v25 = vpop.permute.xlu0 %2153 }
 0x605   :  { %v6117_v10 = vpop.permute.xlu1 %2159  ;;  %v2347_v9 = vrot.slane %v6115_v25, %v5382_v42  ;;  %v2585_v25 = vsel %vm1056_vm5, %v2584_v4, %v2580_v13  ;;  %v2608_v4 = vrot.slane %v6101_v22, %v5391_v50 }
 0x606   :  { %v2356_v60 = vrot.slane %v6117_v10, %v5388_v49  ;;  %v6230_v26 = vsel %vm1063_vm6, %v2589_v6, %v2585_v25  ;;  %v2603_v10 = vrot.slane %v6095_v15, %v5388_v49 }
 0x607   :  { %v2352_v59 = vsel %vm1049_vm4, %v2351_v34, %v2347_v9 }
 0x608   :  { %v6119_v54 = vpop.permute.xlu0 %2168 }
 0x609   :  { %v6121_v39 = vpop.permute.xlu1 %2177  ;;  %v2370_v5 = vrot.slane %v6119_v54, %v5385_v46  ;;  %v2366_v54 = vrot.slane %v6113_v31, %v5382_v42  ;;  %v2357_v31 = vsel %vm1056_vm5, %v2356_v60, %v2352_v59 }
 0x60c   :  { %v6123_v21 = vpop.permute.xlu0 %2171 }
 0x60d   :  { %v6125_v7 = vpop.permute.xlu1 %2162  ;;  %v2375_v48 = vrot.slane %v6123_v21, %v5388_v49  ;;  %v2613_v21 = vrot.slane %v6097_v2, %v5382_v42  ;;  %v2657_v2 = vsel %vm1354_vm9, %v6215_v24, %v6212_v47 }
 0x60e   :  { %v2361_v17 = vrot.slane %v6125_v7, %v5391_v50  ;;  %v2617_v7 = vrot.slane %v6099_v37, %v5385_v46 }
 0x610   :  { %v6127_v36 = vpop.permute.xlu0 %2180  ;;  %v2362_v44 = vsel %vm1063_vm6, %v2361_v17, %v2357_v31 }
 0x611   :  { %v6129_v18 = vpop.permute.xlu1 %2183  ;;  %v2389_v8 = vrot.slane %v6127_v36, %v5385_v46  ;;  %v2385_v36 = vrot.slane %v6121_v39, %v5382_v42  ;;  %v2371_v39 = vsel %vm1049_vm4, %v2370_v5, %v2366_v54 }
 0x612   :  { %v2394_v51 = vrot.slane %v6129_v18, %v5388_v49  ;;  %v2376_v37 = vsel %vm1056_vm5, %v2375_v48, %v2371_v39 }
 0x613   :  { %v2390_v32 = vsel %vm1049_vm4, %v2389_v8, %v2385_v36 }
 0x614   :  { %v6131_v56 = vpop.permute.xlu0 %2174  ;;  %v2395_v6 = vsel %vm1056_vm5, %v2394_v51, %v2390_v32 }
 0x615   :  { %v6133_v19 = vpop.permute.xlu1 %2192  ;;  %v2380_v14 = vrot.slane %v6131_v56, %v5391_v50 }
 0x617   :  { %v2381_v9 = vsel %vm1063_vm6, %v2380_v14, %v2376_v37  ;;  %v2622_v14 = vrot.slane %v6103_v12, %v5388_v49  ;;  %v2627_v37 = vrot.slane %v6111_v29, %v5391_v50  ;;  %v2604_v12 = vsel %vm1056_vm5, %v2603_v10, %v6221_v11 }
 0x618   :  { %v6135_v3 = vpop.permute.xlu0 %2189  ;;  %v2648_v48 = vsel %vm1350_vm7, %v2381_v9, %v2362_v44  ;;  %v2618_v29 = vsel %vm1049_vm4, %v2617_v7, %v2613_v21 }
 0x619   :  { %v6137_v63 = vpop.permute.xlu1 %2195  ;;  %v2404_v35 = vrot.slane %v6135_v3, %v5382_v42  ;;  %v2408_v3 = vrot.slane %v6133_v19, %v5385_v46  ;;  %v2623_v11 = vsel %vm1056_vm5, %v2622_v14, %v2618_v29 }
 0x61a   :  { %v2413_v18 = vrot.slane %v6137_v63, %v5388_v49  ;;  %v2628_v21 = vsel %vm1063_vm6, %v2627_v37, %v2623_v11 }
 0x61b   :  { %v2409_v45 = vsel %vm1049_vm4, %v2408_v3, %v2404_v35 }
 0x61c   :  { %v6139_v23 = vpop.permute.xlu0 %2186  ;;  %v2414_v13 = vsel %vm1056_vm5, %v2413_v18, %v2409_v45  ;;  %v2636_v45 = vrot.slane %v6107_v53, %v5385_v46  ;;  %v2632_v53 = vrot.slane %v6105_v58, %v5382_v42 }
 0x61d   :  { %v6141_v30 = vpop.permute.xlu1 %2204  ;;  %v2399_v28 = vrot.slane %v6139_v23, %v5391_v50 }
 0x61e   :  { %v2427_v23 = vrot.slane %v6141_v30, %v5385_v46  ;;  %v2637_v58 = vsel %vm1049_vm4, %v2636_v45, %v2632_v53  ;;  %v6885_v53 = vmov 0.0|0.0  }
 0x61f   :  { %v2400_v30 = vsel %vm1063_vm6, %v2399_v28, %v2395_v6 }
 0x620   :  { %v6143_v16 = vpop.permute.xlu0 %2201  ;;  %v2649_v36 = vsel %vm1352_vm8, %v2400_v30, %v2648_v48 }
 0x621   :  { %v6145_v1 = vpop.permute.xlu1 %2198  ;;  %v2423_v0 = vrot.slane %v6143_v16, %v5382_v42 }
 0x622   :  { %v2418_v19 = vrot.slane %v6145_v1, %v5391_v50 }
 0x623   :  { %v2428_v34 = vsel %vm1049_vm4, %v2427_v23, %v2423_v0 }
 0x624   :  { %v6156_v27 = vpop.permute.xlu0 %2207 }
 0x625   :  { %v6162_v52 = vpop.permute.xlu1 %2213  ;;  %v2432_v63 = vrot.slane %v6156_v27, %v5388_v49 }
 0x626   :  { %v2442_v57 = vrot.slane %v6162_v52, %v5382_v42 }
 0x627   :  { %v2433_v5 = vsel %vm1056_vm5, %v2432_v63, %v2428_v34 }
 0x628   :  { %v6175_v20 = vpop.permute.xlu0 %2216 }
 0x629   :  { %v6183_v38 = vpop.permute.xlu1 %2210  ;;  %v2446_v41 = vrot.slane %v6175_v20, %v5385_v46 }
 0x62a   :  { %v2437_v16 = vrot.slane %v6183_v38, %v5391_v50  ;;  %v2419_v38 = vsel %vm1063_vm6, %v2418_v19, %v2414_v13  ;;  %v2609_v19 = vsel %vm1063_vm6, %v2608_v4, %v2604_v12 }
 0x62b   :  { %v2447_v8 = vsel %vm1049_vm4, %v2446_v41, %v2442_v57  ;;  %v2650_v31 = vsel %vm1354_vm9, %v2419_v38, %v2649_v36  ;;  %v2658_v41 = vsel %vm1356_vm10, %v6230_v26, %v2657_v2  ;;  %v6882_v26 = vld [vmem:[#allocation37_spill] sm:$0xff] }
 0x62c   :  { %v6202_v55 = vpop.permute.xlu0 %2219  ;;  %v2438_v17 = vsel %vm1063_vm6, %v2437_v16, %v2433_v5  ;;  %v2659_v23 = vsel %vm1358_vm11, %v2609_v19, %v2658_v41  ;;  %v6881_v16 = vld [vmem:[#allocation38_spill] sm:$0xff]  ;;  %v5134_v41 = vld [vmem:[%s6727_s1] sm:$0xff] }
 0x62d   :  { %v6209_v62 = vpop.permute.xlu1 %2225  ;;  %v2451_v1 = vrot.slane %v6202_v55, %v5388_v49  ;;  %v2651_v44 = vsel %vm1356_vm10, %v2438_v17, %v2650_v31  ;;  %v2660_v47 = vsel %vm1360_vm13, %v2628_v21, %v2659_v23  ;;  %v6888_v21 = vmov 0.0  }
 0x62e   :  { %v2461_v55 = vrot.slane %v6209_v62, %v5382_v42 }
 0x630   :  { %v2229_v61 = vpop.permute.xlu0 %2228 }
 0x631   :  { %v2223_v40 = vpop.permute.xlu1 %2222  ;;  %v2465_v33 = vrot.slane %v2229_v61, %v5385_v46  ;;  %v2452_v61 = vsel %vm1056_vm5, %v2451_v1, %v2447_v8 }
 0x632   :  { %v2456_v27 = vrot.slane %v2223_v40, %v5391_v50 }
 0x633   :  { %v2466_v54 = vsel %vm1049_vm4, %v2465_v33, %v2461_v55 }
 0x634   :  { %v2232_v56 = vpop.permute.xlu0 %2231  ;;  %v2457_v62 = vsel %vm1063_vm6, %v2456_v27, %v2452_v61 }
 0x635   :  { %v2238_v22 = vpop.permute.xlu1 %2237  ;;  %v2470_v20 = vrot.slane %v2232_v56, %v5388_v49  ;;  %v2652_v28 = vsel %vm1358_vm11, %v2457_v62, %v2651_v44 }
 0x636   :  { %v2480_v40 = vrot.slane %v2238_v22, %v5382_v42 }
 0x637   :  { %v2471_v35 = vsel %vm1056_vm5, %v2470_v20, %v2466_v54 }
 0x638   :  { %v2241_v25 = vpop.permute.xlu0 %2240 }
 0x639   :  { %v2235_v60 = vpop.permute.xlu1 %2234  ;;  %v2484_v52 = vrot.slane %v2241_v25, %v5385_v46  ;;  %v6883_v25 = vld [vmem:[#allocation36_spill] sm:$0xff] }
 0x63a   :  { %v2475_v59 = vrot.slane %v2235_v60, %v5391_v50 }
 0x63b   :  { %v2485_v18 = vsel %vm1049_vm4, %v2484_v52, %v2480_v40 }
 0x63c   :  { %v2244_v51 = vpop.permute.xlu0 %2243  ;;  %v2476_v39 = vsel %vm1063_vm6, %v2475_v59, %v2471_v35 }
 0x63d   :  { %v2489_v32 = vrot.slane %v2244_v51, %v5388_v49  ;;  %v2247_v3 = vpop.permute.xlu1 %2246  ;;  %v2653_v22 = vsel %vm1360_vm13, %v2476_v39, %v2652_v28 }
 0x63e   :  { %v2494_v56 = vrot.slane %v2247_v3, %v5391_v50 }
 0x63f   :  { %v2490_v0 = vsel %vm1056_vm5, %v2489_v32, %v2485_v18 }
 0x640   :  { %v2495_v15 = vsel %vm1063_vm6, %v2494_v56, %v2490_v0  ;;  %v2343_v6 = vpop.permute.xlu0 %2342 }
 0x641   :  { %v2654_v10 = vsel %vm1362_vm12, %v2495_v15, %v2653_v22  ;;  %v2646_v9 = vrot.slane %v2343_v6, %v5391_v50  ;;  %v2340_v63 = vpop.permute.xlu1 %2339  ;;  %v6884_v6 = vld [vmem:[#allocation12_spill] sm:$0xff] }
 0x642   :  { %v2664_v7 = vmul.f32 %v2654_v10, %v5978_v43  ;;  %v2641_v4 = vrot.slane %v2340_v63, %v5388_v49  ;;  %v6886_v63 = vld [vmem:[#allocation14_spill] sm:$0xff] }
 0x644   :  { %v6348_v1 = vadd.f32 %v2664_v7, %v6881_v16  ;;  %v2642_v33 = vsel %vm1056_vm5, %v2641_v4, %v2637_v58  ;;  %v6889_v7 = vld [vmem:[#allocation15_spill] sm:$0xff] }
 0x645   :  { %v2647_v24 = vsel %vm1063_vm6, %v2646_v9, %v2642_v33 }
 0x646   :  { %v2668_v43 = vsel %vm186_vm2, %v6348_v1, -inf  ;;  %v2661_v13 = vsel %vm1362_vm12, %v2647_v24, %v2660_v47  ;;  %v6890_v24 = vld [vmem:[#allocation16_spill] sm:$0xff] }
 0x647   :  { %v2669_v57 = vrot.slane %v2668_v43, 4  ;;  %v2665_v27 = vmul.f32 %v2661_v13, %v6882_v26 }
 0x649   :  { %v2670_v20 = vmax.f32 %v2668_v43, %v2669_v57  ;;  %v6358_v30 = vadd.f32 %v2665_v27, %v6883_v25  ;;  %v6891_v43 = vld [vmem:[#allocation17_spill] sm:$0xff] }
 0x64b   :  { %v2671_v34 = vrot.slane %v2670_v20, 2  ;;  %v2675_v38 = vsel %vm186_vm2, %v6358_v30, -inf }
 0x64c   :  { %v2676_v55 = vrot.slane %v2675_v38, 4 }
 0x64d   :  { %v2672_v60 = vmax.f32 %v2670_v20, %v2671_v34  ;;  %v5135_v20 = vld [vmem:[%s6729_s3] ss:$0 sm:$0xff] }
 0x64e   :  { %v2677_v5 = vmax.f32 %v2675_v38, %v2676_v55 }
 0x64f   :  { %v2673_v8 = vrot.slane %v2672_v60, 1 }
 0x650   :  { %v2678_v52 = vrot.slane %v2677_v5, 2 }
 0x651   :  { %v2674_v59 = vmax.f32 %v2672_v60, %v2673_v8 }
 0x652   :  { %v2679_v48 = vmax.f32 %v2677_v5, %v2678_v52 }
 0x653   :  { %v2682_v17 = vsub.f32 %v6348_v1, %v2674_v59 }
 0x654   :  { %v2680_v61 = vrot.slane %v2679_v48, 1 }
 0x655   :  { %v2684_v54 = vmul.f32 1.442695, %v2682_v17 }
 0x656   :  { %v2681_v36 = vmax.f32 %v2679_v48, %v2680_v61 }
 0x657   :  { %4980 = vpow2.f32 %v2684_v54  ;;  %v6892_v54 = vld [vmem:[#allocation10_spill] sm:$0xff] }
 0x658   :  { %v2683_v62 = vsub.f32 %v6358_v30, %v2681_v36 }
 0x65a   :  { %v2686_v35 = vmul.f32 1.442695, %v2683_v62  ;;  %v6893_v62 = vld [vmem:[#allocation8_spill] sm:$0xff] }
 0x65c   :  { %4982 = vpow2.f32 %v2686_v35 }
 0x661   :  { %v4981_v40 = vpop.eup %4980 }
 0x662   :  { %v2688_v51 = vsel %vm186_vm2, %v4981_v40, 0.0 }
 0x663   :  { %v2689_v14 = vrot.slane %v2688_v51, 4 }
 0x665   :  { %v2690_v31 = vadd.f32 %v2689_v14, %v2688_v51  ;;  %v6895_v51 = vld [vmem:[#allocation9_spill] sm:$0xff] }
 0x666   :  { %v4983_v39 = vpop.eup %4982 }
 0x667   :  { %v2691_v32 = vrot.slane %v2690_v31, 2  ;;  %v2695_v3 = vsel %vm186_vm2, %v4983_v39, 0.0 }
 0x668   :  { %v2696_v37 = vrot.slane %v2695_v3, 4 }
 0x669   :  { %v2692_v44 = vadd.f32 %v2691_v32, %v2690_v31  ;;  %v6896_v31 = vld [vmem:[#allocation26_spill] sm:$0xff]  ;;  %v6897_v32 = vld [vmem:[#allocation27_spill] sm:$0xff] }
 0x66a   :  { %v2697_v18 = vadd.f32 %v2696_v37, %v2695_v3  ;;  %v6898_v37 = vld [vmem:[#allocation28_spill] sm:$0xff] }
 0x66b   :  { %v2693_v56 = vrot.slane %v2692_v44, 1 }
 0x66c   :  { %v2698_v12 = vrot.slane %v2697_v18, 2 }
 0x66d   :  { %v2694_v45 = vadd.f32 %v2693_v56, %v2692_v44 }
 0x66e   :  { %v2699_v28 = vadd.f32 %v2698_v12, %v2697_v18  ;;  %v6899_v18 = vld [vmem:[#allocation23_spill] sm:$0xff] }
 0x66f   :  { %4984 = vrcp.f32 %v2694_v45 }
 0x670   :  { %v2700_v0 = vrot.slane %v2699_v28, 1 }
 0x672   :  { %v2701_v29 = vadd.f32 %v2700_v0, %v2699_v28 }
 0x674   :  { %4986 = vrcp.f32 %v2701_v29  ;;  %v6900_v29 = vld [vmem:[#allocation29_spill] sm:$0xff] }
 0x679   :  { %v4985_v19 = vpop.eup %4984 }
 0x67a   :  { %v2704_v22 = vmul.f32 %v4985_v19, %v4981_v40  ;;  %v6894_v40 = vld [vmem:[#allocation11_spill] sm:$0xff] }
 0x67c   :  { %4527 = vmatmul.mubr.msk.f32.vlgmr.msra.gmra.mrb[8].mxu1 %vm186_vm2, %v2704_v22  ;;  %v2852_v15 = vsel %vm186_vm2, %v2704_v22, 0.0  ;;  %v6901_v22 = vld [vmem:[#allocation24_spill] sm:$0xff] }
 0x67d   :  { %2853 = vadd.xlane.f32.xlu1 %v2852_v15  ;;  %4669 = vmatpush3.bf16.msra.mxu1 %v6884_v6 }
 0x67e   :  { %v4987_v11 = vpop.eup %4986  ;;  %4678 = vmatprep.subr.bf16.mxu1 %v6885_v53 }
 0x67f   :  { %v2705_v10 = vmul.f32 %v4987_v11, %v4983_v39 }
 0x681   :  { %4538 = vmatmul.mubr.msk.f32.vlgmr.msra.gmra.mrb[16].mxu0 %vm186_vm2, %v2705_v10  ;;  %v2855_v9 = vsel %vm186_vm2, %v2705_v10, 0.0 }
 0x682   :  { %4673 = vmatpush3.bf16.xpose.msk.msra.mxu0 %vm5314_vm3, %v6886_v63  ;;  %2856 = vadd.xlane.f32.xlu0 %v2855_v9 }
 0x683   :  { %4674 = vmatprep.subr.bf16.mxu0 %v6885_v53  ;;  %4555 = vmatprep.mubr.msk.f32.mxu0 %vm5187_vm1, %v6888_v21 }
 0x68a   :  { %4677 = vmatpush3.bf16.xpose.msk.msra.mxu0 %vm5314_vm3, %v6889_v7  ;;  %v6902_v7 = vld [vmem:[#allocation30_spill] sm:$0xff] }
 0x68b   :  { %4686 = vmatprep.subr.bf16.mxu0 %v6885_v53 }
 0x70a   :  { %v2854_v57 = vpop.xlane.xlu1 %2853 }
 0x70b   :  { %v2945_v27 = vadd.f32 1e-08, %v2854_v57  ;;  %v2941_v34 = vmul.f32 %v5135_v20, %v2854_v57 }
 0x70f   :  { %v2857_v13 = vpop.xlane.xlu0 %2856 }
 0x710   :  { %v2946_v26 = vadd.f32 1e-08, %v2857_v13  ;;  %v2942_v25 = vmul.f32 %v5135_v20, %v2857_v13 }
 0x712   :  { %4988 = vrcp.f32 %v2946_v26 }
 0x713   :  { %4990 = vrcp.f32 %v2945_v27 }
 0x71c   :  { %v4989_v5 = vpop.eup %4988 }
 0x71d   :  { %v4991_v52 = vpop.eup %4990 }
 0x74f   :  { %v2775_v4 = vpop.f32.mrb[8].mxu1 }
 0x750   :  { %v2858_v58 = vmul.f32 %v5134_v41, %v2775_v4  ;;  %v4528_v23 = vpop.f32.mrb[9].mxu1 }
 0x752   :  { %4544 = vmatprep.mubr.msk.f32.mxu1 %vm48_vm0, %v2858_v58 }
 0x754   :  { %v2848_v16 = vpop.f32.mrb[16].mxu0 }
 0x755   :  { %v2859_v33 = vmul.f32 %v5134_v41, %v2848_v16  ;;  %v4539_v47 = vpop.f32.mrb[17].mxu0  ;;  %v6903_v41 = vld [vmem:[#allocation31_spill] sm:$0xff] }
 0x757   :  { %4545 = vmatmul.mubr.msk.f32.vlgmr.msra.gmra.mrb[10].mxu1 %vm48_vm0, %v2859_v33 }
 0x758   :  { %4681 = vmatpush3.bf16.xpose.msk.msra.mxu1 %vm5314_vm3, %v6890_v24  ;;  %4566 = vmatprep.mubr.msk.f32.mxu1 %vm5187_vm1, %v6888_v21 }
 0x759   :  { %4682 = vmatprep.subr.bf16.mxu1 %v6885_v53 }
 0x760   :  { %4685 = vmatpush3.bf16.xpose.msk.msra.mxu1 %vm5314_vm3, %v6891_v43 }
 0x761   :  { %4692 = vmatprep.subr.bf16.mxu1 %v6885_v53 }
 0x82a   :  { %v4546_v38 = vpop.f32.mrb[10].mxu1 }
 0x82b   :  { %v2944_v55 = vadd.f32 %v4546_v38, %v2942_v25  ;;  %v2932_v60 = vpop.f32.mrb[11].mxu1  ;;  %v6904_v25 = vld [vmem:[#allocation32_spill] sm:$0xff] }
 0x82c   :  { %v2943_v8 = vadd.f32 %v2941_v34, %v2932_v60 }
 0x82d   :  { %v2950_v59 = vmul.f32 %v4989_v5, %v2944_v55 }
 0x82e   :  { %v2949_v48 = vmul.f32 %v4991_v52, %v2943_v8 }
 0x82f   :  { %4567 = vmatmul.mubr.msk.f32.vlgmr.msra.gmra.mrb[12].mxu1 %vm186_vm2, %v2950_v59  ;;  %v3098_v17 = vmul.f32 %v2950_v59, %v2950_v59 }
 0x830   :  { %4556 = vmatmul.mubr.msk.f32.vlgmr.msra.gmra.mrb[18].mxu0 %vm186_vm2, %v2949_v48  ;;  %v3097_v61 = vmul.f32 %v2949_v48, %v2949_v48  ;;  %4694 = vmatpush3.bf16.msra.mxu1 %v6892_v54 }
 0x831   :  { %v3102_v36 = vsel %vm186_vm2, %v3098_v17, 0.0  ;;  %4688 = vmatpush3.bf16.msra.mxu0 %v6893_v62  ;;  %4577 = vmatprep.mubr.msk.f32.mxu0 %vm5187_vm1, %v6888_v21  ;;  %v6905_v62 = vld [vmem:[#allocation33_spill] sm:$0xff] }
 0x832   :  { %3103 = vadd.xlane.f32.xlu1 %v3102_v36  ;;  %v3099_v35 = vsel %vm186_vm2, %v3097_v61, 0.0  ;;  %4689 = vmatprep.subr.bf16.mxu0 %v6885_v53 }
 0x833   :  { %3100 = vadd.xlane.f32.xlu0 %v3099_v35  ;;  %4695 = vmatprep.subr.bf16.mxu1 %v6885_v53 }
 0x834   :  { %4697 = vmatpush3.bf16.msra.mxu1 %v6894_v40  ;;  %4588 = vmatprep.mubr.msk.f32.mxu1 %vm5187_vm1, %v6888_v21 }
 0x835   :  { %4691 = vmatpush3.bf16.msra.mxu0 %v6895_v51 }
 0x836   :  { %4699 = vmatprep.subr.bf16.mxu0 %v6884_v6 }
 0x8bf   :  { %v6415_v14 = vpop.xlane.xlu1 %3103 }
 0x8c0   :  { %v3142_v39 = vrot.slane %v6415_v14, %v6896_v31  ;;  %v3146_v3 = vrot.slane %v6415_v14, %v6897_v32  ;;  %v3150_v19 = vrot.slane %v6415_v14, %v6900_v29  ;;  %v3154_v4 = vrot.slane %v6415_v14, %v6902_v7 }
 0x8c1   :  { %v3158_v34 = vrot.slane %v6415_v14, %v6904_v25  ;;  %v3162_v35 = vrot.slane %v6415_v14, %v6905_v62 }
 0x8c2   :  { %v3219_v44 = vmul.f32 %v3142_v39, %v6898_v37  ;;  %v3220_v56 = vmul.f32 %v3142_v39, %v6899_v18  ;;  %v3223_v12 = vmul.f32 %v3146_v3, %v6898_v37  ;;  %v3224_v45 = vmul.f32 %v3146_v3, %v6899_v18 }
 0x8c3   :  { %v3225_v15 = vmul.f32 %v3146_v3, %v6901_v22  ;;  %v3221_v53 = vmul.f32 %v3142_v39, %v6901_v22  ;;  %v3228_v9 = vmul.f32 %v3150_v19, %v6899_v18  ;;  %v3227_v2 = vmul.f32 %v3150_v19, %v6898_v37 }
 0x8c4   :  { %v3283_v28 = vmax.f32 %v3219_v44, 1e-16  ;;  %v3284_v0 = vmax.f32 %v3220_v56, 1e-16  ;;  %v3287_v11 = vmax.f32 %v3223_v12, 1e-16  ;;  %v3226_v58 = vmul.f32 %v3146_v3, %v6903_v41 }
 0x8c5   :  { %v3288_v10 = vmax.f32 %v3224_v45, 1e-16  ;;  %v3289_v63 = vmax.f32 %v3225_v15, 1e-16  ;;  %v3285_v21 = vmax.f32 %v3221_v53, 1e-16  ;;  %v3222_v16 = vmul.f32 %v3142_v39, %v6903_v41 }
 0x8c6   :  { %4992 = vrsqrt.f32 %v3283_v28  ;;  %v3292_v23 = vmax.f32 %v3228_v9, 1e-16  ;;  %v3291_v33 = vmax.f32 %v3227_v2, 1e-16  ;;  %v3231_v43 = vmul.f32 %v3154_v4, %v6898_v37 }
 0x8c7   :  { %4994 = vrsqrt.f32 %v3284_v0  ;;  %v3290_v13 = vmax.f32 %v3226_v58, 1e-16  ;;  %v3229_v57 = vmul.f32 %v3150_v19, %v6901_v22  ;;  %v3286_v26 = vmax.f32 %v3222_v16, 1e-16 }
 0x8c8   :  { %4996 = vrsqrt.f32 %v3287_v11  ;;  %v3230_v38 = vmul.f32 %v3150_v19, %v6903_v41  ;;  %v3295_v55 = vmax.f32 %v3231_v43, 1e-16  ;;  %v3232_v60 = vmul.f32 %v3154_v4, %v6899_v18  ;;  %v6906_v11 = vld [vmem:[#allocation34_spill] sm:$0xff]  ;;  %v6907_v43 = vld [vmem:[#allocation35_spill] sm:$0xff] }
 0x8c9   :  { %4998 = vrsqrt.f32 %v3288_v10  ;;  %v3293_v5 = vmax.f32 %v3229_v57, 1e-16  ;;  %v3235_v59 = vmul.f32 %v3158_v34, %v6898_v37  ;;  %v3233_v17 = vmul.f32 %v3154_v4, %v6901_v22 }
 0x8ca   :  { %5000 = vrsqrt.f32 %v3289_v63  ;;  %v3294_v48 = vmax.f32 %v3230_v38, 1e-16  ;;  %v3296_v61 = vmax.f32 %v3232_v60, 1e-16  ;;  %v3234_v40 = vmul.f32 %v3154_v4, %v6903_v41 }
 0x8cb   :  { %5002 = vrsqrt.f32 %v3285_v21  ;;  %v3299_v51 = vmax.f32 %v3235_v59, 1e-16  ;;  %v3236_v39 = vmul.f32 %v3158_v34, %v6899_v18  ;;  %v3297_v3 = vmax.f32 %v3233_v17, 1e-16 }
 0x8cc   :  { %5004 = vrsqrt.f32 %v3292_v23  ;;  %v3239_v12 = vmul.f32 %v3162_v35, %v6898_v37  ;;  %v3298_v45 = vmax.f32 %v3234_v40, 1e-16  ;;  %v3237_v28 = vmul.f32 %v3158_v34, %v6901_v22 }
 0x8cd   :  { %5006 = vrsqrt.f32 %v3291_v33  ;;  %v3300_v0 = vmax.f32 %v3236_v39, 1e-16  ;;  %v3166_v53 = vrot.slane %v6415_v14, %v6906_v11  ;;  %v3238_v10 = vmul.f32 %v3158_v34, %v6903_v41  ;;  %v6461_v34 = vpop.xlane.xlu0 %3100 }
 0x8ce   :  { %5008 = vrsqrt.f32 %v3290_v13  ;;  %v3303_v9 = vmax.f32 %v3239_v12, 1e-16  ;;  %v3240_v63 = vmul.f32 %v3162_v35, %v6899_v18  ;;  %v3301_v2 = vmax.f32 %v3237_v28, 1e-16 }
 0x8cf   :  { %5010 = vrsqrt.f32 %v3286_v26  ;;  %v3243_v58 = vmul.f32 %v3166_v53, %v6898_v37  ;;  %v3302_v23 = vmax.f32 %v3238_v10, 1e-16  ;;  %v3241_v16 = vmul.f32 %v3162_v35, %v6901_v22 }
 0x8d0   :  { %v4993_v47 = vpop.eup %4992  ;;  %5012 = vrsqrt.f32 %v3295_v55  ;;  %v3304_v33 = vmax.f32 %v3240_v63, 1e-16  ;;  %v6457_v13 = vrot.slane %v6415_v14, %v6907_v43  ;;  %v3242_v57 = vmul.f32 %v3162_v35, %v6903_v41 }
 0x8d1   :  { %v4995_v24 = vpop.eup %4994  ;;  %3540 = vperm.xlu1 %4710, %v4993_v47   ;;  %5014 = vrsqrt.f32 %v3293_v5  ;;  %v3307_v26 = vmax.f32 %v3243_v58, 1e-16  ;;  %v3110_v14 = vrot.slane %v6461_v34, %v6896_v31 }
 0x8d2   :  { %3543 = vperm.xlu0 %4711, %v4995_v24   ;;  %v4997_v27 = vpop.eup %4996  ;;  %5016 = vrsqrt.f32 %v3294_v48  ;;  %v3247_v60 = vmul.f32 %v6457_v13, %v6898_v37  ;;  %v3306_v5 = vmax.f32 %v3242_v57, 1e-16  ;;  %v6908_v37 = vld [vmem:[#allocation20_spill] sm:$0xff]  ;;  %v3248_v31 = vmul.f32 %v6457_v13, %v6899_v18 }
 0x8d3   :  { %v4999_v20 = vpop.eup %4998  ;;  %5018 = vrsqrt.f32 %v3296_v61  ;;  %v6470_v61 = vrot.slane %v6461_v34, %v6897_v32  ;;  %v3246_v32 = vmul.f32 %v3166_v53, %v6903_v41 }
 0x8d4   :  { %v5001_v8 = vpop.eup %5000  ;;  %5020 = vrsqrt.f32 %v3299_v51  ;;  %v3311_v17 = vmax.f32 %v3247_v60, 1e-16  ;;  %v6909_v51 = vld [vmem:[#allocation22_spill] sm:$0xff] }
 0x8d5   :  { %3552 = vperm.xlu1 %4710, %v4997_v27   ;;  %v5003_v52 = vpop.eup %5002  ;;  %5022 = vrsqrt.f32 %v3297_v3  ;;  %v3244_v27 = vmul.f32 %v3166_v53, %v6899_v18  ;;  %v3191_v39 = vmul.f32 %v6470_v61, %v6909_v51  ;;  %v3187_v63 = vmul.f32 %v3110_v14, %v6909_v51 }
 0x8d6   :  { %3555 = vperm.xlu0 %4711, %v4999_v20   ;;  %v5005_v54 = vpop.eup %5004  ;;  %5024 = vrsqrt.f32 %v3298_v45  ;;  %v3305_v20 = vmax.f32 %v3241_v16, 1e-16 }
 0x8d7   :  { %v5007_v36 = vpop.eup %5006  ;;  %5026 = vrsqrt.f32 %v3300_v0  ;;  %v6484_v0 = vrot.slane %v6461_v34, %v6900_v29  ;;  %v3255_v10 = vmax.f32 %v3191_v39, 1e-16  ;;  %v3192_v29 = vmul.f32 %v6470_v61, %v6908_v37 }
 0x8d8   :  { %v5009_v44 = vpop.eup %5008  ;;  %5028 = vrsqrt.f32 %v3303_v9  ;;  %v3310_v9 = vmax.f32 %v3246_v32, 1e-16 }
 0x8d9   :  { %3558 = vperm.xlu1 %4710, %v5001_v8   ;;  %v5011_v56 = vpop.eup %5010  ;;  %5030 = vrsqrt.f32 %v3301_v2  ;;  %v3245_v8 = vmul.f32 %v3166_v53, %v6901_v22 }
 0x8da   :  { %3546 = vperm.xlu0 %4711, %v5003_v52   ;;  %v5013_v19 = vpop.eup %5012  ;;  %5032 = vrsqrt.f32 %v3302_v23  ;;  %v3308_v52 = vmax.f32 %v3244_v27, 1e-16  ;;  %v3251_v23 = vmax.f32 %v3187_v63, 1e-16  ;;  %v3256_v27 = vmax.f32 %v3192_v29, 1e-16 }
 0x8db   :  { %v5015_v15 = vpop.eup %5014  ;;  %5034 = vrsqrt.f32 %v3304_v33 }
 0x8dc   :  { %v5017_v21 = vpop.eup %5016  ;;  %5036 = vrsqrt.f32 %v3307_v26 }
 0x8dd   :  { %3567 = vperm.xlu1 %4710, %v5005_v54   ;;  %v5019_v4 = vpop.eup %5018  ;;  %5038 = vrsqrt.f32 %v3305_v20  ;;  %v3188_v54 = vmul.f32 %v3110_v14, %v6908_v37 }
 0x8de   :  { %3564 = vperm.xlu0 %4711, %v5007_v36   ;;  %v5021_v47 = vpop.eup %5020  ;;  %5040 = vrsqrt.f32 %v3306_v5  ;;  %v3309_v36 = vmax.f32 %v3245_v8, 1e-16 }
 0x8df   :  { %v5023_v24 = vpop.eup %5022  ;;  %5042 = vrsqrt.f32 %v3308_v52  ;;  %v3252_v3 = vmax.f32 %v3188_v54, 1e-16 }
 0x8e0   :  { %v5025_v38 = vpop.eup %5024  ;;  %5044 = vrsqrt.f32 %v3311_v17 }
 0x8e1   :  { %3561 = vperm.xlu1 %4710, %v5009_v44   ;;  %v5027_v55 = vpop.eup %5026  ;;  %v3312_v44 = vmax.f32 %v3248_v31, 1e-16  ;;  %5046 = vrsqrt.f32 %v3309_v36 }
 0x8e2   :  { %3549 = vperm.xlu0 %4711, %v5011_v56   ;;  %v5029_v59 = vpop.eup %5028  ;;  %5048 = vrsqrt.f32 %v3252_v3 }
 0x8e3   :  { %v5031_v48 = vpop.eup %5030  ;;  %5050 = vrsqrt.f32 %v3312_v44 }
 0x8e4   :  { %v5033_v35 = vpop.eup %5032  ;;  %5052 = vrsqrt.f32 %v3255_v10 }
 0x8e5   :  { %3576 = vperm.xlu1 %4710, %v5013_v19   ;;  %v5035_v40 = vpop.eup %5034  ;;  %v6910_v19 = vld [vmem:[#allocation21_spill] sm:$0xff]  ;;  %5054 = vrsqrt.f32 %v3310_v9 }
 0x8e6   :  { %3570 = vperm.xlu0 %4711, %v5015_v15   ;;  %v5037_v56 = vpop.eup %5036  ;;  %v3189_v15 = vmul.f32 %v3110_v14, %v6910_v19  ;;  %v3193_v26 = vmul.f32 %v6470_v61, %v6910_v19  ;;  %v3197_v60 = vmul.f32 %v6484_v0, %v6910_v19 }
 0x8e7   :  { %v5039_v45 = vpop.eup %5038 }
 0x8e8   :  { %v5041_v2 = vpop.eup %5040  ;;  %v3253_v58 = vmax.f32 %v3189_v15, 1e-16  ;;  %v3257_v8 = vmax.f32 %v3193_v26, 1e-16  ;;  %v3261_v17 = vmax.f32 %v3197_v60, 1e-16 }
 0x8e9   :  { %3573 = vperm.xlu1 %4710, %v5017_v21   ;;  %v5043_v21 = vpop.eup %5042 }
 0x8ea   :  { %3579 = vperm.xlu0 %4711, %v5019_v4   ;;  %v3195_v4 = vmul.f32 %v6484_v0, %v6909_v51  ;;  %v5045_v16 = vpop.eup %5044  ;;  %5056 = vrsqrt.f32 %v3253_v58 }
 0x8eb   :  { %v5047_v33 = vpop.eup %5046  ;;  %5058 = vrsqrt.f32 %v3251_v23 }
 0x8ec   :  { %v3259_v57 = vmax.f32 %v3195_v4, 1e-16  ;;  %v5049_v20 = vpop.eup %5048 }
 0x8ed   :  { %3588 = vperm.xlu1 %4710, %v5021_v47   ;;  %v6911_v47 = vld [vmem:[#allocation25_spill] sm:$0xff] }
 0x8ee   :  { %3582 = vperm.xlu0 %4711, %v5023_v24   ;;  %v3190_v24 = vmul.f32 %v3110_v14, %v6911_v47  ;;  %5060 = vrsqrt.f32 %v3259_v57  ;;  %v3196_v14 = vmul.f32 %v6484_v0, %v6908_v37 }
 0x8ef   :  { %5062 = vrsqrt.f32 %v3256_v27 }
 0x8f0   :  { %v3254_v5 = vmax.f32 %v3190_v24, 1e-16  ;;  %v3260_v54 = vmax.f32 %v3196_v14, 1e-16  ;;  %v3134_v24 = vrot.slane %v6461_v34, %v6906_v11 }
 0x8f1   :  { %3585 = vperm.xlu1 %4710, %v5025_v38   ;;  %v5051_v38 = vpop.eup %5050 }
 0x8f2   :  { %3591 = vperm.xlu0 %4711, %v5027_v55   ;;  %v3122_v55 = vrot.slane %v6461_v34, %v6902_v7  ;;  %v5053_v52 = vpop.eup %5052  ;;  %5064 = vrsqrt.f32 %v3254_v5  ;;  %v3194_v7 = vmul.f32 %v6470_v61, %v6911_v47  ;;  %v3211_v60 = vmul.f32 %v3134_v24, %v6909_v51 }
 0x8f3   :  { %5066 = vrsqrt.f32 %v3257_v8 }
 0x8f4   :  { %5068 = vrsqrt.f32 %v3261_v17  ;;  %v3199_v3 = vmul.f32 %v3122_v55, %v6909_v51  ;;  %v3258_v32 = vmax.f32 %v3194_v7, 1e-16  ;;  %v3202_v9 = vmul.f32 %v3122_v55, %v6911_v47 }
 0x8f5   :  { %3600 = vperm.xlu1 %4710, %v5029_v59   ;;  %v5055_v59 = vpop.eup %5054  ;;  %5070 = vrsqrt.f32 %v3260_v54  ;;  %v3275_v17 = vmax.f32 %v3211_v60, 1e-16  ;;  %v3212_v7 = vmul.f32 %v3134_v24, %v6908_v37 }
 0x8f6   :  { %3594 = vperm.xlu0 %4711, %v5031_v48   ;;  %v3200_v48 = vmul.f32 %v3122_v55, %v6908_v37  ;;  %v5057_v31 = vpop.eup %5056  ;;  %v3266_v29 = vmax.f32 %v3202_v9, 1e-16 }
 0x8f7   :  { %v5059_v36 = vpop.eup %5058 }
 0x8f8   :  { %v3264_v39 = vmax.f32 %v3200_v48, 1e-16  ;;  %v5061_v44 = vpop.eup %5060 }
 0x8f9   :  { %3597 = vperm.xlu1 %4710, %v5033_v35   ;;  %v3126_v35 = vrot.slane %v6461_v34, %v6904_v25  ;;  %v3198_v25 = vmul.f32 %v6484_v0, %v6911_v47 }
 0x8fa   :  { %3603 = vperm.xlu0 %4711, %v5035_v40   ;;  %v3201_v40 = vmul.f32 %v3122_v55, %v6910_v19  ;;  %5072 = vrsqrt.f32 %v3264_v39  ;;  %v3213_v39 = vmul.f32 %v3134_v24, %v6910_v19 }
 0x8fb   :  { %v3204_v61 = vmul.f32 %v3126_v35, %v6908_v37  ;;  %5074 = vrsqrt.f32 %v3258_v32  ;;  %v3205_v23 = vmul.f32 %v3126_v35, %v6910_v19  ;;  %v3206_v57 = vmul.f32 %v3126_v35, %v6911_v47 }
 0x8fc   :  { %v3214_v32 = vmul.f32 %v3134_v24, %v6911_v47 }
 0x8fd   :  { %3612 = vperm.xlu1 %4710, %v5037_v56   ;;  %v5063_v56 = vpop.eup %5062  ;;  %v3268_v63 = vmax.f32 %v3204_v61, 1e-16  ;;  %v3270_v5 = vmax.f32 %v3206_v57, 1e-16  ;;  %v3277_v61 = vmax.f32 %v3213_v39, 1e-16 }
 0x8fe   :  { %3606 = vperm.xlu0 %4711, %v5039_v45   ;;  %v3265_v45 = vmax.f32 %v3201_v40, 1e-16  ;;  %v5065_v15 = vpop.eup %5064 }
 0x8ff   :  { %v5067_v10 = vpop.eup %5066 }
 0x900   :  { %5076 = vrsqrt.f32 %v3265_v45  ;;  %v5069_v4 = vpop.eup %5068 }
 0x901   :  { %3609 = vperm.xlu1 %4710, %v5041_v2   ;;  %v3203_v2 = vmul.f32 %v3126_v35, %v6909_v51  ;;  %v5071_v58 = vpop.eup %5070 }
 0x902   :  { %v6478_v12 = vpop.f32.mrb[12].mxu1  ;;  %3615 = vperm.xlu0 %4711, %v5043_v21   ;;  %v3262_v21 = vmax.f32 %v3198_v25, 1e-16 }
 0x903   :  { %v6480_v18 = vpop.f32.mrb[18].mxu0  ;;  %v4568_v28 = vpop.f32.mrb[13].mxu1 }
 0x904   :  { %v4557_v53 = vpop.f32.mrb[19].mxu0  ;;  %v3263_v28 = vmax.f32 %v3199_v3, 1e-16 }
 0x905   :  { %3624 = vperm.xlu1 %4710, %v5045_v16   ;;  %v3130_v53 = vrot.slane %v6461_v34, %v6905_v62  ;;  %v3267_v62 = vmax.f32 %v3203_v2, 1e-16  ;;  %v5073_v16 = vpop.eup %5072  ;;  %v3250_v2 = vmul.f32 %v6457_v13, %v6903_v41 }
 0x906   :  { %3618 = vperm.xlu0 %4711, %v5047_v33   ;;  %5078 = vrsqrt.f32 %v3263_v28  ;;  %v5075_v33 = vpop.eup %5074  ;;  %v3278_v28 = vmax.f32 %v3214_v32, 1e-16 }
 0x907   :  { %v3207_v0 = vmul.f32 %v3130_v53, %v6909_v51  ;;  %5080 = vrsqrt.f32 %v3268_v63  ;;  %v3208_v27 = vmul.f32 %v3130_v53, %v6908_v37  ;;  %v3209_v14 = vmul.f32 %v3130_v53, %v6910_v19 }
 0x908   :  { %5082 = vrsqrt.f32 %v3262_v21  ;;  %v3210_v48 = vmul.f32 %v3130_v53, %v6911_v47 }
 0x909   :  { %3447 = vperm.xlu1 %4710, %v5049_v20   ;;  %v3271_v26 = vmax.f32 %v3207_v0, 1e-16  ;;  %5084 = vrsqrt.f32 %v3266_v29  ;;  %v3269_v20 = vmax.f32 %v3205_v23, 1e-16  ;;  %v3272_v11 = vmax.f32 %v3208_v27, 1e-16 }
 0x90a   :  { %3627 = vperm.xlu0 %4711, %v5051_v38   ;;  %5086 = vrsqrt.f32 %v3267_v62  ;;  %v5077_v38 = vpop.eup %5076  ;;  %v3273_v54 = vmax.f32 %v3209_v14, 1e-16  ;;  %v3274_v40 = vmax.f32 %v3210_v48, 1e-16 }
 0x90b   :  { %5088 = vrsqrt.f32 %v3271_v26 }
 0x90c   :  { %5090 = vrsqrt.f32 %v3269_v20 }
 0x90d   :  { %3456 = vperm.xlu1 %4710, %v5053_v52   ;;  %5092 = vrsqrt.f32 %v3270_v5 }
 0x90e   :  { %3621 = vperm.xlu0 %4711, %v5055_v59   ;;  %v3138_v59 = vrot.slane %v6461_v34, %v6907_v43  ;;  %5094 = vrsqrt.f32 %v3272_v11  ;;  %v3276_v43 = vmax.f32 %v3212_v7, 1e-16 }
 0x90f   :  { %5096 = vrsqrt.f32 %v3275_v17 }
 0x910   :  { %v5079_v55 = vpop.eup %5078  ;;  %v3215_v35 = vmul.f32 %v3138_v59, %v6909_v51  ;;  %5098 = vrsqrt.f32 %v3273_v54  ;;  %v3218_v25 = vmul.f32 %v3138_v59, %v6911_v47 }
 0x911   :  { %3450 = vperm.xlu1 %4710, %v5057_v31   ;;  %v5081_v8 = vpop.eup %5080  ;;  %5100 = vrsqrt.f32 %v3274_v40 }
 0x912   :  { %3444 = vperm.xlu0 %4711, %v5059_v36   ;;  %v5083_v52 = vpop.eup %5082  ;;  %5102 = vrsqrt.f32 %v3276_v43  ;;  %v3282_v63 = vmax.f32 %v3218_v25, 1e-16 }
 0x913   :  { %v5085_v31 = vpop.eup %5084 }
 0x914   :  { %v5087_v36 = vpop.eup %5086 }
 0x915   :  { %3468 = vperm.xlu1 %4710, %v5061_v44   ;;  %v5089_v34 = vpop.eup %5088  ;;  %v3279_v44 = vmax.f32 %v3215_v35, 1e-16 }
 0x916   :  { %3459 = vperm.xlu0 %4711, %v5063_v56   ;;  %v5091_v3 = vpop.eup %5090  ;;  %v3216_v56 = vmul.f32 %v3138_v59, %v6908_v37  ;;  %v3249_v37 = vmul.f32 %v6457_v13, %v6901_v22 }
 0x917   :  { %v5093_v51 = vpop.eup %5092  ;;  %5104 = vrsqrt.f32 %v3279_v44 }
 0x918   :  { %v5095_v45 = vpop.eup %5094  ;;  %5106 = vrsqrt.f32 %v3277_v61 }
 0x919   :  { %3453 = vperm.xlu1 %4710, %v5065_v15   ;;  %v3217_v15 = vmul.f32 %v3138_v59, %v6910_v19  ;;  %v5097_v53 = vpop.eup %5096  ;;  %5108 = vrsqrt.f32 %v3278_v28  ;;  %v3313_v19 = vmax.f32 %v3249_v37, 1e-16 }
 0x91a   :  { %3462 = vperm.xlu0 %4711, %v5067_v10   ;;  %v3280_v10 = vmax.f32 %v3216_v56, 1e-16  ;;  %v5099_v9 = vpop.eup %5098 }
 0x91b   :  { %v3281_v47 = vmax.f32 %v3217_v15, 1e-16  ;;  %v5101_v21 = vpop.eup %5100 }
 0x91c   :  { %5110 = vrsqrt.f32 %v3280_v10 }
 0x91d   :  { %3474 = vperm.xlu1 %4710, %v5069_v4   ;;  %v5103_v4 = vpop.eup %5102  ;;  %5112 = vrsqrt.f32 %v3282_v63 }
 0x91e   :  { %3471 = vperm.xlu0 %4711, %v5071_v58   ;;  %v3314_v58 = vmax.f32 %v3250_v2, 1e-16  ;;  %5114 = vrsqrt.f32 %v3281_v47 }
 0x91f   :  { %5116 = vrsqrt.f32 %v3313_v19 }
 0x920   :  { %5118 = vrsqrt.f32 %v3314_v58 }
 0x921   :  { %3483 = vperm.xlu1 %4710, %v5073_v16   ;;  %v5105_v0 = vpop.eup %5104 }
 0x922   :  { %3465 = vperm.xlu0 %4711, %v5075_v33   ;;  %v5107_v29 = vpop.eup %5106 }
 0x923   :  { %v5109_v22 = vpop.eup %5108 }
 0x925   :  { %3486 = vperm.xlu1 %4710, %v5077_v38  }
 0x926   :  { %3480 = vperm.xlu0 %4711, %v5079_v55   ;;  %v5111_v23 = vpop.eup %5110 }
 0x927   :  { %v5113_v41 = vpop.eup %5112 }
 0x928   :  { %v5115_v13 = vpop.eup %5114 }
 0x929   :  { %3495 = vperm.xlu1 %4710, %v5081_v8   ;;  %v5117_v62 = vpop.eup %5116 }
 0x92a   :  { %3477 = vperm.xlu0 %4711, %v5083_v52   ;;  %v5119_v16 = vpop.eup %5118 }
 0x92d   :  { %3489 = vperm.xlu1 %4710, %v5085_v31  }
 0x92e   :  { %3492 = vperm.xlu0 %4711, %v5087_v36  }
 0x931   :  { %3504 = vperm.xlu1 %4710, %v5089_v34  }
 0x932   :  { %3498 = vperm.xlu0 %4711, %v5091_v3  }
 0x935   :  { %3501 = vperm.xlu1 %4710, %v5093_v51  }
 0x936   :  { %3507 = vperm.xlu0 %4711, %v5095_v45  }
 0x939   :  { %3516 = vperm.xlu1 %4710, %v5097_v53  }
 0x93a   :  { %3510 = vperm.xlu0 %4711, %v5099_v9  }
 0x93d   :  { %3513 = vperm.xlu1 %4710, %v5101_v21  }
 0x93e   :  { %3519 = vperm.xlu0 %4711, %v5103_v4  }
 0x941   :  { %3528 = vperm.xlu1 %4710, %v5105_v0  }
 0x942   :  { %3522 = vperm.xlu0 %4711, %v5107_v29  }
 0x945   :  { %3525 = vperm.xlu1 %4710, %v5109_v22  }
 0x946   :  { %3531 = vperm.xlu0 %4711, %v5111_v23  }
 0x949   :  { %3537 = vperm.xlu1 %4710, %v5113_v41  }
 0x94a   :  { %3534 = vperm.xlu0 %4711, %v5115_v13  }
 0x94d   :  { %3630 = vperm.xlu1 %4710, %v5117_v62  }
 0x94e   :  { %3633 = vperm.xlu0 %4711, %v5119_v16  }
 0x950   :  { %v3541_v33 = vpop.permute.xlu1 %3540 }
 0x951   :  { %v3544_v24 = vpop.permute.xlu0 %3543  ;;  %v3790_v57 = vrot.slane %v3541_v33, %v5382_v42 }
 0x952   :  { %v3794_v26 = vrot.slane %v3544_v24, %v5385_v46 }
 0x954   :  { %v3795_v27 = vsel %vm1049_vm4, %v3794_v26, %v3790_v57  ;;  %v3553_v20 = vpop.permute.xlu1 %3552 }
 0x955   :  { %v3556_v38 = vpop.permute.xlu0 %3555  ;;  %v3809_v55 = vrot.slane %v3553_v20, %v5382_v42 }
 0x956   :  { %v3813_v60 = vrot.slane %v3556_v38, %v5385_v46 }
 0x958   :  { %v3814_v5 = vsel %vm1049_vm4, %v3813_v60, %v3809_v55  ;;  %v3559_v14 = vpop.permute.xlu1 %3558 }
 0x959   :  { %v3547_v11 = vpop.permute.xlu0 %3546  ;;  %v3818_v8 = vrot.slane %v3559_v14, %v5388_v49 }
 0x95a   :  { %v3799_v52 = vrot.slane %v3547_v11, %v5388_v49 }
 0x95b   :  { %v3819_v59 = vsel %vm1056_vm5, %v3818_v8, %v3814_v5 }
 0x95c   :  { %v3800_v48 = vsel %vm1056_vm5, %v3799_v52, %v3795_v27  ;;  %v3568_v17 = vpop.permute.xlu1 %3567 }
 0x95d   :  { %v3565_v7 = vpop.permute.xlu0 %3564  ;;  %v3832_v54 = vrot.slane %v3568_v17, %v5385_v46 }
 0x95e   :  { %v3828_v31 = vrot.slane %v3565_v7, %v5382_v42 }
 0x960   :  { %v3833_v36 = vsel %vm1049_vm4, %v3832_v54, %v3828_v31  ;;  %v3562_v35 = vpop.permute.xlu1 %3561 }
 0x961   :  { %v3550_v40 = vpop.permute.xlu0 %3549  ;;  %v3823_v39 = vrot.slane %v3562_v35, %v5391_v50 }
 0x962   :  { %v3804_v43 = vrot.slane %v3550_v40, %v5391_v50 }
 0x963   :  { %v3824_v34 = vsel %vm1063_vm6, %v3823_v39, %v3819_v59 }
 0x964   :  { %v3805_v3 = vsel %vm1063_vm6, %v3804_v43, %v3800_v48  ;;  %v3577_v32 = vpop.permute.xlu1 %3576 }
 0x965   :  { %v3946_v44 = vsel %vm1350_vm7, %v3824_v34, %v3805_v3  ;;  %v3571_v56 = vpop.permute.xlu0 %3570  ;;  %v3847_v15 = vrot.slane %v3577_v32, %v5382_v42 }
 0x966   :  { %v3837_v61 = vrot.slane %v3571_v56, %v5388_v49 }
 0x968   :  { %v3838_v51 = vsel %vm1056_vm5, %v3837_v61, %v3833_v36  ;;  %v3574_v45 = vpop.permute.xlu1 %3573 }
 0x969   :  { %v3580_v25 = vpop.permute.xlu0 %3579  ;;  %v3842_v28 = vrot.slane %v3574_v45, %v5391_v50 }
 0x96a   :  { %v3851_v10 = vrot.slane %v3580_v25, %v5385_v46 }
 0x96b   :  { %v3843_v53 = vsel %vm1063_vm6, %v3842_v28, %v3838_v51 }
 0x96c   :  { %v3852_v9 = vsel %vm1049_vm4, %v3851_v10, %v3847_v15  ;;  %v3947_v37 = vsel %vm1352_vm8, %v3843_v53, %v3946_v44  ;;  %v3589_v63 = vpop.permute.xlu1 %3588 }
 0x96d   :  { %v3583_v2 = vpop.permute.xlu0 %3582  ;;  %v3866_v0 = vrot.slane %v3589_v63, %v5382_v42 }
 0x96e   :  { %v3856_v47 = vrot.slane %v3583_v2, %v5388_v49 }
 0x970   :  { %v3857_v21 = vsel %vm1056_vm5, %v3856_v47, %v3852_v9  ;;  %v3586_v4 = vpop.permute.xlu1 %3585 }
 0x971   :  { %v3592_v19 = vpop.permute.xlu0 %3591  ;;  %v3861_v58 = vrot.slane %v3586_v4, %v5391_v50 }
 0x972   :  { %v3870_v29 = vrot.slane %v3592_v19, %v5385_v46 }
 0x973   :  { %v3862_v22 = vsel %vm1063_vm6, %v3861_v58, %v3857_v21 }
 0x974   :  { %v3871_v23 = vsel %vm1049_vm4, %v3870_v29, %v3866_v0  ;;  %v3948_v41 = vsel %vm1354_vm9, %v3862_v22, %v3947_v37  ;;  %v3601_v13 = vpop.permute.xlu1 %3600 }
 0x975   :  { %v3595_v62 = vpop.permute.xlu0 %3594  ;;  %v3885_v27 = vrot.slane %v3601_v13, %v5382_v42 }
 0x976   :  { %v3875_v16 = vrot.slane %v3595_v62, %v5388_v49 }
 0x978   :  { %v3876_v33 = vsel %vm1056_vm5, %v3875_v16, %v3871_v23  ;;  %v3598_v24 = vpop.permute.xlu1 %3597 }
 0x979   :  { %v3604_v57 = vpop.permute.xlu0 %3603  ;;  %v3880_v26 = vrot.slane %v3598_v24, %v5391_v50 }
 0x97a   :  { %v3889_v20 = vrot.slane %v3604_v57, %v5385_v46 }
 0x97b   :  { %v3881_v38 = vsel %vm1063_vm6, %v3880_v26, %v3876_v33 }
 0x97c   :  { %v3890_v55 = vsel %vm1049_vm4, %v3889_v20, %v3885_v27  ;;  %v3949_v60 = vsel %vm1356_vm10, %v3881_v38, %v3948_v41  ;;  %v3613_v5 = vpop.permute.xlu1 %3612 }
 0x97d   :  { %v3607_v14 = vpop.permute.xlu0 %3606  ;;  %v3904_v17 = vrot.slane %v3613_v5, %v5382_v42 }
 0x97e   :  { %v3894_v11 = vrot.slane %v3607_v14, %v5388_v49 }
 0x980   :  { %v3895_v8 = vsel %vm1056_vm5, %v3894_v11, %v3890_v55  ;;  %v3610_v52 = vpop.permute.xlu1 %3609 }
 0x981   :  { %v3616_v59 = vpop.permute.xlu0 %3615  ;;  %v3899_v48 = vrot.slane %v3610_v52, %v5391_v50 }
 0x982   :  { %v3908_v7 = vrot.slane %v3616_v59, %v5385_v46 }
 0x983   :  { %v3900_v54 = vsel %vm1063_vm6, %v3899_v48, %v3895_v8 }
 0x984   :  { %v3909_v31 = vsel %vm1049_vm4, %v3908_v7, %v3904_v17  ;;  %v3950_v36 = vsel %vm1358_vm11, %v3900_v54, %v3949_v60  ;;  %v3625_v35 = vpop.permute.xlu1 %3624 }
 0x985   :  { %v3619_v40 = vpop.permute.xlu0 %3618  ;;  %v3923_v32 = vrot.slane %v3625_v35, %v5382_v42 }
 0x986   :  { %v3913_v39 = vrot.slane %v3619_v40, %v5388_v49 }
 0x988   :  { %v3914_v43 = vsel %vm1056_vm5, %v3913_v39, %v3909_v31  ;;  %v3448_v34 = vpop.permute.xlu1 %3447 }
 0x989   :  { %v3628_v3 = vpop.permute.xlu0 %3627  ;;  %v3642_v20 = vrot.slane %v3448_v34, %v5385_v46 }
 0x98a   :  { %v3927_v44 = vrot.slane %v3628_v3, %v5385_v46 }
 0x98c   :  { %v6592_v56 = vsel %vm1049_vm4, %v3927_v44, %v3923_v32  ;;  %v3457_v61 = vpop.permute.xlu1 %3456 }
 0x98d   :  { %v3622_v51 = vpop.permute.xlu0 %3621  ;;  %v3657_v38 = vrot.slane %v3457_v61, %v5382_v42 }
 0x98e   :  { %v3918_v45 = vrot.slane %v3622_v51, %v5391_v50 }
 0x990   :  { %v3919_v25 = vsel %vm1063_vm6, %v3918_v45, %v3914_v43  ;;  %v3451_v28 = vpop.permute.xlu1 %3450 }
 0x991   :  { %v6597_v15 = vsel %vm1360_vm13, %v3919_v25, %v3950_v36  ;;  %v3445_v10 = vpop.permute.xlu0 %3444  ;;  %v3647_v5 = vrot.slane %v3451_v28, %v5388_v49 }
 0x992   :  { %v3638_v24 = vrot.slane %v3445_v10, %v5382_v42 }
 0x994   :  { %v3469_v53 = vpop.permute.xlu1 %3468  ;;  %v3643_v11 = vsel %vm1049_vm4, %v3642_v20, %v3638_v24 }
 0x995   :  { %v3460_v9 = vpop.permute.xlu0 %3459  ;;  %v3676_v52 = vrot.slane %v3469_v53, %v5382_v42  ;;  %v3648_v35 = vsel %vm1056_vm5, %v3647_v5, %v3643_v11 }
 0x996   :  { %v3661_v57 = vrot.slane %v3460_v9, %v5385_v46 }
 0x998   :  { %v3454_v37 = vpop.permute.xlu1 %3453  ;;  %v3662_v8 = vsel %vm1049_vm4, %v3661_v57, %v3657_v38 }
 0x999   :  { %v3463_v63 = vpop.permute.xlu0 %3462  ;;  %v3652_v59 = vrot.slane %v3454_v37, %v5391_v50 }
 0x99a   :  { %v3666_v27 = vrot.slane %v3463_v63, %v5388_v49 }
 0x99b   :  { %v3653_v39 = vsel %vm1063_vm6, %v3652_v59, %v3648_v35 }
 0x99c   :  { %v3475_v2 = vpop.permute.xlu1 %3474  ;;  %v3667_v17 = vsel %vm1056_vm5, %v3666_v27, %v3662_v8 }
 0x99d   :  { %v3472_v47 = vpop.permute.xlu0 %3471  ;;  %v3685_v7 = vrot.slane %v3475_v2, %v5388_v49 }
 0x99e   :  { %v3680_v55 = vrot.slane %v3472_v47, %v5385_v46 }
 0x9a0   :  { %v3484_v21 = vpop.permute.xlu1 %3483  ;;  %v3681_v54 = vsel %vm1049_vm4, %v3680_v55, %v3676_v52 }
 0x9a1   :  { %v3466_v4 = vpop.permute.xlu0 %3465  ;;  %v3699_v43 = vrot.slane %v3484_v21, %v5385_v46  ;;  %v3686_v32 = vsel %vm1056_vm5, %v3685_v7, %v3681_v54 }
 0x9a2   :  { %v3671_v60 = vrot.slane %v3466_v4, %v5391_v50 }
 0x9a4   :  { %v3487_v19 = vpop.permute.xlu1 %3486  ;;  %v3672_v31 = vsel %vm1063_vm6, %v3671_v60, %v3667_v17 }
 0x9a5   :  { %v3481_v58 = vpop.permute.xlu0 %3480  ;;  %v3939_v44 = vsel %vm1350_vm7, %v3672_v31, %v3653_v39  ;;  %v3704_v61 = vrot.slane %v3487_v19, %v5388_v49 }
 0x9a6   :  { %v3695_v36 = vrot.slane %v3481_v58, %v5382_v42 }
 0x9a8   :  { %v3496_v0 = vpop.permute.xlu1 %3495  ;;  %v3700_v45 = vsel %vm1049_vm4, %v3699_v43, %v3695_v36 }
 0x9a9   :  { %v3478_v29 = vpop.permute.xlu0 %3477  ;;  %v3718_v53 = vrot.slane %v3496_v0, %v5385_v46 }
 0x9aa   :  { %v3690_v34 = vrot.slane %v3478_v29, %v5391_v50  ;;  %v3705_v29 = vsel %vm1056_vm5, %v3704_v61, %v3700_v45 }
 0x9ac   :  { %v3490_v22 = vpop.permute.xlu1 %3489  ;;  %v3691_v47 = vsel %vm1063_vm6, %v3690_v34, %v3686_v32 }
 0x9ad   :  { %v3493_v23 = vpop.permute.xlu0 %3492  ;;  %v3709_v25 = vrot.slane %v3490_v22, %v5391_v50  ;;  %v3940_v24 = vsel %vm1352_vm8, %v3691_v47, %v3939_v44 }
 0x9ae   :  { %v3714_v51 = vrot.slane %v3493_v23, %v5382_v42 }
 0x9b0   :  { %v3505_v41 = vpop.permute.xlu1 %3504  ;;  %v3719_v0 = vsel %vm1049_vm4, %v3718_v53, %v3714_v51 }
 0x9b1   :  { %v3499_v13 = vpop.permute.xlu0 %3498  ;;  %v3733_v21 = vrot.slane %v3505_v41, %v5382_v42 }
 0x9b2   :  { %v3723_v28 = vrot.slane %v3499_v13, %v5388_v49  ;;  %v3710_v13 = vsel %vm1063_vm6, %v3709_v25, %v3705_v29 }
 0x9b4   :  { %v3502_v62 = vpop.permute.xlu1 %3501 }
 0x9b5   :  { %v3508_v16 = vpop.permute.xlu0 %3507  ;;  %v3728_v9 = vrot.slane %v3502_v62, %v5391_v50  ;;  %v3724_v62 = vsel %vm1056_vm5, %v3723_v28, %v3719_v0 }
 0x9b6   :  { %v3737_v10 = vrot.slane %v3508_v16, %v5385_v46 }
 0x9b7   :  { %v3729_v57 = vsel %vm1063_vm6, %v3728_v9, %v3724_v62 }
 0x9b8   :  { %v3517_v33 = vpop.permute.xlu1 %3516  ;;  %v3738_v16 = vsel %vm1049_vm4, %v3737_v10, %v3733_v21 }
 0x9b9   :  { %v3511_v26 = vpop.permute.xlu0 %3510  ;;  %v3752_v22 = vrot.slane %v3517_v33, %v5382_v42 }
 0x9ba   :  { %v3742_v37 = vrot.slane %v3511_v26, %v5388_v49 }
 0x9bc   :  { %v3514_v14 = vpop.permute.xlu1 %3513  ;;  %v3743_v26 = vsel %vm1056_vm5, %v3742_v37, %v3738_v16 }
 0x9bd   :  { %v3520_v48 = vpop.permute.xlu0 %3519  ;;  %v3747_v4 = vrot.slane %v3514_v14, %v5391_v50 }
 0x9be   :  { %v3756_v63 = vrot.slane %v3520_v48, %v5385_v46 }
 0x9bf   :  { %v3748_v33 = vsel %vm1063_vm6, %v3747_v4, %v3743_v26 }
 0x9c0   :  { %v3529_v40 = vpop.permute.xlu1 %3528  ;;  %v3757_v27 = vsel %vm1049_vm4, %v3756_v63, %v3752_v22 }
 0x9c1   :  { %v3523_v3 = vpop.permute.xlu0 %3522  ;;  %v3771_v55 = vrot.slane %v3529_v40, %v5382_v42 }
 0x9c2   :  { %v3761_v19 = vrot.slane %v3523_v3, %v5388_v49 }
 0x9c4   :  { %v3526_v2 = vpop.permute.xlu1 %3525  ;;  %v3762_v38 = vsel %vm1056_vm5, %v3761_v19, %v3757_v27 }
 0x9c5   :  { %v3532_v58 = vpop.permute.xlu0 %3531  ;;  %v3766_v23 = vrot.slane %v3526_v2, %v5391_v50 }
 0x9c6   :  { %v3775_v41 = vrot.slane %v3532_v58, %v5385_v46  ;;  %v3941_v46 = vsel %vm1354_vm9, %v3710_v13, %v3940_v24 }
 0x9c7   :  { %v3767_v14 = vsel %vm1063_vm6, %v3766_v23, %v3762_v38  ;;  %v3942_v8 = vsel %vm1356_vm10, %v3729_v57, %v3941_v46 }
 0x9c8   :  { %v3538_v20 = vpop.permute.xlu1 %3537  ;;  %v3776_v52 = vsel %vm1049_vm4, %v3775_v41, %v3771_v55  ;;  %v3943_v59 = vsel %vm1358_vm11, %v3748_v33, %v3942_v8 }
 0x9c9   :  { %v3535_v60 = vpop.permute.xlu0 %3534  ;;  %v3785_v5 = vrot.slane %v3538_v20, %v5391_v50  ;;  %v3944_v42 = vsel %vm1360_vm13, %v3767_v14, %v3943_v59 }
 0x9ca   :  { %v3780_v11 = vrot.slane %v3535_v60, %v5388_v49 }
 0x9cc   :  { %v3781_v48 = vsel %vm1056_vm5, %v3780_v11, %v3776_v52  ;;  %v3631_v17 = vpop.permute.xlu1 %3630 }
 0x9cd   :  { %v3786_v7 = vsel %vm1063_vm6, %v3785_v5, %v3781_v48  ;;  %v3634_v54 = vpop.permute.xlu0 %3633  ;;  %v3932_v31 = vrot.slane %v3631_v17, %v5388_v49  ;;  %v5136_v5 = vld [vmem:[%s6727_s1] sm:$0xff] }
 0x9ce   :  { %v3945_v36 = vsel %vm1362_vm12, %v3786_v7, %v3944_v42  ;;  %v3937_v35 = vrot.slane %v3634_v54, %v5391_v50 }
 0x9cf   :  { %v3955_v40 = vmul.f32 %v3945_v36, %v6480_v18  ;;  %v3933_v39 = vsel %vm1056_vm5, %v3932_v31, %v6592_v56 }
 0x9d0   :  { %v3938_v43 = vsel %vm1063_vm6, %v3937_v35, %v3933_v39 }
 0x9d1   :  { %v3957_v34 = vadd.f32 %v3955_v40, %v6348_v1  ;;  %v3952_v3 = vsel %vm1362_vm12, %v3938_v43, %v6597_v15 }
 0x9d2   :  { %v3956_v32 = vmul.f32 %v3952_v3, %v6478_v12 }
 0x9d3   :  { %v3959_v49 = vsel %vm186_vm2, %v3957_v34, -inf }
 0x9d4   :  { %v3960_v44 = vrot.slane %v3959_v49, 4  ;;  %v3958_v61 = vadd.f32 %v3956_v32, %v6358_v30 }
 0x9d6   :  { %v3961_v50 = vmax.f32 %v3959_v49, %v3960_v44  ;;  %v3966_v18 = vsel %vm186_vm2, %v3958_v61, -inf }
 0x9d7   :  { %v3967_v51 = vrot.slane %v3966_v18, 4 }
 0x9d8   :  { %v3962_v45 = vrot.slane %v3961_v50, 2 }
 0x9d9   :  { %v3968_v56 = vmax.f32 %v3966_v18, %v3967_v51 }
 0x9da   :  { %v3963_v25 = vmax.f32 %v3961_v50, %v3962_v45 }
 0x9db   :  { %v3969_v28 = vrot.slane %v3968_v56, 2 }
 0x9dc   :  { %v3964_v10 = vrot.slane %v3963_v25, 1 }
 0x9dd   :  { %v3970_v1 = vmax.f32 %v3968_v56, %v3969_v28 }
 0x9de   :  { %v3965_v53 = vmax.f32 %v3963_v25, %v3964_v10 }
 0x9df   :  { %v3971_v9 = vrot.slane %v3970_v1, 1 }
 0x9e0   :  { %v3973_v15 = vsub.f32 %v3957_v34, %v3965_v53 }
 0x9e1   :  { %v3972_v37 = vmax.f32 %v3970_v1, %v3971_v9 }
 0x9e2   :  { %v3975_v12 = vmul.f32 1.442695, %v3973_v15 }
 0x9e3   :  { %v3974_v63 = vsub.f32 %v3958_v61, %v3972_v37 }
 0x9e4   :  { %5120 = vpow2.f32 %v3975_v12 }
 0x9e5   :  { %v3977_v2 = vmul.f32 1.442695, %v3974_v63 }
 0x9e7   :  { %5122 = vpow2.f32 %v3977_v2 }
 0x9ee   :  { %v5121_v30 = vpop.eup %5120 }
 0x9ef   :  { %v3979_v47 = vsel %vm186_vm2, %v5121_v30, 0.0 }
 0x9f0   :  { %v3980_v21 = vrot.slane %v3979_v47, 4 }
 0x9f1   :  { %v5123_v4 = vpop.eup %5122 }
 0x9f2   :  { %v3981_v19 = vadd.f32 %v3980_v21, %v3979_v47  ;;  %v3986_v58 = vsel %vm186_vm2, %v5123_v4, 0.0 }
 0x9f3   :  { %v3987_v29 = vrot.slane %v3986_v58, 4 }
 0x9f4   :  { %v3982_v0 = vrot.slane %v3981_v19, 2 }
 0x9f5   :  { %v3988_v22 = vadd.f32 %v3987_v29, %v3986_v58 }
 0x9f6   :  { %v3983_v23 = vadd.f32 %v3982_v0, %v3981_v19 }
 0x9f7   :  { %v3989_v13 = vrot.slane %v3988_v22, 2 }
 0x9f8   :  { %v3984_v62 = vrot.slane %v3983_v23, 1 }
 0x9f9   :  { %v3990_v16 = vadd.f32 %v3989_v13, %v3988_v22 }
 0x9fa   :  { %v3985_v41 = vadd.f32 %v3984_v62, %v3983_v23 }
 0x9fb   :  { %v3991_v24 = vrot.slane %v3990_v16, 1 }
 0x9fc   :  { %5124 = vrcp.f32 %v3985_v41 }
 0x9fd   :  { %v3992_v57 = vadd.f32 %v3991_v24, %v3990_v16 }
 0x9ff   :  { %5126 = vrcp.f32 %v3992_v57 }
 0xa06   :  { %v5125_v26 = vpop.eup %5124 }
 0xa07   :  { %v3995_v27 = vmul.f32 %v5125_v26, %v5121_v30 }
 0xa09   :  { %v5127_v20 = vpop.eup %5126  ;;  %4578 = vmatmul.mubr.msk.f32.vlgmr.msra.gmra.mrb[20].mxu0 %vm186_vm2, %v3995_v27  ;;  %4248 = vst.msk [vmem:[#allocation4] sm:$0xff] %vm186_vm2, %v3995_v27  ;;  %v4143_v33 = vsel %vm186_vm2, %v3995_v27, 0.0 }
 0xa0a   :  { %4144 = vadd.xlane.f32.xlu1 %v4143_v33  ;;  %v3996_v38 = vmul.f32 %v5127_v20, %v5123_v4  ;;  %4701 = vmatpush3.bf16.msra.mxu0 %v6884_v6 }
 0xa0c   :  { %4589 = vmatmul.mubr.msk.f32.vlgmr.msra.gmra.mrb[14].mxu1 %vm186_vm2, %v3996_v38  ;;  %4249 = vst.msk [vmem:[#allocation4 + $0x8] sm:$0xff] %vm186_vm2, %v3996_v38  ;;  %v4146_v55 = vsel %vm186_vm2, %v3996_v38, 0.0 }
 0xa0d   :  { %4147 = vadd.xlane.f32.xlu0 %v4146_v55 }
 0xadc   :  { %v4066_v60 = vpop.f32.mrb[20].mxu0 }
 0xadd   :  { %v4149_v46 = vmul.f32 %v5136_v5, %v4066_v60  ;;  %v4579_v14 = vpop.f32.mrb[21].mxu0 }
 0xadf   :  { %4595 = vmatprep.mubr.msk.f32.mxu0 %vm48_vm0, %v4149_v46  ;;  %v4139_v11 = vpop.f32.mrb[14].mxu1 }
 0xae0   :  { %v4150_v8 = vmul.f32 %v5136_v5, %v4139_v11  ;;  %v4590_v52 = vpop.f32.mrb[15].mxu1 }
 0xae2   :  { %4596 = vmatmul.mubr.msk.f32.vlgmr.msra.gmra.mrb[22].mxu0 %vm48_vm0, %v4150_v8 }
 0xae3   :  { %5149 = shalt.err (!%p5146_p4)
}
 0xae4   :  { %s5150_s17 = scalar_lea.hbm %s6733_s7, 256 }
 0xae5   :  { %p5151_p5 = scmp.ne.s32.totalorder %s6733_s7, %s5150_s17  ;;  %p5154_p6 = scmp.lt.u32.totalorder %s5150_s17, %s6733_s7 }
 0xae7   :  { %p5156_p7 = pnand %p5154_p6, %p5151_p5 }
 0xae9   :  { %5159 = shalt.err (!%p5156_p7)
}
 0xaea   :  { %s5191_s22 = smov 128   ;;  %s5192_s23 = smov 8   ;;  %v4148_v6 = vpop.xlane.xlu0 %4147  ;;  %v4145_v59 = vpop.xlane.xlu1 %4144  ;;  %v5137_v42 = vld [vmem:[%s6729_s3] ss:$0 sm:$0xff]  ;;  %v6912_v32 = vld [vmem:[#allocation18_spill] sm:$0xff]  ;;  %v6913_v44 = vld [vmem:[#allocation19_spill] sm:$0xff] }
 0xaeb   :  { %4273 = dma.vmem_to_hbm [thread:$0]  %s4268_s14, 256, %s6733_s7, [#allocation5], %s5191_s22, %s5191_s22, %s5192_s23   ;;  %v4237_v48 = vadd.f32 1e-08, %v4148_v6  ;;  %v4236_v17 = vadd.f32 1e-08, %v4145_v59  ;;  %v4233_v7 = vmul.f32 %v5137_v42, %v4148_v6  ;;  %v4232_v54 = vmul.f32 %v5137_v42, %v4145_v59 }
 0xaec   :  { %s5193_s7 = smov [#allocation2]  }
 0xaed   :  { %5128 = vrcp.f32 %v4237_v48  ;;  %s4255_s5 = sshll.u32 %s5193_s7, 4  ;;  %s4256_s5 = int_to_ptr.vmem [resolvable:$true] %s4255_s5 }
 0xaee   :  { %5130 = vrcp.f32 %v4236_v17  ;;  %s5160_s3 = scalar_lea.vmem %s4256_s5, 256  ;;  %p5165_p9 = scmp.lt.s32.totalorder %s4256_s5, %s4256_s5 }
 0xaef   :  { %p5161_p8 = scmp.ne.s32.totalorder %s4256_s5, %s5160_s3  ;;  %p5166_p10 = scmp.lt.s32.totalorder %s5160_s3, %s5160_s3 }
 0xaf1   :  { %p5167_p11 = por %p5166_p10, %p5165_p9 }
 0xaf3   :  { %p5168_p12 = pnand %p5167_p11, %p5161_p8 }
 0xaf7   :  { %v5129_v40 = vpop.eup %5128 }
 0xaf8   :  { %v5131_v43 = vpop.eup %5130 }
 0xbb5   :  { %v4597_v31 = vpop.f32.mrb[22].mxu0 }
 0xbb6   :  { %v4235_v36 = vadd.f32 %v4597_v31, %v4233_v7  ;;  %v4223_v35 = vpop.f32.mrb[23].mxu0 }
 0xbb7   :  { %v4234_v39 = vadd.f32 %v4232_v54, %v4223_v35 }
 0xbb8   :  { %v4241_v34 = vmul.f32 %v5129_v40, %v4235_v36 }
 0xbb9   :  { %v4240_v3 = vmul.f32 %v5131_v43, %v4234_v39 }
 0xbba   :  { %v4243_v49 = vadd.f32 %v4241_v34, %v6912_v32 }
 0xbbb   :  { %v4242_v61 = vadd.f32 %v4240_v3, %v6913_v44 }
 0xbbc   :  { %v4245_v50 = vmax.f32 %v4243_v49, 0.0 }
 0xbbd   :  { %v4244_v18 = vmax.f32 %v4242_v61, 0.0 }
 0xbbe   :  { %4247 = vst.msk [vmem:[#allocation2 + $0x8] sm:$0xff] %vm186_vm2, %v4245_v50 }
 0xbbf   :  { %4246 = vst.msk [vmem:[#allocation2] sm:$0xff] %vm186_vm2, %v4244_v18 }
 0xbc0   :  { %5171 = shalt.err (!%p5168_p12)
}
 0xbc1   :  { %s5172_s28 = scalar_lea.hbm %s6732_s6, 256 }
 0xbc2   :  { %p5173_p13 = scmp.ne.s32.totalorder %s6732_s6, %s5172_s28  ;;  %p5176_p0 = scmp.lt.u32.totalorder %s5172_s28, %s6732_s6 }
 0xbc4   :  { %p5178_p1 = pnand %p5176_p0, %p5173_p13 }
 0xbc6   :  { %5181 = shalt.err (!%p5178_p1)
}
 0xbc7   :  { %4261 = dma.vmem_to_hbm [thread:$0]  %s4256_s5, 256, %s6732_s6, [#allocation3], %s5191_s22, %s5191_s22, %s5192_s23  }
 0xbc8   :  { %5182 = dma.done.wait [#allocation3], 256  }
 0xbc9   :  { %5183 = vsyncadd [#allocation3], 4294967040 }
 0xbca   :  { %5184 = dma.done.wait [#allocation5], 256  }
 0xbcb   :  { %5185 = vsyncadd [#allocation5], 4294967040 }
 0xbcc   :  { %4280 = vsyncpa [#allocation3], 1 }
 0xbcd   :  { %4281 = vsyncpa [#allocation5], 1 }

</bundles_post_ra>
